<compile_context>
chip_gen: v7x
topology: tpu7x:2x2x1
jax: 0.10.0
libtpu: 0.0.40
codegen_flags: <defaults>
</compile_context>

<pallas_src>
import functools

import jax
import jax.numpy as jnp
from jax.experimental import pallas as pl
from jax.experimental.pallas import tpu as pltpu

BN_EPS = 1e-5


# ----------------------------- fused MBConv kernel ---------------------------

def _mbconv_kernel(*refs, ksize, stride, padding, has_expansion,
                   with_attention, apply_residual):
    refs = list(refs)
    idx = 0

    def nxt():
        nonlocal idx
        r = refs[idx]
        idx += 1
        return r

    x_ref = nxt()
    if has_expansion:
        w_exp_ref, exp_s_ref, exp_b_ref = nxt(), nxt(), nxt()
    w_dw_ref, dw_s_ref, dw_b_ref = nxt(), nxt(), nxt()
    if with_attention:
        w_se1_ref, b_se1_ref, w_se2_ref, b_se2_ref = nxt(), nxt(), nxt(), nxt()
    w_pj_ref, pj_s_ref, pj_b_ref = nxt(), nxt(), nxt()
    o_ref = nxt()
    xpad_ref = nxt()          # VMEM scratch: (Hp, Wp, Cmid) f32

    _, H, W, Cin = x_ref.shape
    Hp, Wp, Cmid = xpad_ref.shape
    _, Ho, Wo, Cout = o_ref.shape

    x = x_ref[0].astype(jnp.float32)          # (H, W, Cin)
    x2d = x.reshape(H * W, Cin)               # cheap retile (minor dim kept)

    # ---- expansion: 1x1 conv + BN + ReLU (kept in VMEM) ----
    if has_expansion:
        h2d = jnp.dot(x2d, w_exp_ref[...], preferred_element_type=jnp.float32)
        h2d = h2d * exp_s_ref[...] + exp_b_ref[...]
        h2d = jnp.maximum(h2d, 0.0)
    else:
        h2d = x2d
    h = h2d.reshape(H, W, Cmid)

    # ---- zero-pad into VMEM scratch (no HBM-side jnp.pad copy) ----
    if padding > 0:
        xpad_ref[...] = jnp.zeros_like(xpad_ref)
        xpad_ref[pl.ds(padding, H), pl.ds(padding, W), :] = h
    else:
        xpad_ref[...] = h
    xpad = xpad_ref[...]

    # ---- depthwise KxK conv + BN + ReLU ----
    acc = jnp.zeros((Ho, Wo, Cmid), jnp.float32)
    w_dw = w_dw_ref[...]                      # (K, K, Cmid)
    for kh in range(ksize):
        for kw in range(ksize):
            patch = jax.lax.slice(
                xpad,
                (kh, kw, 0),
                (kh + (Ho - 1) * stride + 1, kw + (Wo - 1) * stride + 1, Cmid),
                (stride, stride, 1),
            )
            acc = acc + patch * w_dw[kh, kw, :]
    dw = acc * dw_s_ref[...] + dw_b_ref[...]
    dw = jnp.maximum(dw, 0.0)
    dw2d = dw.reshape(Ho * Wo, Cmid)

    # ---- Squeeze-and-Excitation gate (fused, VMEM-resident) ----
    if with_attention:
        pooled = jnp.sum(dw2d, axis=0, keepdims=True) * (1.0 / float(Ho * Wo))
        g = jnp.dot(pooled, w_se1_ref[...],
                    preferred_element_type=jnp.float32) + b_se1_ref[...]
        g = jnp.maximum(g, 0.0)
        g = jnp.dot(g, w_se2_ref[...],
                    preferred_element_type=jnp.float32) + b_se2_ref[...]
        gate = jax.nn.sigmoid(g)              # (1, Cmid)
        dw2d = dw2d * gate

    # ---- projection: 1x1 conv + BN (+ fused residual, reuses loaded x) ----
    y2d = jnp.dot(dw2d, w_pj_ref[...], preferred_element_type=jnp.float32)
    y2d = y2d * pj_s_ref[...] + pj_b_ref[...]
    if apply_residual:
        y2d = y2d + x2d
    o_ref[0] = y2d.reshape(Ho, Wo, Cout).astype(o_ref.dtype)


# ----------------------------- pallas_call wrapper ----------------------------

def _full_block(arr):
    nd = arr.ndim
    return pl.BlockSpec(arr.shape, lambda n, _nd=nd: (0,) * _nd)


def mnasnet_unit_forward(x_nchw, params, *, stride, ksize, expansion_rate,
                         with_attention, in_planes, out_planes):
    x = jnp.transpose(x_nchw, (0, 2, 3, 1))   # -> NHWC (channels on lanes)
    N, H, W, Cin = x.shape
    inner = Cin * expansion_rate
    padding = {3: 1, 5: 2}.get(ksize, 0)
    Ho = (H + 2 * padding - ksize) // stride + 1
    Wo = (W + 2 * padding - ksize) // stride + 1
    Hp, Wp = H + 2 * padding, W + 2 * padding
    has_expansion = expansion_rate > 1
    apply_residual = (in_planes == out_planes) and (stride == 1)

    inputs = [x]
    in_specs = [pl.BlockSpec((1, H, W, Cin), lambda n: (n, 0, 0, 0))]
    names = []
    if has_expansion:
        names += ['w_exp', 'exp_scale', 'exp_bias']
    names += ['w_dw', 'dw_scale', 'dw_bias']
    if with_attention:
        names += ['w_se1', 'b_se1', 'w_se2', 'b_se2']
    names += ['w_proj', 'proj_scale', 'proj_bias']
    for nm in names:
        inputs.append(params[nm])
        in_specs.append(_full_block(params[nm]))

    out_shape = jax.ShapeDtypeStruct((N, Ho, Wo, out_planes), x.dtype)
    out_spec = pl.BlockSpec((1, Ho, Wo, out_planes), lambda n: (n, 0, 0, 0))

    # --- cost estimate (advisory for the XLA scheduler) ---
    weight_elems = sum(int(a.size) for a in inputs[1:])
    flops = 2 * N * Ho * Wo * ksize * ksize * inner \
        + 2 * N * Ho * Wo * inner * out_planes
    if has_expansion:
        flops += 2 * N * H * W * Cin * inner
    transcendentals = 0
    if with_attention:
        cr = params['w_se1'].shape[1]
        flops += 4 * N * inner * cr
        transcendentals = N * inner
    bytes_accessed = 4 * (int(x.size) + N * Ho * Wo * out_planes + weight_elems)

    # --- explicit VMEM budget (blocks are double-buffered) ---
    itemsize = 4
    per_step = (
        2 * (H * W * Cin + Ho * Wo * out_planes) * itemsize
        + 2 * weight_elems * itemsize
        + Hp * Wp * inner * itemsize
        + (2 * H * W * inner + 2 * Ho * Wo * inner) * itemsize
    )
    vmem_limit = int(min(max(4 * per_step, 16 * 1024 * 1024), 48 * 1024 * 1024))

    kernel = functools.partial(
        _mbconv_kernel, ksize=ksize, stride=stride, padding=padding,
        has_expansion=has_expansion, with_attention=with_attention,
        apply_residual=apply_residual)

    out = pl.pallas_call(
        kernel,
        out_shape=out_shape,
        grid=(N,),
        in_specs=in_specs,
        out_specs=out_spec,
        scratch_shapes=[pltpu.VMEM((Hp, Wp, inner), jnp.float32)],
        compiler_params=pltpu.CompilerParams(
            dimension_semantics=("parallel",),
            vmem_limit_bytes=vmem_limit),
        cost_estimate=pl.CostEstimate(
            flops=int(flops),
            transcendentals=int(transcendentals),
            bytes_accessed=int(bytes_accessed)),
    )(*inputs)
    return jnp.transpose(out, (0, 3, 1, 2))   # back to NCHW


# ----------------------------- parameters ------------------------------------

def init_params(key, in_planes, out_planes, expansion_rate, ksize, reduction):
    inner = in_planes * expansion_rate
    cr = max(inner // reduction, 1)
    ks = jax.random.split(key, 20)

    def bn_fold(kg, kb, km, kv, c):
        gamma = 1.0 + 0.1 * jax.random.normal(kg, (c,), jnp.float32)
        beta = 0.1 * jax.random.normal(kb, (c,), jnp.float32)
        mean = 0.05 * jax.random.normal(km, (c,), jnp.float32)
        var = 1.0 + 0.1 * jnp.abs(jax.random.normal(kv, (c,), jnp.float32))
        scale = gamma / jnp.sqrt(var + BN_EPS)
        bias = beta - mean * scale
        return scale[None, :], bias[None, :]

    p = {}
    # expansion 1x1: torch weight (inner, in, 1, 1) -> (in, inner)
    w_exp_t = 0.2 * jax.random.normal(ks[0], (inner, in_planes), jnp.float32)
    p['w_exp'] = w_exp_t.T
    p['exp_scale'], p['exp_bias'] = bn_fold(ks[1], ks[2], ks[3], ks[4], inner)
    # depthwise: torch weight (inner, 1, K, K) -> (K, K, inner)
    w_dw_t = 0.2 * jax.random.normal(ks[5], (inner, 1, ksize, ksize), jnp.float32)
    p['w_dw'] = jnp.transpose(w_dw_t[:, 0], (1, 2, 0))
    p['dw_scale'], p['dw_bias'] = bn_fold(ks[6], ks[7], ks[8], ks[9], inner)
    # SE: fc1 (cr, inner, 1, 1)+bias, fc2 (inner, cr, 1, 1)+bias
    w1_t = 0.2 * jax.random.normal(ks[10], (cr, inner), jnp.float32)
    b1_t = 0.1 * jax.random.normal(ks[11], (cr,), jnp.float32)
    w2_t = 0.2 * jax.random.normal(ks[12], (inner, cr), jnp.float32)
    b2_t = 0.1 * jax.random.normal(ks[13], (inner,), jnp.float32)
    p['w_se1'] = w1_t.T
    p['b_se1'] = b1_t[None, :]
    p['w_se2'] = w2_t.T
    p['b_se2'] = b2_t[None, :]
    # projection 1x1: (out, inner, 1, 1) -> (inner, out)
    w_proj_t = 0.2 * jax.random.normal(ks[14], (out_planes, inner), jnp.float32)
    p['w_proj'] = w_proj_t.T
    p['proj_scale'], p['proj_bias'] = bn_fold(ks[15], ks[16], ks[17], ks[18],
                                              out_planes)
    return p


# ----------------------------- pure-JAX reference ----------------------------

def reference_forward(x_nchw, params, *, stride, ksize, expansion_rate,
                      with_attention, in_planes, out_planes):
    x = jnp.transpose(x_nchw, (0, 2, 3, 1))
    identity = x
    if expansion_rate > 1:
        x = jnp.einsum('nhwc,cd->nhwd', x, params['w_exp'])
        x = jnp.maximum(x * params['exp_scale'][0] + params['exp_bias'][0], 0.0)
    padding = {3: 1, 5: 2}.get(ksize, 0)
    inner = x.shape[-1]
    w_dw = params['w_dw'][:, :, None, :]  # (K, K, 1, C) HWIO grouped
    out = jax.lax.conv_general_dilated(
        x, w_dw, window_strides=(stride, stride),
        padding=[(padding, padding), (padding, padding)],
        dimension_numbers=('NHWC', 'HWIO', 'NHWC'),
        feature_group_count=inner)
    out = jnp.maximum(out * params['dw_scale'][0] + params['dw_bias'][0], 0.0)
    if with_attention:
        pooled = jnp.mean(out, axis=(1, 2))
        h = jnp.maximum(pooled @ params['w_se1'] + params['b_se1'][0], 0.0)
        gate = jax.nn.sigmoid(h @ params['w_se2'] + params['b_se2'][0])
        out = out * gate[:, None, None, :]
    out = jnp.einsum('nhwc,cd->nhwd', out, params['w_proj'])
    out = out * params['proj_scale'][0] + params['proj_bias'][0]
    if in_planes == out_planes and stride == 1:
        out = out + identity
    return jnp.transpose(out, (0, 3, 1, 2))


# ----------------------------- main -------------------------------------------

if __name__ == "__main__":
    N, H, W = 2, 16, 16
    key = jax.random.PRNGKey(0)

    configs = [
        # MBConv-style: expansion + 3x3 dw + SE + residual
        dict(in_planes=8, out_planes=8, stride=1, ksize=3, expansion_rate=2,
             with_attention=True, reduction=4),
        # SepConv-style: no expansion, no SE, residual
        dict(in_planes=8, out_planes=8, stride=1, ksize=3, expansion_rate=1,
             with_attention=False, reduction=4),
        # 5x5 depthwise, SE, channel change (no residual)
        dict(in_planes=8, out_planes=16, stride=1, ksize=5, expansion_rate=2,
             with_attention=True, reduction=4),
    ]

    for cfg in configs:
        kx, kp, key = jax.random.split(key, 3)
        x = jax.random.normal(kx, (N, cfg['in_planes'], H, W), jnp.float32)
        params = init_params(kp, cfg['in_planes'], cfg['out_planes'],
                             cfg['expansion_rate'], cfg['ksize'],
                             cfg['reduction'])
        fwd_cfg = dict(stride=cfg['stride'], ksize=cfg['ksize'],
                       expansion_rate=cfg['expansion_rate'],
                       with_attention=cfg['with_attention'],
                       in_planes=cfg['in_planes'],
                       out_planes=cfg['out_planes'])

        out = jax.block_until_ready(mnasnet_unit_forward(x, params, **fwd_cfg))
        ref = reference_forward(x, params, **fwd_cfg)

        assert out.shape == (N, cfg['out_planes'], H, W), out.shape
        max_err = float(jnp.max(jnp.abs(out - ref)))
        assert jnp.allclose(out, ref, atol=2e-4, rtol=2e-4), max_err

    print("KERNEL_OK")
</pallas_src>

<mosaic_0001>
module attributes {stable_mosaic.version = 11 : i64} {
  func.func @_mbconv_kernel(%arg0: i32, %arg1: memref<1x16x16x8xf32, #tpu.memory_space<vmem>>, %arg2: memref<8x16xf32, #tpu.memory_space<vmem>>, %arg3: memref<1x16xf32, #tpu.memory_space<vmem>>, %arg4: memref<1x16xf32, #tpu.memory_space<vmem>>, %arg5: memref<3x3x16xf32, #tpu.memory_space<vmem>>, %arg6: memref<1x16xf32, #tpu.memory_space<vmem>>, %arg7: memref<1x16xf32, #tpu.memory_space<vmem>>, %arg8: memref<16x4xf32, #tpu.memory_space<vmem>>, %arg9: memref<1x4xf32, #tpu.memory_space<vmem>>, %arg10: memref<4x16xf32, #tpu.memory_space<vmem>>, %arg11: memref<1x16xf32, #tpu.memory_space<vmem>>, %arg12: memref<16x8xf32, #tpu.memory_space<vmem>>, %arg13: memref<1x8xf32, #tpu.memory_space<vmem>>, %arg14: memref<1x8xf32, #tpu.memory_space<vmem>>, %arg15: memref<1x16x16x8xf32, #tpu.memory_space<vmem>>, %arg16: memref<18x18x16xf32, #tpu.memory_space<vmem>>) attributes {dimension_semantics = [#tpu.dimension_semantics<parallel>], iteration_bounds = array<i64: 2>, scalar_prefetch = 0 : i64, scratch_operands = 1 : i64, tpu.core_type = #tpu.core_type<tc>, window_params = [{transform_indices = @transform_0, window_bounds = array<i64: 1, 16, 16, 8>}, {pipeline_mode = #tpu.pipeline_mode<synchronous>, transform_indices = @transform_1, window_bounds = array<i64: 8, 16>}, {pipeline_mode = #tpu.pipeline_mode<synchronous>, transform_indices = @transform_2, window_bounds = array<i64: 1, 16>}, {pipeline_mode = #tpu.pipeline_mode<synchronous>, transform_indices = @transform_3, window_bounds = array<i64: 1, 16>}, {pipeline_mode = #tpu.pipeline_mode<synchronous>, transform_indices = @transform_4, window_bounds = array<i64: 3, 3, 16>}, {pipeline_mode = #tpu.pipeline_mode<synchronous>, transform_indices = @transform_5, window_bounds = array<i64: 1, 16>}, {pipeline_mode = #tpu.pipeline_mode<synchronous>, transform_indices = @transform_6, window_bounds = array<i64: 1, 16>}, {pipeline_mode = #tpu.pipeline_mode<synchronous>, transform_indices = @transform_7, window_bounds = array<i64: 16, 4>}, {pipeline_mode = #tpu.pipeline_mode<synchronous>, transform_indices = @transform_8, window_bounds = array<i64: 1, 4>}, {pipeline_mode = #tpu.pipeline_mode<synchronous>, transform_indices = @transform_9, window_bounds = array<i64: 4, 16>}, {pipeline_mode = #tpu.pipeline_mode<synchronous>, transform_indices = @transform_10, window_bounds = array<i64: 1, 16>}, {pipeline_mode = #tpu.pipeline_mode<synchronous>, transform_indices = @transform_11, window_bounds = array<i64: 16, 8>}, {pipeline_mode = #tpu.pipeline_mode<synchronous>, transform_indices = @transform_12, window_bounds = array<i64: 1, 8>}, {pipeline_mode = #tpu.pipeline_mode<synchronous>, transform_indices = @transform_13, window_bounds = array<i64: 1, 8>}, {transform_indices = @transform_14, window_bounds = array<i64: 1, 16, 16, 8>}]} {
    %c0 = arith.constant 0 : index
    %c0_0 = arith.constant 0 : index
    %c0_1 = arith.constant 0 : index
    %c0_2 = arith.constant 0 : index
    %0 = vector.load %arg1[%c0, %c0_0, %c0_1, %c0_2] : memref<1x16x16x8xf32, #tpu.memory_space<vmem>>, vector<1x16x16x8xf32>
    %1 = vector.shape_cast %0 : vector<1x16x16x8xf32> to vector<16x16x8xf32>
    %2 = vector.shape_cast %1 : vector<16x16x8xf32> to vector<256x8xf32>
    %c0_3 = arith.constant 0 : index
    %c0_4 = arith.constant 0 : index
    %3 = vector.load %arg2[%c0_3, %c0_4] : memref<8x16xf32, #tpu.memory_space<vmem>>, vector<8x16xf32>
    %cst = arith.constant dense<0.000000e+00> : vector<256x16xf32>
    %4 = tpu.matmul %2, %3, %cst {dimension_numbers = #tpu.dot_dimension_numbers<[1], [0], [0], [1], [0, 0, 1, 1], [], []>} : vector<256x8xf32>, vector<8x16xf32>, vector<256x16xf32> -> vector<256x16xf32>
    %c0_5 = arith.constant 0 : index
    %c0_6 = arith.constant 0 : index
    %5 = vector.load %arg3[%c0_5, %c0_6] : memref<1x16xf32, #tpu.memory_space<vmem>>, vector<1x16xf32>
    %6 = vector.broadcast %5 : vector<1x16xf32> to vector<256x16xf32>
    %7 = arith.mulf %4, %6 : vector<256x16xf32>
    %c0_7 = arith.constant 0 : index
    %c0_8 = arith.constant 0 : index
    %8 = vector.load %arg4[%c0_7, %c0_8] : memref<1x16xf32, #tpu.memory_space<vmem>>, vector<1x16xf32>
    %9 = vector.broadcast %8 : vector<1x16xf32> to vector<256x16xf32>
    %10 = arith.addf %7, %9 : vector<256x16xf32>
    %cst_9 = arith.constant 0.000000e+00 : f32
    %11 = vector.broadcast %cst_9 : f32 to vector<256x16xf32>
    %12 = arith.maximumf %10, %11 : vector<256x16xf32>
    %13 = vector.shape_cast %12 : vector<256x16xf32> to vector<16x16x16xf32>
    %cst_10 = arith.constant 0.000000e+00 : f32
    %14 = vector.broadcast %cst_10 : f32 to vector<18x18x16xf32>
    %c0_11 = arith.constant 0 : index
    %c0_12 = arith.constant 0 : index
    %c0_13 = arith.constant 0 : index
    %15 = vector.load %arg16[%c0_11, %c0_12, %c0_13] : memref<18x18x16xf32, #tpu.memory_space<vmem>>, vector<18x18x16xf32>
    tpu.vector_store %arg16[%c0_11, %c0_12, %c0_13], %14 {strides = array<i32>} : memref<18x18x16xf32, #tpu.memory_space<vmem>>, vector<18x18x16xf32>,
    %c1 = arith.constant 1 : index
    %c1_14 = arith.constant 1 : index
    %c0_15 = arith.constant 0 : index
    %16 = vector.load %arg16[%c1, %c1_14, %c0_15] : memref<18x18x16xf32, #tpu.memory_space<vmem>>, vector<16x16x16xf32>
    tpu.vector_store %arg16[%c1, %c1_14, %c0_15], %13 {strides = array<i32>} : memref<18x18x16xf32, #tpu.memory_space<vmem>>, vector<16x16x16xf32>,
    %c0_16 = arith.constant 0 : index
    %c0_17 = arith.constant 0 : index
    %c0_18 = arith.constant 0 : index
    %17 = vector.load %arg16[%c0_16, %c0_17, %c0_18] : memref<18x18x16xf32, #tpu.memory_space<vmem>>, vector<18x18x16xf32>
    %cst_19 = arith.constant 0.000000e+00 : f32
    %18 = vector.broadcast %cst_19 : f32 to vector<16x16x16xf32>
    %c0_20 = arith.constant 0 : index
    %c0_21 = arith.constant 0 : index
    %c0_22 = arith.constant 0 : index
    %19 = vector.load %arg5[%c0_20, %c0_21, %c0_22] : memref<3x3x16xf32, #tpu.memory_space<vmem>>, vector<3x3x16xf32>
    %20 = vector.extract_strided_slice %17 {offsets = [0, 0, 0], sizes = [16, 16, 16], strides = [1, 1, 1]} : vector<18x18x16xf32> to vector<16x16x16xf32>
    %21 = vector.extract_strided_slice %19 {offsets = [0, 0, 0], sizes = [1, 1, 16], strides = [1, 1, 1]} : vector<3x3x16xf32> to vector<1x1x16xf32>
    %22 = vector.shape_cast %21 : vector<1x1x16xf32> to vector<16xf32>
    %23 = vector.shape_cast %22 : vector<16xf32> to vector<1x1x16xf32>
    %24 = vector.broadcast %23 : vector<1x1x16xf32> to vector<16x16x16xf32>
    %25 = arith.mulf %20, %24 : vector<16x16x16xf32>
    %26 = arith.addf %18, %25 : vector<16x16x16xf32>
    %27 = vector.extract_strided_slice %17 {offsets = [0, 1, 0], sizes = [16, 16, 16], strides = [1, 1, 1]} : vector<18x18x16xf32> to vector<16x16x16xf32>
    %28 = vector.extract_strided_slice %19 {offsets = [0, 1, 0], sizes = [1, 1, 16], strides = [1, 1, 1]} : vector<3x3x16xf32> to vector<1x1x16xf32>
    %29 = vector.shape_cast %28 : vector<1x1x16xf32> to vector<16xf32>
    %30 = vector.shape_cast %29 : vector<16xf32> to vector<1x1x16xf32>
    %31 = vector.broadcast %30 : vector<1x1x16xf32> to vector<16x16x16xf32>
    %32 = arith.mulf %27, %31 : vector<16x16x16xf32>
    %33 = arith.addf %26, %32 : vector<16x16x16xf32>
    %34 = vector.extract_strided_slice %17 {offsets = [0, 2, 0], sizes = [16, 16, 16], strides = [1, 1, 1]} : vector<18x18x16xf32> to vector<16x16x16xf32>
    %35 = vector.extract_strided_slice %19 {offsets = [0, 2, 0], sizes = [1, 1, 16], strides = [1, 1, 1]} : vector<3x3x16xf32> to vector<1x1x16xf32>
    %36 = vector.shape_cast %35 : vector<1x1x16xf32> to vector<16xf32>
    %37 = vector.shape_cast %36 : vector<16xf32> to vector<1x1x16xf32>
    %38 = vector.broadcast %37 : vector<1x1x16xf32> to vector<16x16x16xf32>
    %39 = arith.mulf %34, %38 : vector<16x16x16xf32>
    %40 = arith.addf %33, %39 : vector<16x16x16xf32>
    %41 = vector.extract_strided_slice %17 {offsets = [1, 0, 0], sizes = [16, 16, 16], strides = [1, 1, 1]} : vector<18x18x16xf32> to vector<16x16x16xf32>
    %42 = vector.extract_strided_slice %19 {offsets = [1, 0, 0], sizes = [1, 1, 16], strides = [1, 1, 1]} : vector<3x3x16xf32> to vector<1x1x16xf32>
    %43 = vector.shape_cast %42 : vector<1x1x16xf32> to vector<16xf32>
    %44 = vector.shape_cast %43 : vector<16xf32> to vector<1x1x16xf32>
    %45 = vector.broadcast %44 : vector<1x1x16xf32> to vector<16x16x16xf32>
    %46 = arith.mulf %41, %45 : vector<16x16x16xf32>
    %47 = arith.addf %40, %46 : vector<16x16x16xf32>
    %48 = vector.extract_strided_slice %17 {offsets = [1, 1, 0], sizes = [16, 16, 16], strides = [1, 1, 1]} : vector<18x18x16xf32> to vector<16x16x16xf32>
    %49 = vector.extract_strided_slice %19 {offsets = [1, 1, 0], sizes = [1, 1, 16], strides = [1, 1, 1]} : vector<3x3x16xf32> to vector<1x1x16xf32>
    %50 = vector.shape_cast %49 : vector<1x1x16xf32> to vector<16xf32>
    %51 = vector.shape_cast %50 : vector<16xf32> to vector<1x1x16xf32>
    %52 = vector.broadcast %51 : vector<1x1x16xf32> to vector<16x16x16xf32>
    %53 = arith.mulf %48, %52 : vector<16x16x16xf32>
    %54 = arith.addf %47, %53 : vector<16x16x16xf32>
    %55 = vector.extract_strided_slice %17 {offsets = [1, 2, 0], sizes = [16, 16, 16], strides = [1, 1, 1]} : vector<18x18x16xf32> to vector<16x16x16xf32>
    %56 = vector.extract_strided_slice %19 {offsets = [1, 2, 0], sizes = [1, 1, 16], strides = [1, 1, 1]} : vector<3x3x16xf32> to vector<1x1x16xf32>
    %57 = vector.shape_cast %56 : vector<1x1x16xf32> to vector<16xf32>
    %58 = vector.shape_cast %57 : vector<16xf32> to vector<1x1x16xf32>
    %59 = vector.broadcast %58 : vector<1x1x16xf32> to vector<16x16x16xf32>
    %60 = arith.mulf %55, %59 : vector<16x16x16xf32>
    %61 = arith.addf %54, %60 : vector<16x16x16xf32>
    %62 = vector.extract_strided_slice %17 {offsets = [2, 0, 0], sizes = [16, 16, 16], strides = [1, 1, 1]} : vector<18x18x16xf32> to vector<16x16x16xf32>
    %63 = vector.extract_strided_slice %19 {offsets = [2, 0, 0], sizes = [1, 1, 16], strides = [1, 1, 1]} : vector<3x3x16xf32> to vector<1x1x16xf32>
    %64 = vector.shape_cast %63 : vector<1x1x16xf32> to vector<16xf32>
    %65 = vector.shape_cast %64 : vector<16xf32> to vector<1x1x16xf32>
    %66 = vector.broadcast %65 : vector<1x1x16xf32> to vector<16x16x16xf32>
    %67 = arith.mulf %62, %66 : vector<16x16x16xf32>
    %68 = arith.addf %61, %67 : vector<16x16x16xf32>
    %69 = vector.extract_strided_slice %17 {offsets = [2, 1, 0], sizes = [16, 16, 16], strides = [1, 1, 1]} : vector<18x18x16xf32> to vector<16x16x16xf32>
    %70 = vector.extract_strided_slice %19 {offsets = [2, 1, 0], sizes = [1, 1, 16], strides = [1, 1, 1]} : vector<3x3x16xf32> to vector<1x1x16xf32>
    %71 = vector.shape_cast %70 : vector<1x1x16xf32> to vector<16xf32>
    %72 = vector.shape_cast %71 : vector<16xf32> to vector<1x1x16xf32>
    %73 = vector.broadcast %72 : vector<1x1x16xf32> to vector<16x16x16xf32>
    %74 = arith.mulf %69, %73 : vector<16x16x16xf32>
    %75 = arith.addf %68, %74 : vector<16x16x16xf32>
    %76 = vector.extract_strided_slice %17 {offsets = [2, 2, 0], sizes = [16, 16, 16], strides = [1, 1, 1]} : vector<18x18x16xf32> to vector<16x16x16xf32>
    %77 = vector.extract_strided_slice %19 {offsets = [2, 2, 0], sizes = [1, 1, 16], strides = [1, 1, 1]} : vector<3x3x16xf32> to vector<1x1x16xf32>
    %78 = vector.shape_cast %77 : vector<1x1x16xf32> to vector<16xf32>
    %79 = vector.shape_cast %78 : vector<16xf32> to vector<1x1x16xf32>
    %80 = vector.broadcast %79 : vector<1x1x16xf32> to vector<16x16x16xf32>
    %81 = arith.mulf %76, %80 : vector<16x16x16xf32>
    %82 = arith.addf %75, %81 : vector<16x16x16xf32>
    %c0_23 = arith.constant 0 : index
    %c0_24 = arith.constant 0 : index
    %83 = vector.load %arg6[%c0_23, %c0_24] : memref<1x16xf32, #tpu.memory_space<vmem>>, vector<1x16xf32>
    %84 = vector.shape_cast %83 : vector<1x16xf32> to vector<1x1x16xf32>
    %85 = vector.broadcast %84 : vector<1x1x16xf32> to vector<16x16x16xf32>
    %86 = arith.mulf %82, %85 : vector<16x16x16xf32>
    %c0_25 = arith.constant 0 : index
    %c0_26 = arith.constant 0 : index
    %87 = vector.load %arg7[%c0_25, %c0_26] : memref<1x16xf32, #tpu.memory_space<vmem>>, vector<1x16xf32>
    %88 = vector.shape_cast %87 : vector<1x16xf32> to vector<1x1x16xf32>
    %89 = vector.broadcast %88 : vector<1x1x16xf32> to vector<16x16x16xf32>
    %90 = arith.addf %86, %89 : vector<16x16x16xf32>
    %cst_27 = arith.constant 0.000000e+00 : f32
    %91 = vector.broadcast %cst_27 : f32 to vector<16x16x16xf32>
    %92 = arith.maximumf %90, %91 : vector<16x16x16xf32>
    %93 = vector.shape_cast %92 : vector<16x16x16xf32> to vector<256x16xf32>
    %cst_28 = arith.constant dense<0.000000e+00> : vector<16xf32>
    %94 = vector.multi_reduction <add>, %93, %cst_28 [0] : vector<256x16xf32> to vector<16xf32>
    %95 = vector.shape_cast %94 : vector<16xf32> to vector<1x16xf32>
    %cst_29 = arith.constant 3.906250e-03 : f32
    %96 = vector.broadcast %cst_29 : f32 to vector<1x16xf32>
    %97 = arith.mulf %95, %96 : vector<1x16xf32>
    %c0_30 = arith.constant 0 : index
    %c0_31 = arith.constant 0 : index
    %98 = vector.load %arg8[%c0_30, %c0_31] : memref<16x4xf32, #tpu.memory_space<vmem>>, vector<16x4xf32>
    %cst_32 = arith.constant dense<0.000000e+00> : vector<1x4xf32>
    %99 = tpu.matmul %97, %98, %cst_32 {dimension_numbers = #tpu.dot_dimension_numbers<[1], [0], [0], [1], [0, 0, 1, 1], [], []>} : vector<1x16xf32>, vector<16x4xf32>, vector<1x4xf32> -> vector<1x4xf32>
    %c0_33 = arith.constant 0 : index
    %c0_34 = arith.constant 0 : index
    %100 = vector.load %arg9[%c0_33, %c0_34] : memref<1x4xf32, #tpu.memory_space<vmem>>, vector<1x4xf32>
    %101 = arith.addf %99, %100 : vector<1x4xf32>
    %cst_35 = arith.constant 0.000000e+00 : f32
    %102 = vector.broadcast %cst_35 : f32 to vector<1x4xf32>
    %103 = arith.maximumf %101, %102 : vector<1x4xf32>
    %c0_36 = arith.constant 0 : index
    %c0_37 = arith.constant 0 : index
    %104 = vector.load %arg10[%c0_36, %c0_37] : memref<4x16xf32, #tpu.memory_space<vmem>>, vector<4x16xf32>
    %cst_38 = arith.constant dense<0.000000e+00> : vector<1x16xf32>
    %105 = tpu.matmul %103, %104, %cst_38 {dimension_numbers = #tpu.dot_dimension_numbers<[1], [0], [0], [1], [0, 0, 1, 1], [], []>} : vector<1x4xf32>, vector<4x16xf32>, vector<1x16xf32> -> vector<1x16xf32>
    %c0_39 = arith.constant 0 : index
    %c0_40 = arith.constant 0 : index
    %106 = vector.load %arg11[%c0_39, %c0_40] : memref<1x16xf32, #tpu.memory_space<vmem>>, vector<1x16xf32>
    %107 = arith.addf %105, %106 : vector<1x16xf32>
    %108 = arith.negf %107 : vector<1x16xf32>
    %109 = math.exp %108 : vector<1x16xf32>
    %cst_41 = arith.constant 1.000000e+00 : f32
    %110 = vector.broadcast %cst_41 : f32 to vector<1x16xf32>
    %111 = arith.addf %110, %109 : vector<1x16xf32>
    %112 = arith.divf %110, %111 : vector<1x16xf32>
    %113 = vector.broadcast %112 : vector<1x16xf32> to vector<256x16xf32>
    %114 = arith.mulf %93, %113 : vector<256x16xf32>
    %c0_42 = arith.constant 0 : index
    %c0_43 = arith.constant 0 : index
    %115 = vector.load %arg12[%c0_42, %c0_43] : memref<16x8xf32, #tpu.memory_space<vmem>>, vector<16x8xf32>
    %cst_44 = arith.constant dense<0.000000e+00> : vector<256x8xf32>
    %116 = tpu.matmul %114, %115, %cst_44 {dimension_numbers = #tpu.dot_dimension_numbers<[1], [0], [0], [1], [0, 0, 1, 1], [], []>} : vector<256x16xf32>, vector<16x8xf32>, vector<256x8xf32> -> vector<256x8xf32>
    %c0_45 = arith.constant 0 : index
    %c0_46 = arith.constant 0 : index
    %117 = vector.load %arg13[%c0_45, %c0_46] : memref<1x8xf32, #tpu.memory_space<vmem>>, vector<1x8xf32>
    %118 = vector.broadcast %117 : vector<1x8xf32> to vector<256x8xf32>
    %119 = arith.mulf %116, %118 : vector<256x8xf32>
    %c0_47 = arith.constant 0 : index
    %c0_48 = arith.constant 0 : index
    %120 = vector.load %arg14[%c0_47, %c0_48] : memref<1x8xf32, #tpu.memory_space<vmem>>, vector<1x8xf32>
    %121 = vector.broadcast %120 : vector<1x8xf32> to vector<256x8xf32>
    %122 = arith.addf %119, %121 : vector<256x8xf32>
    %123 = arith.addf %122, %2 : vector<256x8xf32>
    %124 = vector.shape_cast %123 : vector<256x8xf32> to vector<16x16x8xf32>
    %c0_49 = arith.constant 0 : index
    %c0_50 = arith.constant 0 : index
    %c0_51 = arith.constant 0 : index
    %c0_52 = arith.constant 0 : index
    %125 = vector.load %arg15[%c0_49, %c0_50, %c0_51, %c0_52] : memref<1x16x16x8xf32, #tpu.memory_space<vmem>>, vector<1x16x16x8xf32>
    %126 = vector.shape_cast %125 : vector<1x16x16x8xf32> to vector<16x16x8xf32>
    %127 = vector.shape_cast %124 : vector<16x16x8xf32> to vector<1x16x16x8xf32>
    tpu.vector_store %arg15[%c0_49, %c0_50, %c0_51, %c0_52], %127 {strides = array<i32>} : memref<1x16x16x8xf32, #tpu.memory_space<vmem>>, vector<1x16x16x8xf32>,
    return
  }
  func.func @transform_0(%arg0: i32) -> (i32, i32, i32, i32) {
    %c0_i32 = arith.constant 0 : i32
    %c0_i32_0 = arith.constant 0 : i32
    %c0_i32_1 = arith.constant 0 : i32
    %c0_i32_2 = arith.constant 0 : i32
    return %arg0, %c0_i32, %c0_i32_0, %c0_i32_1 : i32, i32, i32, i32
  }
  func.func @transform_1(%arg0: i32) -> (i32, i32) {
    %c0_i32 = arith.constant 0 : i32
    %c0_i32_0 = arith.constant 0 : i32
    %c0_i32_1 = arith.constant 0 : i32
    return %c0_i32, %c0_i32_0 : i32, i32
  }
  func.func @transform_2(%arg0: i32) -> (i32, i32) {
    %c0_i32 = arith.constant 0 : i32
    %c0_i32_0 = arith.constant 0 : i32
    %c0_i32_1 = arith.constant 0 : i32
    return %c0_i32, %c0_i32_0 : i32, i32
  }
  func.func @transform_3(%arg0: i32) -> (i32, i32) {
    %c0_i32 = arith.constant 0 : i32
    %c0_i32_0 = arith.constant 0 : i32
    %c0_i32_1 = arith.constant 0 : i32
    return %c0_i32, %c0_i32_0 : i32, i32
  }
  func.func @transform_4(%arg0: i32) -> (i32, i32, i32) {
    %c0_i32 = arith.constant 0 : i32
    %c0_i32_0 = arith.constant 0 : i32
    %c0_i32_1 = arith.constant 0 : i32
    %c0_i32_2 = arith.constant 0 : i32
    return %c0_i32, %c0_i32_0, %c0_i32_1 : i32, i32, i32
  }
  func.func @transform_5(%arg0: i32) -> (i32, i32) {
    %c0_i32 = arith.constant 0 : i32
    %c0_i32_0 = arith.constant 0 : i32
    %c0_i32_1 = arith.constant 0 : i32
    return %c0_i32, %c0_i32_0 : i32, i32
  }
  func.func @transform_6(%arg0: i32) -> (i32, i32) {
    %c0_i32 = arith.constant 0 : i32
    %c0_i32_0 = arith.constant 0 : i32
    %c0_i32_1 = arith.constant 0 : i32
    return %c0_i32, %c0_i32_0 : i32, i32
  }
  func.func @transform_7(%arg0: i32) -> (i32, i32) {
    %c0_i32 = arith.constant 0 : i32
    %c0_i32_0 = arith.constant 0 : i32
    %c0_i32_1 = arith.constant 0 : i32
    return %c0_i32, %c0_i32_0 : i32, i32
  }
  func.func @transform_8(%arg0: i32) -> (i32, i32) {
    %c0_i32 = arith.constant 0 : i32
    %c0_i32_0 = arith.constant 0 : i32
    %c0_i32_1 = arith.constant 0 : i32
    return %c0_i32, %c0_i32_0 : i32, i32
  }
  func.func @transform_9(%arg0: i32) -> (i32, i32) {
    %c0_i32 = arith.constant 0 : i32
    %c0_i32_0 = arith.constant 0 : i32
    %c0_i32_1 = arith.constant 0 : i32
    return %c0_i32, %c0_i32_0 : i32, i32
  }
  func.func @transform_10(%arg0: i32) -> (i32, i32) {
    %c0_i32 = arith.constant 0 : i32
    %c0_i32_0 = arith.constant 0 : i32
    %c0_i32_1 = arith.constant 0 : i32
    return %c0_i32, %c0_i32_0 : i32, i32
  }
  func.func @transform_11(%arg0: i32) -> (i32, i32) {
    %c0_i32 = arith.constant 0 : i32
    %c0_i32_0 = arith.constant 0 : i32
    %c0_i32_1 = arith.constant 0 : i32
    return %c0_i32, %c0_i32_0 : i32, i32
  }
  func.func @transform_12(%arg0: i32) -> (i32, i32) {
    %c0_i32 = arith.constant 0 : i32
    %c0_i32_0 = arith.constant 0 : i32
    %c0_i32_1 = arith.constant 0 : i32
    return %c0_i32, %c0_i32_0 : i32, i32
  }
  func.func @transform_13(%arg0: i32) -> (i32, i32) {
    %c0_i32 = arith.constant 0 : i32
    %c0_i32_0 = arith.constant 0 : i32
    %c0_i32_1 = arith.constant 0 : i32
    return %c0_i32, %c0_i32_0 : i32, i32
  }
  func.func @transform_14(%arg0: i32) -> (i32, i32, i32, i32) {
    %c0_i32 = arith.constant 0 : i32
    %c0_i32_0 = arith.constant 0 : i32
    %c0_i32_1 = arith.constant 0 : i32
    %c0_i32_2 = arith.constant 0 : i32
    return %arg0, %c0_i32, %c0_i32_0, %c0_i32_1 : i32, i32, i32, i32
  }
}

</mosaic_0001>

<bundles_post_ra>
// kernel: tpu_custom_call.1
= control target key start
LH: loop header
LB: loop body
LE: loop exit
PB: predicated region body
PF: predicated region fallthrough
CT: control target
= control target key end

     0   :  { %s4065_s29 = smov 0   ;;  %s6772_s0 = inlined_call_operand.vmem [shape: f32[2,16,16,8], index: 0, kind: input, shape index: {}]   ;;  %s6773_s1 = inlined_call_operand.vmem [shape: f32[8,16], index: 1, kind: input, shape index: {}]   ;;  %s6774_s2 = inlined_call_operand.vmem [shape: f32[1,16], index: 2, kind: input, shape index: {}]   ;;  %s6775_s3 = inlined_call_operand.vmem [shape: f32[1,16], index: 3, kind: input, shape index: {}]   ;;  %s6776_s4 = inlined_call_operand.vmem [shape: f32[3,3,16], index: 4, kind: input, shape index: {}]   ;;  %s6777_s5 = inlined_call_operand.vmem [shape: f32[1,16], index: 5, kind: input, shape index: {}]   ;;  %s6778_s6 = inlined_call_operand.vmem [shape: f32[1,16], index: 6, kind: input, shape index: {}]   ;;  %s6779_s7 = inlined_call_operand.vmem [shape: f32[16,4], index: 7, kind: input, shape index: {}]   ;;  %s6780_s8 = inlined_call_operand.vmem [shape: f32[1,4], index: 8, kind: input, shape index: {}]   ;;  %s6781_s9 = inlined_call_operand.vmem [shape: f32[4,16], index: 9, kind: input, shape index: {}]   ;;  %s6782_s10 = inlined_call_operand.vmem [shape: f32[1,16], index: 10, kind: input, shape index: {}]   ;;  %s6783_s11 = inlined_call_operand.vmem [shape: f32[16,8], index: 11, kind: input, shape index: {}]   ;;  %s6784_s12 = inlined_call_operand.vmem [shape: f32[1,8], index: 12, kind: input, shape index: {}]   ;;  %s6785_s13 = inlined_call_operand.vmem [shape: f32[1,8], index: 13, kind: input, shape index: {}]   ;;  %s6786_s14 = inlined_call_operand.vmem [shape: f32[2,16,16,8], index: 14, kind: output, shape index: {}]  }
   0x1 LB: > { %s3648_s30 = sadd.s32 4294967295, %s3985_s29   ;;  %p3652_p0 = scmp.ge.s32.totalorder %s3985_s29, 1  ;;  %s3985_s29 = sphi %s4065_s29, %s24_s29  }
   0x2   : > { %p412_p1 = scmp.lt.s32.totalorder %s3985_s29, 3 }
   0x4   : > { %p413_p2 = pnand %p3652_p0, %p412_p1 }
   0x6   : > { %416 = sbr.rel (%p413_p2) target bundleno = 1356 (0x54c), region = 76 }
   0xd   : > { %v500_v0 = vld [vmem:[%s6773_s1] sm:$0xff]  ;;  %p458_p3 = scmp.lt.s32.totalorder %s3648_s30, 1  ;;  %vm501_vm0 = vcmask 64512   ;;  %vm933_vm1 = vcmask 130048   ;;  %vm936_vm2 = vcmask 123904   ;;  %v6787_v33 = vmov 0.0  }
   0xe   : > { %3807 = vmatprep.subr.mxu0 %v500_v0  ;;  %939 = vst.msk [vmem:[#allocation2 + $0x20] sm:$0xff] %vm933_vm1, %v6787_v33  ;;  %934 = vst.msk [vmem:[#allocation2] sm:$0xff] %vm933_vm1, %v6787_v33  ;;  %3864 = vmatprep.subr.mxu1 %v6787_v33  ;;  %v4262_v34 = vld [vmem:[%s6774_s2] ss:$0 sm:$0xff]  ;;  %v1079_v51 = vlaneseq  ;;  %vm1247_vm3 = vcmask 1046528   ;;  %vm1492_vm4 = vcmask 1045504  }
   0xf   : > { %3808 = vmatpush3.msra.mxu0 %v500_v0  ;;  %s7110_s30 = smov (!%p458_p3, %s3648_s30), 1  ;;  %940 = vst.msk [vmem:[#allocation2 + $0x28] sm:$0x3] %vm936_vm2, %v6787_v33  ;;  %937 = vst.msk [vmem:[#allocation2 + $0x10] sm:$0x3] %vm936_vm2, %v6787_v33  ;;  %vm3989_vm5 = vmmov 0  }
  0x10   : > { %s3733_s17 = sshll.u32 %s7110_s30, 8  ;;  %935 = vst.msk [vmem:[#allocation2 + $0x8] sm:$0xff] %vm933_vm1, %v6787_v33  ;;  %938 = vst.msk [vmem:[#allocation2 + $0x18] sm:$0xff] %vm933_vm1, %v6787_v33  ;;  %v4267_v36 = vld [vmem:[%s6775_s3] ss:$0 sm:$0xff]  ;;  %v1080_v60 = vshrl.u32 %v1079_v51, 7 }
  0x11   : > { %s4084_s20 = scalar_lea.vmem %s6772_s0, %s3733_s17  ;;  %941 = vst.msk [vmem:[#allocation2 + $0x30] sm:$0xff] %vm933_vm1, %v6787_v33  ;;  %942 = vst.msk [vmem:[#allocation2 + $0x38] sm:$0xff] %vm933_vm1, %v6787_v33  ;;  %vm3012_vm6 = vcmask 1043456   ;;  %vm3008_vm7 = vcmask 31744   ;;  %s6610_s27 = scalar_lea.vmem %s6786_s14, %s3733_s17 }
  0x12   : > { %v468_v1 = vld [vmem:[%s4084_s20] sm:$0xff]  ;;  %v469_v2 = vld [vmem:[%s4084_s20 + $0x8] sm:$0xff]  ;;  %v470_v3 = vld [vmem:[%s4084_s20 + $0x10] sm:$0xff]  ;;  %943 = vst.msk [vmem:[#allocation2 + $0x40] sm:$0x3] %vm936_vm2, %v6787_v33 }
  0x13   : > { %3809 = vmatprep.mubr.msk.f32.mxu0 %vm501_vm0, %v468_v1  ;;  %v471_v4 = vld [vmem:[%s4084_s20 + $0x18] sm:$0xff]  ;;  %v472_v5 = vld [vmem:[%s4084_s20 + $0x20] sm:$0xff]  ;;  %v473_v6 = vld [vmem:[%s4084_s20 + $0x28] sm:$0xff]  ;;  %944 = vst.msk [vmem:[#allocation2 + $0x48] sm:$0xff] %vm933_vm1, %v6787_v33  ;;  %v4293_v1 = vsub.s32 1, %v1080_v60 }
  0x14   : > { %3810 = vmatmul.mubr.msk.f32.vlgmr.msra.gmra.mrb[0].mxu0 %vm501_vm0, %v469_v2  ;;  %v474_v7 = vld [vmem:[%s4084_s20 + $0x30] sm:$0xff]  ;;  %v475_v8 = vld [vmem:[%s4084_s20 + $0x38] sm:$0xff]  ;;  %v476_v9 = vld [vmem:[%s4084_s20 + $0x40] sm:$0xff]  ;;  %945 = vst.msk [vmem:[#allocation2 + $0x50] sm:$0xff] %vm933_vm1, %v6787_v33 }
  0x15   : > { %3812 = vmatprep.mubr.msk.f32.mxu0 %vm501_vm0, %v470_v3  ;;  %v477_v10 = vld [vmem:[%s4084_s20 + $0x48] sm:$0xff]  ;;  %v478_v11 = vld [vmem:[%s4084_s20 + $0x50] sm:$0xff]  ;;  %v479_v12 = vld [vmem:[%s4084_s20 + $0x58] sm:$0xff]  ;;  %946 = vst.msk [vmem:[#allocation2 + $0x58] sm:$0x3] %vm936_vm2, %v6787_v33 }
  0x16   : > { %v480_v13 = vld [vmem:[%s4084_s20 + $0x60] sm:$0xff]  ;;  %v481_v14 = vld [vmem:[%s4084_s20 + $0x68] sm:$0xff]  ;;  %v482_v15 = vld [vmem:[%s4084_s20 + $0x70] sm:$0xff]  ;;  %947 = vst.msk [vmem:[#allocation2 + $0x60] sm:$0xff] %vm933_vm1, %v6787_v33 }
  0x17   : > { %v483_v16 = vld [vmem:[%s4084_s20 + $0x78] sm:$0xff]  ;;  %v484_v17 = vld [vmem:[%s4084_s20 + $0x80] sm:$0xff]  ;;  %v485_v18 = vld [vmem:[%s4084_s20 + $0x88] sm:$0xff]  ;;  %948 = vst.msk [vmem:[#allocation2 + $0x68] sm:$0xff] %vm933_vm1, %v6787_v33 }
  0x18   : > { %3813 = vmatmul.mubr.msk.f32.gmra.mrb[2].mxu0 %vm501_vm0, %v471_v4  ;;  %v486_v19 = vld [vmem:[%s4084_s20 + $0x90] sm:$0xff]  ;;  %v487_v20 = vld [vmem:[%s4084_s20 + $0x98] sm:$0xff]  ;;  %v488_v21 = vld [vmem:[%s4084_s20 + $0xa0] sm:$0xff]  ;;  %949 = vst.msk [vmem:[#allocation2 + $0x70] sm:$0x3] %vm936_vm2, %v6787_v33 }
  0x19   : > { %3815 = vmatprep.mubr.msk.f32.mxu0 %vm501_vm0, %v472_v5  ;;  %v489_v22 = vld [vmem:[%s4084_s20 + $0xa8] sm:$0xff]  ;;  %v490_v23 = vld [vmem:[%s4084_s20 + $0xb0] sm:$0xff]  ;;  %v491_v24 = vld [vmem:[%s4084_s20 + $0xb8] sm:$0xff]  ;;  %950 = vst.msk [vmem:[#allocation2 + $0x78] sm:$0xff] %vm933_vm1, %v6787_v33 }
  0x1a   : > { %v492_v25 = vld [vmem:[%s4084_s20 + $0xc0] sm:$0xff]  ;;  %v493_v26 = vld [vmem:[%s4084_s20 + $0xc8] sm:$0xff]  ;;  %v494_v27 = vld [vmem:[%s4084_s20 + $0xd0] sm:$0xff]  ;;  %951 = vst.msk [vmem:[#allocation2 + $0x80] sm:$0xff] %vm933_vm1, %v6787_v33 }
  0x1b   : > { %v495_v28 = vld [vmem:[%s4084_s20 + $0xd8] sm:$0xff]  ;;  %v496_v29 = vld [vmem:[%s4084_s20 + $0xe0] sm:$0xff]  ;;  %v497_v30 = vld [vmem:[%s4084_s20 + $0xe8] sm:$0xff]  ;;  %952 = vst.msk [vmem:[#allocation2 + $0x88] sm:$0x3] %vm936_vm2, %v6787_v33 }
  0x1c   : > { %3816 = vmatmul.mubr.msk.f32.gmra.mrb[4].mxu0 %vm501_vm0, %v473_v6  ;;  %v498_v31 = vld [vmem:[%s4084_s20 + $0xf0] sm:$0xff]  ;;  %v499_v32 = vld [vmem:[%s4084_s20 + $0xf8] sm:$0xff]  ;;  %953 = vst.msk [vmem:[#allocation2 + $0x90] sm:$0xff] %vm933_vm1, %v6787_v33  ;;  %954 = vst.msk [vmem:[#allocation2 + $0x98] sm:$0xff] %vm933_vm1, %v6787_v33 }
  0x1d   : > { %3818 = vmatprep.mubr.msk.f32.mxu0 %vm501_vm0, %v474_v7  ;;  %955 = vst.msk [vmem:[#allocation2 + $0xa0] sm:$0x3] %vm936_vm2, %v6787_v33  ;;  %958 = vst.msk [vmem:[#allocation2 + $0xb8] sm:$0x3] %vm936_vm2, %v6787_v33  ;;  %v1076_v3 = vld [vmem:[%s6776_s4] sm:$0x7] }
  0x1e   : > { %956 = vst.msk [vmem:[#allocation2 + $0xa8] sm:$0xff] %vm933_vm1, %v6787_v33  ;;  %957 = vst.msk [vmem:[#allocation2 + $0xb0] sm:$0xff] %vm933_vm1, %v6787_v33  ;;  %v4303_v5 = vrot.slane %v1076_v3, %v4293_v1  ;;  %v4307_v7 = vsub.s32 2, %v1080_v60 }
  0x1f   : > { %959 = vst.msk [vmem:[#allocation2 + $0xc0] sm:$0xff] %vm933_vm1, %v6787_v33  ;;  %960 = vst.msk [vmem:[#allocation2 + $0xc8] sm:$0xff] %vm933_vm1, %v6787_v33 }
  0x20   : > { %3819 = vmatmul.mubr.msk.f32.gmra.mrb[6].mxu0 %vm501_vm0, %v475_v8  ;;  %961 = vst.msk [vmem:[#allocation2 + $0xd0] sm:$0x3] %vm936_vm2, %v6787_v33  ;;  %964 = vst.msk [vmem:[#allocation2 + $0xe8] sm:$0x3] %vm936_vm2, %v6787_v33  ;;  %v1022_v8 = vld [vmem:[#allocation2] sm:$0xff] }
  0x21   : > { %3821 = vmatprep.mubr.msk.f32.mxu0 %vm501_vm0, %v476_v9  ;;  %962 = vst.msk [vmem:[#allocation2 + $0xd8] sm:$0xff] %vm933_vm1, %v6787_v33  ;;  %963 = vst.msk [vmem:[#allocation2 + $0xe0] sm:$0xff] %vm933_vm1, %v6787_v33  ;;  %v1023_v9 = vld [vmem:[#allocation2 + $0x8] sm:$0xff] }
  0x22   : > { %965 = vst.msk [vmem:[#allocation2 + $0xf0] sm:$0xff] %vm933_vm1, %v6787_v33  ;;  %966 = vst.msk [vmem:[#allocation2 + $0xf8] sm:$0xff] %vm933_vm1, %v6787_v33 }
  0x23   : > { %967 = vst.msk [vmem:[#allocation2 + $0x100] sm:$0x3] %vm936_vm2, %v6787_v33  ;;  %970 = vst.msk [vmem:[#allocation2 + $0x118] sm:$0x3] %vm936_vm2, %v6787_v33 }
  0x24   : > { %3822 = vmatmul.mubr.msk.f32.gmra.mrb[8].mxu0 %vm501_vm0, %v477_v10  ;;  %968 = vst.msk [vmem:[#allocation2 + $0x108] sm:$0xff] %vm933_vm1, %v6787_v33  ;;  %969 = vst.msk [vmem:[#allocation2 + $0x110] sm:$0xff] %vm933_vm1, %v6787_v33  ;;  %v1024_v10 = vld [vmem:[#allocation2 + $0x10] sm:$0x3] }
  0x25   : > { %3824 = vmatprep.mubr.msk.f32.mxu0 %vm501_vm0, %v478_v11  ;;  %971 = vst.msk [vmem:[#allocation2 + $0x120] sm:$0xff] %vm933_vm1, %v6787_v33  ;;  %972 = vst.msk [vmem:[#allocation2 + $0x128] sm:$0xff] %vm933_vm1, %v6787_v33 }
  0x26   : > { %973 = vst.msk [vmem:[#allocation2 + $0x130] sm:$0x3] %vm936_vm2, %v6787_v33  ;;  %976 = vst.msk [vmem:[#allocation2 + $0x148] sm:$0x3] %vm936_vm2, %v6787_v33 }
  0x27   : > { %974 = vst.msk [vmem:[#allocation2 + $0x138] sm:$0xff] %vm933_vm1, %v6787_v33  ;;  %975 = vst.msk [vmem:[#allocation2 + $0x140] sm:$0xff] %vm933_vm1, %v6787_v33 }
  0x28   : > { %3825 = vmatmul.mubr.msk.f32.gmra.mrb[10].mxu0 %vm501_vm0, %v479_v12  ;;  %977 = vst.msk [vmem:[#allocation2 + $0x150] sm:$0xff] %vm933_vm1, %v6787_v33  ;;  %978 = vst.msk [vmem:[#allocation2 + $0x158] sm:$0xff] %vm933_vm1, %v6787_v33  ;;  %v4311_v12 = vsub.s32 0, %v1080_v60 }
  0x29   : > { %3827 = vmatprep.mubr.msk.f32.mxu0 %vm501_vm0, %v480_v13  ;;  %979 = vst.msk [vmem:[#allocation2 + $0x160] sm:$0x3] %vm936_vm2, %v6787_v33  ;;  %982 = vst.msk [vmem:[#allocation2 + $0x178] sm:$0x3] %vm936_vm2, %v6787_v33  ;;  %v1151_v13 = vmul.f32 %v4303_v5, %v1022_v8 }
  0x2a   : > { %980 = vst.msk [vmem:[#allocation2 + $0x168] sm:$0xff] %vm933_vm1, %v6787_v33  ;;  %981 = vst.msk [vmem:[#allocation2 + $0x170] sm:$0xff] %vm933_vm1, %v6787_v33 }
  0x2b   : > { %983 = vst.msk [vmem:[#allocation2 + $0x180] sm:$0xff] %vm933_vm1, %v6787_v33  ;;  %984 = vst.msk [vmem:[#allocation2 + $0x188] sm:$0xff] %vm933_vm1, %v6787_v33 }
  0x2c   : > { %3828 = vmatmul.mubr.msk.f32.gmra.mrb[12].mxu0 %vm501_vm0, %v481_v14  ;;  %985 = vst.msk [vmem:[#allocation2 + $0x190] sm:$0x3] %vm936_vm2, %v6787_v33  ;;  %988 = vst.msk [vmem:[#allocation2 + $0x1a8] sm:$0x3] %vm936_vm2, %v6787_v33  ;;  %v1152_v14 = vmul.f32 %v4303_v5, %v1023_v9 }
  0x2d   : > { %3830 = vmatprep.mubr.msk.f32.mxu0 %vm501_vm0, %v482_v15  ;;  %986 = vst.msk [vmem:[#allocation2 + $0x198] sm:$0xff] %vm933_vm1, %v6787_v33  ;;  %987 = vst.msk [vmem:[#allocation2 + $0x1a0] sm:$0xff] %vm933_vm1, %v6787_v33  ;;  %v1153_v15 = vmul.f32 %v4303_v5, %v1024_v10 }
  0x2e   : > { %6864 = vst [vmem:[#allocation3_spill] sm:$0xff] %v4311_v12 }
  0x30   : > { %3831 = vmatmul.mubr.msk.f32.gmra.mrb[14].mxu0 %vm501_vm0, %v483_v16 }
  0x31   : > { %3833 = vmatprep.mubr.msk.f32.mxu0 %vm501_vm0, %v484_v17  ;;  %v4319_v17 = vrot.slane %v1076_v3, %v4307_v7 }
  0x34   : > { %3834 = vmatmul.mubr.msk.f32.gmra.mrb[16].mxu0 %vm501_vm0, %v485_v18 }
  0x35   : > { %3836 = vmatprep.mubr.msk.f32.mxu0 %vm501_vm0, %v486_v19  ;;  %v4324_v19 = vrot.slane %v1076_v3, %v4311_v12 }
  0x38   : > { %3837 = vmatmul.mubr.msk.f32.gmra.mrb[18].mxu0 %vm501_vm0, %v487_v20  ;;  %v1248_v20 = vrot.slane %v1151_v13, 1 }
  0x39   : > { %3839 = vmatprep.mubr.msk.f32.mxu0 %vm501_vm0, %v488_v21  ;;  %v1249_v21 = vrot.slane %v1152_v14, 1 }
  0x3c   : > { %3840 = vmatmul.mubr.msk.f32.gmra.mrb[20].mxu0 %vm501_vm0, %v489_v22  ;;  %v1251_v22 = vrot.slane %v1153_v15, 1 }
  0x3d   : > { %3842 = vmatprep.mubr.msk.f32.mxu0 %vm501_vm0, %v490_v23 }
  0x40   : > { %3843 = vmatmul.mubr.msk.f32.gmra.mrb[22].mxu0 %vm501_vm0, %v491_v24  ;;  %v1396_v24 = vmul.f32 %v4319_v17, %v1022_v8 }
  0x41   : > { %3845 = vmatprep.mubr.msk.f32.mxu0 %vm501_vm0, %v492_v25  ;;  %v1397_v25 = vmul.f32 %v4319_v17, %v1023_v9 }
  0x44   : > { %3846 = vmatmul.mubr.msk.f32.gmra.mrb[24].mxu0 %vm501_vm0, %v493_v26  ;;  %v1398_v26 = vmul.f32 %v4319_v17, %v1024_v10 }
  0x45   : > { %3848 = vmatprep.mubr.msk.f32.mxu0 %vm501_vm0, %v494_v27  ;;  %v1077_v27 = vld [vmem:[%s6776_s4 + $0x4] sm:$0x7] }
  0x46   : > { %v4351_v51 = vrot.slane %v1077_v27, %v4311_v12 }
  0x48   : > { %3849 = vmatmul.mubr.msk.f32.gmra.mrb[26].mxu0 %vm501_vm0, %v495_v28 }
  0x49   : > { %3851 = vmatprep.mubr.msk.f32.mxu0 %vm501_vm0, %v496_v29  ;;  %v1083_v29 = vmul.f32 %v4324_v19, %v1022_v8 }
  0x4c   : > { %3852 = vmatmul.mubr.msk.f32.gmra.mrb[28].mxu0 %vm501_vm0, %v497_v30  ;;  %v1084_v30 = vmul.f32 %v4324_v19, %v1023_v9 }
  0x4d   : > { %3854 = vmatprep.mubr.msk.f32.mxu0 %vm501_vm0, %v498_v31  ;;  %v1250_v31 = vsel %vm1247_vm3, %v1248_v20, %v1249_v21 }
  0x50   : > { %3855 = vmatmul.mubr.msk.f32.gmra.mrb[30].mxu0 %vm501_vm0, %v499_v32 }
  0xe7   : > { %v3811_v35 = vpop.f32.mrb[0].mxu0 }
  0xe8   : > { %v831_v37 = vmul.f32 %v3811_v35, %v4262_v34  ;;  %v664_v38 = vpop.f32.mrb[1].mxu0 }
  0xe9   : > { %v830_v39 = vmul.f32 %v4262_v34, %v664_v38  ;;  %v1252_v38 = vsel %vm1247_vm3, %v1249_v21, %v1251_v22 }
  0xea   : > { %v870_v40 = vadd.f32 %v4267_v36, %v831_v37 }
  0xeb   : > { %v869_v41 = vadd.f32 %v4267_v36, %v830_v39  ;;  %v3814_v42 = vpop.f32.mrb[2].mxu0  ;;  %v1493_v39 = vrot.slane %v1396_v24, 2 }
  0xec   : > { %v902_v43 = vmax.f32 %v870_v40, 0.0  ;;  %v833_v44 = vmul.f32 %v3814_v42, %v4262_v34  ;;  %v674_v45 = vpop.f32.mrb[3].mxu0  ;;  %v1494_v40 = vrot.slane %v1397_v25, 2 }
  0xed   : > { %v901_v46 = vmax.f32 %v869_v41, 0.0  ;;  %v832_v47 = vmul.f32 %v4262_v34, %v674_v45  ;;  %v1496_v41 = vrot.slane %v1398_v26, 2 }
  0xee   : > { %991 = vst.msk [vmem:[#allocation2 + $0x21] sm:$0xff] %vm933_vm1, %v902_v43  ;;  %v872_v48 = vadd.f32 %v4267_v36, %v833_v44  ;;  %v4343_v43 = vrot.slane %v1077_v27, %v4293_v1 }
  0xef   : > { %990 = vst.msk [vmem:[#allocation2 + $0x19] sm:$0xff] %vm933_vm1, %v901_v46  ;;  %v871_v49 = vadd.f32 %v4267_v36, %v832_v47  ;;  %v3817_v50 = vpop.f32.mrb[4].mxu0  ;;  %v1360_v46 = vadd.f32 %v1250_v31, %v1083_v29  ;;  %v1361_v47 = vadd.f32 %v1252_v38, %v1084_v30 }
  0xf0   : > { %v904_v52 = vmax.f32 %v872_v48, 0.0  ;;  %v835_v53 = vmul.f32 %v3817_v50, %v4262_v34  ;;  %v684_v54 = vpop.f32.mrb[5].mxu0  ;;  %v1497_v50 = vsel %vm1492_vm4, %v1494_v40, %v1496_v41 }
  0xf1   : > { %v903_v55 = vmax.f32 %v871_v49, 0.0  ;;  %v834_v56 = vmul.f32 %v4262_v34, %v684_v54  ;;  %v1495_v49 = vsel %vm1492_vm4, %v1493_v39, %v1494_v40 }
  0xf2   : > { %993 = vst.msk [vmem:[#allocation2 + $0x39] sm:$0xff] %vm933_vm1, %v904_v52  ;;  %v874_v57 = vadd.f32 %v4267_v36, %v835_v53 }
  0xf3   : > { %992 = vst.msk [vmem:[#allocation2 + $0x31] sm:$0xff] %vm933_vm1, %v903_v55  ;;  %v873_v58 = vadd.f32 %v4267_v36, %v834_v56  ;;  %v4285_v59 = vpop.f32.mrb[6].mxu0  ;;  %v4357_v55 = vrot.slane %v1077_v27, %v4307_v7  ;;  %v1078_v56 = vld [vmem:[%s6776_s4 + $0x8] sm:$0x7] }
  0xf4   : > { %v906_v61 = vmax.f32 %v874_v57, 0.0  ;;  %v4287_v62 = vpop.f32.mrb[7].mxu0  ;;  %v4371_v21 = vrot.slane %v1078_v56, %v4293_v1  ;;  %v4376_v26 = vrot.slane %v1078_v56, %v4307_v7  ;;  %v4382_v31 = vrot.slane %v1078_v56, %v4311_v12 }
  0xf5   : > { %v905_v63 = vmax.f32 %v873_v58, 0.0  ;;  %v1027_v42 = vld [vmem:[#allocation2 + $0x28] sm:$0x3]  ;;  %6865 = vst [vmem:[#allocation4_spill] sm:$0xff] %v4357_v55 }
  0xf6   : > { %995 = vst.msk [vmem:[#allocation2 + $0x51] sm:$0xff] %vm933_vm1, %v906_v61  ;;  %v1025_v35 = vld [vmem:[#allocation2 + $0x18] sm:$0xff]  ;;  %v1026_v37 = vld [vmem:[#allocation2 + $0x20] sm:$0xff]  ;;  %v1156_v48 = vmul.f32 %v4303_v5, %v1027_v42  ;;  %v1711_v54 = vmul.f32 %v4343_v43, %v1027_v42  ;;  %v1605_v61 = vadd.f32 %v1495_v49, %v1360_v46  ;;  %6866 = vst [vmem:[#allocation5_spill] sm:$0xff] %v4371_v21 }
  0xf7   : > { %994 = vst.msk [vmem:[#allocation2 + $0x49] sm:$0xff] %vm933_vm1, %v905_v63  ;;  %v4291_v0 = vpop.f32.mrb[8].mxu0  ;;  %v1154_v44 = vmul.f32 %v4303_v5, %v1025_v35  ;;  %v1155_v45 = vmul.f32 %v4303_v5, %v1026_v37  ;;  %v1709_v52 = vmul.f32 %v4343_v43, %v1025_v35  ;;  %v1710_v53 = vmul.f32 %v4343_v43, %v1026_v37 }
  0xf8   : > { %v4295_v2 = vpop.f32.mrb[9].mxu0  ;;  %v1606_v63 = vadd.f32 %v1497_v50, %v1361_v47  ;;  %v1256_v3 = vrot.slane %v1156_v48, 1  ;;  %v1399_v8 = vmul.f32 %v4319_v17, %v1025_v35  ;;  %v1400_v9 = vmul.f32 %v4319_v17, %v1026_v37  ;;  %6867 = vst [vmem:[#allocation6_spill] sm:$0xff] %v4376_v26  ;;  %6868 = vst [vmem:[#allocation7_spill] sm:$0xff] %v4382_v31 }
  0xf9   : > { %v1253_v58 = vrot.slane %v1154_v44, 1  ;;  %v1254_v60 = vrot.slane %v1155_v45, 1  ;;  %v1641_v10 = vmul.f32 %v4351_v51, %v1025_v35  ;;  %v1642_v14 = vmul.f32 %v4351_v51, %v1026_v37  ;;  %v1030_v45 = vld [vmem:[#allocation2 + $0x40] sm:$0x3] }
  0xfa   : > { %v1805_v15 = vrot.slane %v1709_v52, 1  ;;  %v1806_v20 = vrot.slane %v1710_v53, 1  ;;  %v1401_v22 = vmul.f32 %v4319_v17, %v1027_v42  ;;  %v1808_v24 = vrot.slane %v1711_v54, 1  ;;  %v1028_v56 = vld [vmem:[#allocation2 + $0x30] sm:$0xff] }
  0xfb   : > { %v4300_v4 = vpop.f32.mrb[10].mxu0  ;;  %v1955_v25 = vmul.f32 %v4357_v55, %v1027_v42  ;;  %v1255_v27 = vsel %vm1247_vm3, %v1253_v58, %v1254_v60  ;;  %v1953_v29 = vmul.f32 %v4357_v55, %v1025_v35  ;;  %v1954_v30 = vmul.f32 %v4357_v55, %v1026_v37  ;;  %v4391_v58 = vld [vmem:[#allocation2 + $0x38] sm:$0xff] }
  0xfc   : > { %v4305_v6 = vpop.f32.mrb[11].mxu0  ;;  %v1257_v1 = vsel %vm1247_vm3, %v1254_v60, %v1256_v3  ;;  %v1498_v38 = vrot.slane %v1399_v8, 2  ;;  %v1499_v39 = vrot.slane %v1400_v9, 2  ;;  %v1673_v40 = vadd.f32 %v1641_v10, %v1605_v61 }
  0xfd   : > { %v1085_v41 = vmul.f32 %v4324_v19, %v1025_v35  ;;  %v1086_v42 = vmul.f32 %v4324_v19, %v1026_v37  ;;  %v1674_v7 = vadd.f32 %v1642_v14, %v1606_v63  ;;  %v1807_v44 = vsel %vm1247_vm3, %v1805_v15, %v1806_v20 }
  0xfe   : > { %v1501_v46 = vrot.slane %v1401_v22, 2  ;;  %v2052_v47 = vrot.slane %v1955_v25, 2  ;;  %v1809_v48 = vsel %vm1247_vm3, %v1806_v20, %v1808_v24  ;;  %v837_v49 = vmul.f32 %v4285_v59, %v4262_v34 }
  0xff   : > { %v4309_v11 = vpop.f32.mrb[12].mxu0  ;;  %v1362_v50 = vadd.f32 %v1255_v27, %v1085_v41  ;;  %v1363_v52 = vadd.f32 %v1257_v1, %v1086_v42  ;;  %v2049_v53 = vrot.slane %v1953_v29, 2  ;;  %v2050_v54 = vrot.slane %v1954_v30, 2 }
 0x100   : > { %v4316_v16 = vpop.f32.mrb[13].mxu0  ;;  %v1500_v35 = vsel %vm1492_vm4, %v1498_v38, %v1499_v39  ;;  %v1917_v37 = vadd.f32 %v1807_v44, %v1673_v40  ;;  %v4395_v60 = vmul.f32 %v4303_v5, %v1030_v45  ;;  %v4398_v61 = vmul.f32 %v4319_v17, %v1030_v45 }
 0x101   : > { %v1918_v63 = vadd.f32 %v1809_v48, %v1674_v7  ;;  %v1714_v3 = vmul.f32 %v4343_v43, %v1030_v45  ;;  %v4402_v59 = vmul.f32 %v4357_v55, %v1030_v45  ;;  %v4405_v8 = vmul.f32 %v4371_v21, %v1030_v45 }
 0x102   : > { %v1502_v9 = vsel %vm1492_vm4, %v1499_v39, %v1501_v46  ;;  %v4409_v10 = vmul.f32 %v4376_v26, %v1030_v45  ;;  %v1712_v14 = vmul.f32 %v4343_v43, %v1028_v56  ;;  %v1713_v15 = vmul.f32 %v4343_v43, %v4391_v58 }
 0x103   : > { %v4321_v18 = vpop.f32.mrb[14].mxu0  ;;  %v1607_v20 = vadd.f32 %v1500_v35, %v1362_v50  ;;  %v1608_v22 = vadd.f32 %v1502_v9, %v1363_v52  ;;  %v2051_v24 = vsel %vm1492_vm4, %v2049_v53, %v2050_v54  ;;  %v836_v25 = vmul.f32 %v4262_v34, %v4287_v62 }
 0x104   : > { %v4326_v23 = vpop.f32.mrb[15].mxu0  ;;  %v2053_v27 = vsel %vm1492_vm4, %v2050_v54, %v2052_v47  ;;  %v2161_v29 = vadd.f32 %v2051_v24, %v1917_v37  ;;  %v1813_v39 = vrot.slane %v1714_v3, 1  ;;  %v2057_v40 = vrot.slane %v4402_v59, 2  ;;  %v4517_v59 = vld [vmem:[%s6777_s5] ss:$0 sm:$0xff] }
 0x105   : > { %v2162_v38 = vadd.f32 %v2053_v27, %v1918_v63  ;;  %v2364_v41 = vrot.slane %v4405_v8, 1  ;;  %v2608_v42 = vrot.slane %v4409_v10, 2  ;;  %v4424_v7 = vmul.f32 %v4303_v5, %v1028_v56 }
 0x106   : > { %v1810_v44 = vrot.slane %v1712_v14, 1  ;;  %v1811_v62 = vrot.slane %v1713_v15, 1  ;;  %v4427_v45 = vmul.f32 %v4324_v19, %v1028_v56  ;;  %v4431_v46 = vmul.f32 %v4324_v19, %v4391_v58 }
 0x107   : > { %v4334_v28 = vpop.f32.mrb[16].mxu0  ;;  %v1643_v47 = vmul.f32 %v4351_v51, %v1028_v56  ;;  %v1644_v48 = vmul.f32 %v4351_v51, %v4391_v58  ;;  %v4438_v50 = vmul.f32 %v4303_v5, %v4391_v58  ;;  %v4441_v52 = vmul.f32 %v4319_v17, %v1028_v56 }
 0x108   : > { %v4339_v32 = vpop.f32.mrb[17].mxu0  ;;  %v2265_v53 = vmul.f32 %v4371_v21, %v1028_v56  ;;  %v2266_v54 = vmul.f32 %v4371_v21, %v4391_v58  ;;  %v876_v63 = vadd.f32 %v4267_v36, %v837_v49  ;;  %v875_v3 = vadd.f32 %v4267_v36, %v836_v25 }
 0x109   : > { %v1675_v35 = vadd.f32 %v1643_v47, %v1607_v20  ;;  %v1676_v37 = vadd.f32 %v1644_v48, %v1608_v22  ;;  %v1258_v8 = vrot.slane %v4424_v7, 1  ;;  %v1812_v9 = vsel %vm1247_vm3, %v1810_v44, %v1811_v62 }
 0x10a   : > { %v1956_v14 = vmul.f32 %v4357_v55, %v1028_v56  ;;  %v1957_v15 = vmul.f32 %v4357_v55, %v4391_v58  ;;  %v1814_v24 = vsel %vm1247_vm3, %v1811_v62, %v1813_v39  ;;  %v2197_v27 = vmul.f32 %v4382_v31, %v1028_v56 }
 0x10b   : > { %v4362_v57 = vpop.f32.mrb[18].mxu0  ;;  %v908_v33 = vmax.f32 %v876_v63, 0.0  ;;  %v907_v20 = vmax.f32 %v875_v3, 0.0  ;;  %v2361_v49 = vrot.slane %v2265_v53, 1  ;;  %v2362_v47 = vrot.slane %v2266_v54, 1  ;;  %v4469_v63 = vld [vmem:[#allocation2 + $0x48] sm:$0xff] }
 0x10c   : > { %v4367_v13 = vpop.f32.mrb[19].mxu0  ;;  %v2509_v25 = vmul.f32 %v4376_v26, %v1028_v56  ;;  %v2510_v7 = vmul.f32 %v4376_v26, %v4391_v58  ;;  %v1259_v48 = vrot.slane %v4438_v50, 1  ;;  %v1919_v1 = vadd.f32 %v1812_v9, %v1675_v35 }
 0x10d   : > { %v1920_v30 = vadd.f32 %v1814_v24, %v1676_v37  ;;  %997 = vst.msk [vmem:[#allocation2 + $0x69] sm:$0xff] %vm933_vm1, %v908_v33  ;;  %996 = vst.msk [vmem:[#allocation2 + $0x61] sm:$0xff] %vm933_vm1, %v907_v20  ;;  %v839_v39 = vmul.f32 %v4291_v0, %v4262_v34  ;;  %v2054_v62 = vrot.slane %v1956_v14, 2  ;;  %v2055_v53 = vrot.slane %v1957_v15, 2  ;;  %v4479_v15 = vld [vmem:[#allocation2 + $0x50] sm:$0xff] }
 0x10e   : > { %v2198_v56 = vmul.f32 %v4382_v31, %v4391_v58  ;;  %v2229_v54 = vadd.f32 %v2197_v27, %v2161_v29  ;;  %v838_v50 = vmul.f32 %v4262_v34, %v4295_v2  ;;  %v841_v33 = vmul.f32 %v4300_v4, %v4262_v34 }
 0x10f   : > { %v4455_v22 = vpop.f32.mrb[20].mxu0  ;;  %v878_v3 = vadd.f32 %v4267_v36, %v839_v39  ;;  %v840_v35 = vmul.f32 %v4262_v34, %v4305_v6  ;;  %v2363_v37 = vsel %vm1247_vm3, %v2361_v49, %v2362_v47  ;;  %v2605_v9 = vrot.slane %v2509_v25, 2 }
 0x110   : > { %v4460_v44 = vpop.f32.mrb[21].mxu0  ;;  %v2230_v0 = vadd.f32 %v2198_v56, %v2162_v38  ;;  %v2606_v14 = vrot.slane %v2510_v7, 2  ;;  %v877_v24 = vadd.f32 %v4267_v36, %v838_v50  ;;  %v880_v27 = vadd.f32 %v4267_v36, %v841_v33  ;;  %v1033_v38 = vld [vmem:[#allocation2 + $0x58] sm:$0x3] }
 0x111   : > { %v910_v29 = vmax.f32 %v878_v3, 0.0  ;;  %v879_v2 = vadd.f32 %v4267_v36, %v840_v35  ;;  %v2365_v20 = vsel %vm1247_vm3, %v2362_v47, %v2364_v41  ;;  %v2473_v4 = vadd.f32 %v2363_v37, %v2229_v54 }
 0x112   : > { %v2056_v39 = vsel %vm1492_vm4, %v2054_v62, %v2055_v53  ;;  %v2268_v6 = vmul.f32 %v4371_v21, %v4469_v63  ;;  %v2269_v49 = vmul.f32 %v4371_v21, %v4479_v15  ;;  %v909_v25 = vmax.f32 %v877_v24, 0.0 }
 0x113   : > { %999 = vst.msk [vmem:[#allocation2 + $0x81] sm:$0xff] %vm933_vm1, %v910_v29  ;;  %v912_v7 = vmax.f32 %v880_v27, 0.0  ;;  %v911_v56 = vmax.f32 %v879_v2, 0.0  ;;  %v4493_v3 = vmul.f32 %v4319_v17, %v4391_v58  ;;  %v1503_v41 = vrot.slane %v4441_v52, 2  ;;  %v4507_v58 = vpop.f32.mrb[22].mxu0 }
 0x114   : > { %v2474_v47 = vadd.f32 %v2365_v20, %v2230_v0  ;;  %v2163_v62 = vadd.f32 %v2056_v39, %v1919_v1  ;;  %v1260_v54 = vsel %vm1247_vm3, %v1258_v8, %v1259_v48  ;;  %v2607_v50 = vsel %vm1492_vm4, %v2605_v9, %v2606_v14  ;;  %998 = vst.msk [vmem:[#allocation2 + $0x79] sm:$0xff] %vm933_vm1, %v909_v25 }
 0x115   : > { %v2609_v33 = vsel %vm1492_vm4, %v2606_v14, %v2608_v42  ;;  %v2058_v35 = vsel %vm1492_vm4, %v2055_v53, %v2057_v40  ;;  %1001 = vst.msk [vmem:[#allocation2 + $0x99] sm:$0xff] %vm933_vm1, %v912_v7  ;;  %1000 = vst.msk [vmem:[#allocation2 + $0x91] sm:$0xff] %vm933_vm1, %v911_v56  ;;  %v2717_v1 = vadd.f32 %v2607_v50, %v2473_v4  ;;  %v4512_v42 = vpop.f32.mrb[23].mxu0  ;;  %v2366_v40 = vrot.slane %v2268_v6, 1 }
 0x116   : > { %v2270_v8 = vmul.f32 %v4371_v21, %v1033_v38  ;;  %v2164_v0 = vadd.f32 %v2058_v35, %v1920_v30  ;;  %v2199_v10 = vmul.f32 %v4382_v31, %v4469_v63  ;;  %v2367_v53 = vrot.slane %v2269_v49, 1 }
 0x117   : > { %v2512_v37 = vmul.f32 %v4376_v26, %v4469_v63  ;;  %v2513_v9 = vmul.f32 %v4376_v26, %v4479_v15  ;;  %v6869_v30 = vrot.slane %v4395_v60, 1  ;;  %v2718_v29 = vadd.f32 %v2609_v33, %v2474_v47  ;;  %v4541_v25 = vpop.f32.mrb[24].mxu0 }
 0x118   : > { %v1162_v24 = vmul.f32 %v4303_v5, %v1033_v38  ;;  %v2231_v27 = vadd.f32 %v2199_v10, %v2163_v62  ;;  %v4528_v2 = vmul.f32 %v4319_v17, %v1033_v38  ;;  %v4531_v20 = vmul.f32 %v4343_v43, %v1033_v38  ;;  %v4544_v50 = vpop.f32.mrb[25].mxu0 }
 0x119   : > { %v1262_v14 = vsel %vm1247_vm3, %v1259_v48, %v6869_v30  ;;  %v2514_v4 = vmul.f32 %v4376_v26, %v1033_v38  ;;  %v2200_v39 = vmul.f32 %v4382_v31, %v4479_v15  ;;  %v2756_v6 = vmul.f32 %v4517_v59, %v2717_v1  ;;  %6870 = vst [vmem:[#allocation8_spill] sm:$0xff] %v4544_v50 }
 0x11a   : > { %v2369_v60 = vrot.slane %v2270_v8, 1  ;;  %v1160_v48 = vmul.f32 %v4303_v5, %v4469_v63  ;;  %v1161_v49 = vmul.f32 %v4303_v5, %v4479_v15  ;;  %v2368_v56 = vsel %vm1247_vm3, %v2366_v40, %v2367_v53  ;;  %v4552_v8 = vld [vmem:[%s6778_s6] ss:$0 sm:$0xff] }
 0x11b   : > { %v2232_v7 = vadd.f32 %v2200_v39, %v2164_v0  ;;  %v2610_v47 = vrot.slane %v2512_v37, 2  ;;  %v2611_v62 = vrot.slane %v2513_v9, 2  ;;  %v1364_v33 = vadd.f32 %v1260_v54, %v4427_v45 }
 0x11c   : > { %v1504_v35 = vrot.slane %v4493_v3, 2  ;;  %v2757_v1 = vmul.f32 %v4517_v59, %v2718_v29  ;;  %v2475_v10 = vadd.f32 %v2368_v56, %v2231_v27  ;;  %v1365_v0 = vadd.f32 %v1262_v14, %v4431_v46  ;;  %v4561_v29 = vpop.f32.mrb[26].mxu0 }
 0x11d   : > { %v1266_v30 = vrot.slane %v1162_v24, 1  ;;  %v4557_v37 = vmul.f32 %v4357_v55, %v1033_v38  ;;  %v1818_v45 = vrot.slane %v4531_v20, 1  ;;  %v2613_v54 = vrot.slane %v2514_v4, 2  ;;  %6871 = vst [vmem:[#allocation9_spill] sm:$0xff] %v4561_v29  ;;  %v4567_v14 = vpop.f32.mrb[27].mxu0 }
 0x11e   : > { %v1263_v3 = vrot.slane %v1160_v48, 1  ;;  %v2370_v9 = vsel %vm1247_vm3, %v2367_v53, %v2369_v60  ;;  %v4564_v39 = vadd.f32 %v4552_v8, %v2756_v6  ;;  %v1264_v27 = vrot.slane %v1161_v49, 1  ;;  %6873 = vst [vmem:[#allocation11_spill] sm:$0xff] %v4567_v14 }
 0x11f   : > { %v2476_v56 = vadd.f32 %v2370_v9, %v2232_v7  ;;  %v2612_v46 = vsel %vm1492_vm4, %v2610_v47, %v2611_v62  ;;  %v4570_v38 = vadd.f32 %v4552_v8, %v2757_v1  ;;  %v1089_v24 = vmul.f32 %v4324_v19, %v4469_v63 }
 0x120   : > { %6872 = vst [vmem:[#allocation10_spill] sm:$0xff] %v4564_v39  ;;  %v1405_v53 = vmul.f32 %v4319_v17, %v4469_v63  ;;  %v2719_v20 = vadd.f32 %v2612_v46, %v2475_v10  ;;  %v1505_v4 = vsel %vm1492_vm4, %v1503_v41, %v1504_v35  ;;  %v6875_v6 = vrot.slane %v4398_v61, 2 }
 0x121   : > { %6874 = vst [vmem:[#allocation12_spill] sm:$0xff] %v4570_v38  ;;  %v1715_v48 = vmul.f32 %v4343_v43, %v4469_v63  ;;  %v1716_v49 = vmul.f32 %v4343_v43, %v4479_v15  ;;  %v1406_v7 = vmul.f32 %v4319_v17, %v4479_v15  ;;  %v1609_v47 = vadd.f32 %v1505_v4, %v1364_v33 }
 0x122   : > { %v1507_v60 = vsel %vm1492_vm4, %v1504_v35, %v6875_v6  ;;  %v2614_v10 = vsel %vm1492_vm4, %v2611_v62, %v2613_v54  ;;  %v6791_v52 = vmax.f32 %v4564_v39, 0.0  ;;  %v1265_v41 = vsel %vm1247_vm3, %v1263_v3, %v1264_v27 }
 0x123   : > { %v1610_v1 = vadd.f32 %v1507_v60, %v1365_v0  ;;  %v1267_v61 = vsel %vm1247_vm3, %v1264_v27, %v1266_v30  ;;  %v2720_v35 = vadd.f32 %v2614_v10, %v2476_v56  ;;  %v6789_v9 = vmax.f32 %v4570_v38, 0.0 }
 0x124   : > { %v1645_v46 = vmul.f32 %v4351_v51, %v4469_v63  ;;  %v1646_v6 = vmul.f32 %v4351_v51, %v4479_v15  ;;  %v2758_v33 = vmul.f32 %v4517_v59, %v2719_v20  ;;  %v1815_v0 = vrot.slane %v1715_v48, 1 }
 0x125   : > { %v1816_v4 = vrot.slane %v1716_v49, 1  ;;  %v1959_v62 = vmul.f32 %v4357_v55, %v4469_v63  ;;  %v1960_v54 = vmul.f32 %v4357_v55, %v4479_v15  ;;  %v2062_v30 = vrot.slane %v4557_v37, 2 }
 0x126   : > { %v1090_v3 = vmul.f32 %v4324_v19, %v4479_v15  ;;  %v1677_v27 = vadd.f32 %v1645_v46, %v1609_v47  ;;  %v1678_v56 = vadd.f32 %v1646_v6, %v1610_v1  ;;  %v1366_v60 = vadd.f32 %v1265_v41, %v1089_v24  ;;  %v4615_v15 = vpop.f32.mrb[28].mxu0  ;;  %v1036_v1 = vld [vmem:[#allocation2 + $0x70] sm:$0x3] }
 0x127   : > { %v1508_v10 = vrot.slane %v1405_v53, 2  ;;  %v1509_v40 = vrot.slane %v1406_v7, 2  ;;  %v2759_v20 = vmul.f32 %v4517_v59, %v2720_v35  ;;  %v2859_v48 = vsel %vm933_vm1, %v6791_v52, 0.0  ;;  %6877 = vst [vmem:[#allocation14_spill] sm:$0xff] %v4615_v15  ;;  %v4619_v41 = vpop.f32.mrb[29].mxu0 }
 0x128   : > { %v2860_v63 = vsel %vm933_vm1, %v6789_v9, 0.0  ;;  %v1367_v49 = vadd.f32 %v1267_v61, %v1090_v3  ;;  %v4613_v37 = vadd.f32 %v4552_v8, %v2758_v33  ;;  %v1817_v24 = vsel %vm1247_vm3, %v1815_v0, %v1816_v4  ;;  %6878 = vst [vmem:[#allocation15_spill] sm:$0xff] %v4619_v41  ;;  %v4624_v61 = vld [vmem:[#allocation2 + $0x60] sm:$0xff]  ;;  %v4626_v33 = vld [vmem:[#allocation2 + $0x68] sm:$0xff] }
 0x129   : > { %v1819_v53 = vsel %vm1247_vm3, %v1816_v4, %v1818_v45  ;;  %v2059_v7 = vrot.slane %v1959_v62, 2  ;;  %v2060_v47 = vrot.slane %v1960_v54, 2  ;;  %v1921_v35 = vadd.f32 %v1817_v24, %v1677_v27 }
 0x12a   : > { %6876 = vst [vmem:[#allocation13_spill] sm:$0xff] %v4613_v37  ;;  %v1922_v46 = vadd.f32 %v1819_v53, %v1678_v56  ;;  %v2861_v6 = vadd.f32 %v2860_v63, %v2859_v48  ;;  %v4622_v9 = vadd.f32 %v4552_v8, %v2759_v20  ;;  %v843_v0 = vmul.f32 %v4309_v11, %v4262_v34  ;;  %v4644_v63 = vpop.f32.mrb[30].mxu0 }
 0x12b   : > { %v842_v45 = vmul.f32 %v4262_v34, %v4316_v16  ;;  %v6790_v4 = vmax.f32 %v4613_v37, 0.0  ;;  %v2273_v62 = vmul.f32 %v4371_v21, %v1036_v1  ;;  %v1510_v54 = vsel %vm1492_vm4, %v1508_v10, %v1509_v40  ;;  %6881 = vst [vmem:[#allocation17_spill] sm:$0xff] %v4644_v63  ;;  %v4650_v10 = vpop.f32.mrb[31].mxu0 }
 0x12c   : > { %6879 = vst [vmem:[#allocation16_spill] sm:$0xff] %v4622_v9  ;;  %v6880_v3 = vrot.slane %v4528_v2, 2  ;;  %v4638_v56 = vadd.f32 %v1510_v54, %v1366_v60  ;;  %v2061_v48 = vsel %vm1492_vm4, %v2059_v7, %v2060_v47  ;;  %v2063_v11 = vsel %vm1492_vm4, %v2060_v47, %v2062_v30  ;;  %6882 = vst [vmem:[#allocation18_spill] sm:$0xff] %v4650_v10 }
 0x12d   : > { %v2165_v16 = vadd.f32 %v2061_v48, %v1921_v35  ;;  %v2166_v24 = vadd.f32 %v2063_v11, %v1922_v46  ;;  %v2271_v53 = vmul.f32 %v4371_v21, %v4624_v61  ;;  %v2272_v2 = vmul.f32 %v4371_v21, %v4626_v33 }
 0x12e   : > { %v1512_v27 = vsel %vm1492_vm4, %v1509_v40, %v6880_v3  ;;  %v6796_v40 = vmax.f32 %v4622_v9, 0.0  ;;  %v4654_v60 = vadd.f32 %v4267_v36, %v843_v0  ;;  %v4661_v30 = vmul.f32 %v4321_v18, %v4262_v34 }
 0x12f   : > { %v4640_v20 = vadd.f32 %v1512_v27, %v1367_v49  ;;  %v4657_v49 = vadd.f32 %v4267_v36, %v842_v45  ;;  %v2862_v7 = vsel %vm933_vm1, %v6790_v4, 0.0  ;;  %v2374_v47 = vrot.slane %v2273_v62, 1 }
 0x130   : > { %v2517_v35 = vmul.f32 %v4376_v26, %v1036_v1  ;;  %v4669_v46 = vmul.f32 %v4262_v34, %v4326_v23  ;;  %v1163_v0 = vmul.f32 %v4303_v5, %v4624_v61  ;;  %v1164_v45 = vmul.f32 %v4303_v5, %v4626_v33 }
 0x131   : > { %v2201_v18 = vmul.f32 %v4382_v31, %v4624_v61  ;;  %v2202_v54 = vmul.f32 %v4382_v31, %v4626_v33  ;;  %v2371_v3 = vrot.slane %v2271_v53, 1  ;;  %v2372_v62 = vrot.slane %v2272_v2, 1 }
 0x132   : > { %v2515_v27 = vmul.f32 %v4376_v26, %v4624_v61  ;;  %v2516_v23 = vmul.f32 %v4376_v26, %v4626_v33  ;;  %v1165_v48 = vmul.f32 %v4303_v5, %v1036_v1  ;;  %v4685_v11 = vmul.f32 %v4319_v17, %v1036_v1 }
 0x133   : > { %v2233_v4 = vadd.f32 %v2201_v18, %v2165_v16  ;;  %v2234_v52 = vadd.f32 %v2202_v54, %v2166_v24  ;;  %v2864_v37 = vsel %vm933_vm1, %v6796_v40, 0.0  ;;  %v1720_v53 = vmul.f32 %v4343_v43, %v1036_v1 }
 0x134   : > { %v4692_v2 = vmul.f32 %v4357_v55, %v1036_v1  ;;  %v4696_v38 = vmul.f32 %v4334_v28, %v4262_v34  ;;  %v2863_v39 = vadd.f32 %v2862_v7, %v2861_v6  ;;  %v2618_v12 = vrot.slane %v2517_v35, 2 }
 0x135   : > { %v1268_v10 = vrot.slane %v1163_v0, 1  ;;  %v1269_v63 = vrot.slane %v1164_v45, 1  ;;  %v2373_v16 = vsel %vm1247_vm3, %v2371_v3, %v2372_v62  ;;  %v2375_v24 = vsel %vm1247_vm3, %v2372_v62, %v2374_v47 }
 0x136   : > { %v2615_v18 = vrot.slane %v2515_v27, 2  ;;  %v2616_v54 = vrot.slane %v2516_v23, 2  ;;  %v1271_v40 = vrot.slane %v1165_v48, 1  ;;  %v1516_v9 = vrot.slane %v4685_v11, 2  ;;  %v1039_v48 = vld [vmem:[#allocation2 + $0x88] sm:$0x3] }
 0x137   : > { %v2477_v41 = vadd.f32 %v2373_v16, %v2233_v4  ;;  %v2478_v1 = vadd.f32 %v2375_v24, %v2234_v52  ;;  %v1823_v15 = vrot.slane %v1720_v53, 1  ;;  %v4703_v28 = vmul.f32 %v4319_v17, %v4624_v61  ;;  %v4724_v53 = vld [vmem:[#allocation2 + $0x78] sm:$0xff]  ;;  %v4726_v16 = vld [vmem:[#allocation2 + $0x80] sm:$0xff] }
 0x138   : > { %v1718_v6 = vmul.f32 %v4343_v43, %v4624_v61  ;;  %v1719_v7 = vmul.f32 %v4343_v43, %v4626_v33  ;;  %v4709_v35 = vadd.f32 %v2864_v37, %v2863_v39  ;;  %v1091_v0 = vmul.f32 %v4324_v19, %v4624_v61 }
 0x139   : > { %v1409_v52 = vmul.f32 %v4319_v17, %v4626_v33  ;;  %v1270_v4 = vsel %vm1247_vm3, %v1268_v10, %v1269_v63  ;;  %v1647_v45 = vmul.f32 %v4351_v51, %v4624_v61  ;;  %v2617_v3 = vsel %vm1492_vm4, %v2615_v18, %v2616_v54 }
 0x13a   : > { %v2619_v62 = vsel %vm1492_vm4, %v2616_v54, %v2618_v12  ;;  %v1272_v39 = vsel %vm1247_vm3, %v1269_v63, %v1271_v40  ;;  %v1648_v37 = vmul.f32 %v4351_v51, %v4626_v33  ;;  %v2721_v27 = vadd.f32 %v2617_v3, %v2477_v41 }
 0x13b   : > { %v2722_v23 = vadd.f32 %v2619_v62, %v2478_v1  ;;  %v1092_v10 = vmul.f32 %v4324_v19, %v4626_v33  ;;  %v1513_v24 = vrot.slane %v4703_v28, 2  ;;  %v1820_v18 = vrot.slane %v1718_v6, 1 }
 0x13c   : > { %v1821_v47 = vrot.slane %v1719_v7, 1  ;;  %v1368_v12 = vadd.f32 %v1270_v4, %v1091_v0  ;;  %v1514_v54 = vrot.slane %v1409_v52, 2  ;;  %v1679_v63 = vadd.f32 %v1647_v45, %v4638_v56 }
 0x13d   : > { %v1680_v40 = vadd.f32 %v1648_v37, %v4640_v20  ;;  %v1369_v41 = vadd.f32 %v1272_v39, %v1092_v10  ;;  %v1168_v1 = vmul.f32 %v4303_v5, %v1039_v48  ;;  %v1166_v3 = vmul.f32 %v4303_v5, %v4724_v53 }
 0x13e   : > { %v1167_v62 = vmul.f32 %v4303_v5, %v4726_v16  ;;  %v1962_v28 = vmul.f32 %v4357_v55, %v4624_v61  ;;  %v1963_v6 = vmul.f32 %v4357_v55, %v4626_v33  ;;  %v2760_v7 = vmul.f32 %v4517_v59, %v2721_v27 }
 0x13f   : > { %v2761_v56 = vmul.f32 %v4517_v59, %v2722_v23  ;;  %v1822_v20 = vsel %vm1247_vm3, %v1820_v18, %v1821_v47  ;;  %v1824_v0 = vsel %vm1247_vm3, %v1821_v47, %v1823_v15  ;;  %v4747_v52 = vmul.f32 %v4319_v17, %v1039_v48 }
 0x140   : > { %v4750_v4 = vmul.f32 %v4343_v43, %v1039_v48  ;;  %v1923_v45 = vadd.f32 %v1822_v20, %v1679_v63  ;;  %v1924_v39 = vadd.f32 %v1824_v0, %v1680_v40  ;;  %v4753_v61 = vmul.f32 %v4357_v55, %v1039_v48 }
 0x141   : > { %v4756_v33 = vmul.f32 %v4371_v21, %v1039_v48  ;;  %v1276_v37 = vrot.slane %v1168_v1, 1  ;;  %v4759_v27 = vmul.f32 %v4376_v26, %v1039_v48  ;;  %v1273_v23 = vrot.slane %v1166_v3, 1 }
 0x142   : > { %v1274_v15 = vrot.slane %v1167_v62, 1  ;;  %v2064_v47 = vrot.slane %v1962_v28, 2  ;;  %v4762_v10 = vadd.f32 %v4552_v8, %v2760_v7  ;;  %v4765_v18 = vadd.f32 %v4552_v8, %v2761_v56 }
 0x143   : > { %v4769_v63 = vmul.f32 %v4319_v17, %v4724_v53  ;;  %v2065_v40 = vrot.slane %v1963_v6, 2  ;;  %v4775_v48 = vmul.f32 %v4319_v17, %v4726_v16  ;;  %v1093_v28 = vmul.f32 %v4324_v19, %v4724_v53 }
 0x144   : > { %6883 = vst [vmem:[#allocation19_spill] sm:$0xff] %v4762_v10  ;;  %6884 = vst [vmem:[#allocation20_spill] sm:$0xff] %v4765_v18  ;;  %v1094_v7 = vmul.f32 %v4324_v19, %v4726_v16  ;;  %v1275_v56 = vsel %vm1247_vm3, %v1273_v23, %v1274_v15  ;;  %v1277_v0 = vsel %vm1247_vm3, %v1274_v15, %v1276_v37  ;;  %v6798_v1 = vmax.f32 %v4762_v10, 0.0 }
 0x145   : > { %v1515_v20 = vsel %vm1492_vm4, %v1513_v24, %v1514_v54  ;;  %v6799_v3 = vmax.f32 %v4765_v18, 0.0  ;;  %v1517_v62 = vsel %vm1492_vm4, %v1514_v54, %v1516_v9  ;;  %v1721_v23 = vmul.f32 %v4343_v43, %v4724_v53 }
 0x146   : > { %v1613_v50 = vadd.f32 %v1515_v20, %v1368_v12  ;;  %v1614_v6 = vadd.f32 %v1517_v62, %v1369_v41  ;;  %v4796_v37 = vadd.f32 %v1275_v56, %v1093_v28  ;;  %v4798_v24 = vadd.f32 %v1277_v0, %v1094_v7 }
 0x147   : > { %v1649_v15 = vmul.f32 %v4351_v51, %v4724_v53  ;;  %v1722_v11 = vmul.f32 %v4343_v43, %v4726_v16  ;;  %v1650_v9 = vmul.f32 %v4351_v51, %v4726_v16  ;;  %v4808_v12 = vmul.f32 %v4357_v55, %v4724_v53 }
 0x148   : > { %v914_v54 = vmax.f32 %v4654_v60, 0.0  ;;  %v913_v41 = vmax.f32 %v4657_v49, 0.0  ;;  %v4815_v20 = vsel %vm933_vm1, %v6798_v1, 0.0  ;;  %v4820_v62 = vsel %vm933_vm1, %v6799_v3, 0.0 }
 0x149   : > { %6885 = vst [vmem:[#allocation21_spill] sm:$0xff] %v4820_v62  ;;  %v4824_v28 = vmul.f32 %v4357_v55, %v4726_v16  ;;  %v2066_v7 = vsel %vm1492_vm4, %v2064_v47, %v2065_v40  ;;  %v1681_v56 = vadd.f32 %v1649_v15, %v1613_v50  ;;  %v1682_v60 = vadd.f32 %v1650_v9, %v1614_v6  ;;  %v1042_v6 = vld [vmem:[#allocation2 + $0xa0] sm:$0x3] }
 0x14a   : > { %v1825_v0 = vrot.slane %v1721_v23, 1  ;;  %v2167_v49 = vadd.f32 %v2066_v7, %v1923_v45  ;;  %1003 = vst.msk [vmem:[#allocation2 + $0xb1] sm:$0xff] %vm933_vm1, %v914_v54  ;;  %1002 = vst.msk [vmem:[#allocation2 + $0xa9] sm:$0xff] %vm933_vm1, %v913_v41  ;;  %v1826_v1 = vrot.slane %v1722_v11, 1  ;;  %v6886_v14 = vrot.slane %v4692_v2, 2 }
 0x14b   : > { %v2203_v29 = vmul.f32 %v4382_v31, %v4724_v53  ;;  %v2274_v18 = vmul.f32 %v4371_v21, %v4724_v53  ;;  %v2275_v50 = vmul.f32 %v4371_v21, %v4726_v16  ;;  %v2518_v45 = vmul.f32 %v4376_v26, %v4724_v53 }
 0x14c   : > { %v2068_v3 = vsel %vm1492_vm4, %v2065_v40, %v6886_v14  ;;  %v2519_v47 = vmul.f32 %v4376_v26, %v4726_v16  ;;  %v884_v2 = vadd.f32 %v4267_v36, %v4661_v30  ;;  %v883_v14 = vadd.f32 %v4267_v36, %v4669_v46 }
 0x14d   : > { %v886_v40 = vadd.f32 %v4267_v36, %v4696_v38  ;;  %v846_v23 = vmul.f32 %v4262_v34, %v4339_v32  ;;  %v849_v15 = vmul.f32 %v4362_v57, %v4262_v34  ;;  %v2168_v53 = vadd.f32 %v2068_v3, %v1924_v39 }
 0x14e   : > { %v2204_v11 = vmul.f32 %v4382_v31, %v4726_v16  ;;  %v2235_v9 = vadd.f32 %v2203_v29, %v2167_v49  ;;  %v916_v54 = vmax.f32 %v884_v2, 0.0  ;;  %v915_v30 = vmax.f32 %v883_v14, 0.0  ;;  %v1040_v14 = vld [vmem:[#allocation2 + $0x90] sm:$0xff] }
 0x14f   : > { %v918_v41 = vmax.f32 %v886_v40, 0.0  ;;  %v885_v7 = vadd.f32 %v4267_v36, %v846_v23  ;;  %v888_v46 = vadd.f32 %v4267_v36, %v849_v15  ;;  %v2376_v10 = vrot.slane %v2274_v18, 1  ;;  %v1041_v40 = vld [vmem:[#allocation2 + $0x98] sm:$0xff] }
 0x150   : > { %v2377_v38 = vrot.slane %v2275_v50, 1  ;;  %v4857_v62 = vmul.f32 %v4303_v5, %v1042_v6  ;;  %v4860_v32 = vmul.f32 %v4319_v17, %v1042_v6  ;;  %1005 = vst.msk [vmem:[#allocation2 + $0xc9] sm:$0xff] %vm933_vm1, %v916_v54  ;;  %v2620_v34 = vrot.slane %v2518_v45, 2  ;;  %1004 = vst.msk [vmem:[#allocation2 + $0xc1] sm:$0xff] %vm933_vm1, %v915_v30 }
 0x151   : > { %v2621_v57 = vrot.slane %v2519_v47, 2  ;;  %1007 = vst.msk [vmem:[#allocation2 + $0xe1] sm:$0xff] %vm933_vm1, %v918_v41  ;;  %v917_v29 = vmax.f32 %v885_v7, 0.0  ;;  %v920_v16 = vmax.f32 %v888_v46, 0.0  ;;  %v1827_v36 = vsel %vm1247_vm3, %v1825_v0, %v1826_v1 }
 0x152   : > { %v6887_v39 = vrot.slane %v4750_v4, 1  ;;  %v2069_v3 = vrot.slane %v4808_v12, 2  ;;  %v2070_v49 = vrot.slane %v4824_v28, 2  ;;  %v1925_v50 = vadd.f32 %v1827_v36, %v1681_v56 }
 0x153   : > { %v2236_v45 = vadd.f32 %v2204_v11, %v2168_v53  ;;  %v4872_v47 = vmul.f32 %v4343_v43, %v1042_v6  ;;  %1006 = vst.msk [vmem:[#allocation2 + $0xd9] sm:$0xff] %vm933_vm1, %v917_v29  ;;  %1009 = vst.msk [vmem:[#allocation2 + $0xf9] sm:$0xff] %vm933_vm1, %v920_v16  ;;  %v2378_v4 = vsel %vm1247_vm3, %v2376_v10, %v2377_v38  ;;  %v1526_v12 = vrot.slane %v4860_v32, 2 }
 0x154   : > { %v1829_v18 = vsel %vm1247_vm3, %v1826_v1, %v6887_v39  ;;  %v1281_v1 = vrot.slane %v4857_v62, 1  ;;  %v2279_v28 = vmul.f32 %v4371_v21, %v1042_v6  ;;  %v6888_v56 = vrot.slane %v4756_v33, 1 }
 0x155   : > { %v1926_v2 = vadd.f32 %v1829_v18, %v1682_v60  ;;  %v2479_v0 = vadd.f32 %v2378_v4, %v2235_v9  ;;  %v2622_v23 = vsel %vm1492_vm4, %v2620_v34, %v2621_v57  ;;  %v4885_v15 = vmul.f32 %v4357_v55, %v1042_v6 }
 0x156   : > { %v2380_v60 = vsel %vm1247_vm3, %v2377_v38, %v6888_v56  ;;  %v6889_v53 = vrot.slane %v4759_v27, 2  ;;  %v2071_v62 = vsel %vm1492_vm4, %v2069_v3, %v2070_v49  ;;  %v2277_v11 = vmul.f32 %v4371_v21, %v1040_v14 }
 0x157   : > { %v2278_v54 = vmul.f32 %v4371_v21, %v1041_v40  ;;  %v2480_v30 = vadd.f32 %v2380_v60, %v2236_v45  ;;  %v1833_v33 = vrot.slane %v4872_v47, 1  ;;  %v4895_v9 = vmul.f32 %v4376_v26, %v1042_v6 }
 0x158   : > { %v2624_v10 = vsel %vm1492_vm4, %v2621_v57, %v6889_v53  ;;  %v2169_v41 = vadd.f32 %v2071_v62, %v1925_v50  ;;  %v2384_v7 = vrot.slane %v2279_v28, 1  ;;  %v1095_v46 = vmul.f32 %v4324_v19, %v1040_v14 }
 0x159   : > { %v1169_v27 = vmul.f32 %v4303_v5, %v1040_v14  ;;  %v1170_v38 = vmul.f32 %v4303_v5, %v1041_v40  ;;  %v2723_v34 = vadd.f32 %v2622_v23, %v2479_v0  ;;  %v1096_v57 = vmul.f32 %v4324_v19, %v1041_v40 }
 0x15a   : > { %v6890_v29 = vrot.slane %v4753_v61, 2  ;;  %v2205_v36 = vmul.f32 %v4382_v31, %v1040_v14  ;;  %v2381_v39 = vrot.slane %v2277_v11, 1  ;;  %v2382_v6 = vrot.slane %v2278_v54, 1 }
 0x15b   : > { %v2521_v18 = vmul.f32 %v4376_v26, %v1040_v14  ;;  %v2522_v3 = vmul.f32 %v4376_v26, %v1041_v40  ;;  %v2724_v50 = vadd.f32 %v2624_v10, %v2480_v30  ;;  %v2628_v45 = vrot.slane %v4895_v9, 2 }
 0x15c   : > { %v2073_v16 = vsel %vm1492_vm4, %v2070_v49, %v6890_v29  ;;  %v2237_v4 = vadd.f32 %v2205_v36, %v2169_v41  ;;  %v1278_v28 = vrot.slane %v1169_v27, 1  ;;  %v1279_v56 = vrot.slane %v1170_v38, 1 }
 0x15d   : > { %v2170_v47 = vadd.f32 %v2073_v16, %v1926_v2  ;;  %v1414_v60 = vmul.f32 %v4319_v17, %v1040_v14  ;;  %v1415_v61 = vmul.f32 %v4319_v17, %v1041_v40  ;;  %v6891_v49 = vrot.slane %v4775_v48, 2 }
 0x15e   : > { %v6892_v0 = vrot.slane %v4769_v63, 2  ;;  %v6893_v53 = vrot.slane %v4747_v52, 2  ;;  %v1724_v2 = vmul.f32 %v4343_v43, %v1040_v14  ;;  %v2206_v11 = vmul.f32 %v4382_v31, %v1041_v40 }
 0x15f   : > { %v6894_v10 = vmov %v6891_v49  ;;  %v1725_v54 = vmul.f32 %v4343_v43, %v1041_v40  ;;  %v2383_v30 = vsel %vm1247_vm3, %v2381_v39, %v2382_v6  ;;  %v2625_v9 = vrot.slane %v2521_v18, 2 }
 0x160   : > { %v1520_v23 = vsel %vm1492_vm4, %v6892_v0, %v6891_v49  ;;  %v1522_v62 = vsel %vm1492_vm4, %v6894_v10, %v6893_v53  ;;  %v2626_v41 = vrot.slane %v2522_v3, 2  ;;  %v2238_v38 = vadd.f32 %v2206_v11, %v2170_v47 }
 0x161   : > { %v1615_v63 = vadd.f32 %v1520_v23, %v4796_v37  ;;  %v1616_v27 = vadd.f32 %v1522_v62, %v4798_v24  ;;  %v2481_v52 = vadd.f32 %v2383_v30, %v2237_v4  ;;  %v2762_v48 = vmul.f32 %v4517_v59, %v2723_v34 }
 0x162   : > { %v2763_v29 = vmul.f32 %v4517_v59, %v2724_v50  ;;  %v1280_v16 = vsel %vm1247_vm3, %v1278_v28, %v1279_v56  ;;  %v1282_v36 = vsel %vm1247_vm3, %v1279_v56, %v1281_v1  ;;  %v1651_v49 = vmul.f32 %v4351_v51, %v1040_v14 }
 0x163   : > { %v1652_v39 = vmul.f32 %v4351_v51, %v1041_v40  ;;  %v1968_v18 = vmul.f32 %v4357_v55, %v1040_v14  ;;  %v1969_v37 = vmul.f32 %v4357_v55, %v1041_v40  ;;  %v1830_v3 = vrot.slane %v1724_v2, 1 }
 0x164   : > { %v1831_v24 = vrot.slane %v1725_v54, 1  ;;  %v2385_v47 = vsel %vm1247_vm3, %v2382_v6, %v2384_v7  ;;  %v2627_v34 = vsel %vm1492_vm4, %v2625_v9, %v2626_v41  ;;  %v1683_v4 = vadd.f32 %v1651_v49, %v1615_v63 }
 0x165   : > { %v1684_v50 = vadd.f32 %v1652_v39, %v1616_v27  ;;  %v2482_v0 = vadd.f32 %v2385_v47, %v2238_v38  ;;  %v2725_v28 = vadd.f32 %v2627_v34, %v2481_v52  ;;  %v4937_v1 = vadd.f32 %v4552_v8, %v2762_v48  ;;  %v4984_v39 = vld [vmem:[%s6775_s3] ss:$0 sm:$0xff] }
 0x166   : > { %v2077_v56 = vrot.slane %v4885_v15, 2  ;;  %v1523_v23 = vrot.slane %v1414_v60, 2  ;;  %v1524_v53 = vrot.slane %v1415_v61, 2  ;;  %v4941_v14 = vadd.f32 %v4552_v8, %v2763_v29  ;;  %v4947_v60 = vld [vmem:[#allocation2 + $0xa8] sm:$0xff]  ;;  %v4949_v61 = vld [vmem:[#allocation2 + $0xb0] sm:$0xff] }
 0x167   : > { %6895 = vst [vmem:[#allocation22_spill] sm:$0xff] %v4937_v1  ;;  %v1372_v40 = vadd.f32 %v1280_v16, %v1095_v46  ;;  %v1373_v10 = vadd.f32 %v1282_v36, %v1096_v57  ;;  %v2074_v62 = vrot.slane %v1968_v18, 2  ;;  %v1832_v7 = vsel %vm1247_vm3, %v1830_v3, %v1831_v24 }
 0x168   : > { %6896 = vst [vmem:[#allocation23_spill] sm:$0xff] %v4941_v14  ;;  %v1834_v6 = vsel %vm1247_vm3, %v1831_v24, %v1833_v33  ;;  %v2075_v2 = vrot.slane %v1969_v37, 2  ;;  %v2629_v11 = vsel %vm1492_vm4, %v2626_v41, %v2628_v45  ;;  %v1927_v54 = vadd.f32 %v1832_v7, %v1683_v4  ;;  %v4962_v45 = vld [vmem:[%s6774_s2] ss:$0 sm:$0xff] }
 0x169   : > { %v1928_v30 = vadd.f32 %v1834_v6, %v1684_v50  ;;  %v2726_v9 = vadd.f32 %v2629_v11, %v2482_v0  ;;  %v2764_v15 = vmul.f32 %v4517_v59, %v2725_v28  ;;  %v4953_v46 = vadd.f32 %v4815_v20, %v4709_v35  ;;  %v1045_v35 = vld [vmem:[#allocation2 + $0xb8] sm:$0x3] }
 0x16a   : > { %v1525_v57 = vsel %vm1492_vm4, %v1523_v23, %v1524_v53  ;;  %v1527_v33 = vsel %vm1492_vm4, %v1524_v53, %v1526_v12  ;;  %v848_v41 = vmul.f32 %v4962_v45, %v4367_v13  ;;  %v1172_v32 = vmul.f32 %v4303_v5, %v4947_v60 }
 0x16b   : > { %6897 = vst [vmem:[#allocation24_spill] sm:$0xff] %v4953_v46  ;;  %v1617_v20 = vadd.f32 %v1525_v57, %v1372_v40  ;;  %v1618_v38 = vadd.f32 %v1527_v33, %v1373_v10  ;;  %v1173_v12 = vmul.f32 %v4303_v5, %v4949_v61  ;;  %v2076_v52 = vsel %vm1492_vm4, %v2074_v62, %v2075_v2 }
 0x16c   : > { %v2078_v48 = vsel %vm1492_vm4, %v2075_v2, %v2077_v56  ;;  %v4975_v29 = vmul.f32 %v4517_v59, %v2726_v9  ;;  %v4978_v13 = vadd.f32 %v4552_v8, %v2764_v15  ;;  %v2171_v16 = vadd.f32 %v2076_v52, %v1927_v54 }
 0x16d   : > { %v2172_v36 = vadd.f32 %v2078_v48, %v1928_v30  ;;  %v1174_v49 = vmul.f32 %v4303_v5, %v1045_v35  ;;  %v4987_v18 = vadd.f32 %v4984_v39, %v848_v41  ;;  %v4991_v37 = vmul.f32 %v4962_v45, %v4455_v22 }
 0x16e   : > { %6898 = vst [vmem:[#allocation25_spill] sm:$0xff] %v4975_v29  ;;  %6899 = vst [vmem:[#allocation26_spill] sm:$0xff] %v4978_v13  ;;  %v4995_v8 = vmul.f32 %v4962_v45, %v4460_v44  ;;  %v4998_v3 = vmul.f32 %v4319_v17, %v1045_v35  ;;  %v1729_v24 = vmul.f32 %v4343_v43, %v1045_v35  ;;  %v1283_v4 = vrot.slane %v1172_v32, 1 }
 0x16f   : > { %v5002_v47 = vmul.f32 %v4357_v55, %v1045_v35  ;;  %v2282_v34 = vmul.f32 %v4371_v21, %v1045_v35  ;;  %v1284_v50 = vrot.slane %v1173_v12, 1  ;;  %v5007_v22 = vmul.f32 %v4962_v45, %v4507_v58 }
 0x170   : > { %v5011_v44 = vmul.f32 %v4962_v45, %v4512_v42  ;;  %v5014_v0 = vmul.f32 %v4376_v26, %v1045_v35  ;;  %v1097_v28 = vmul.f32 %v4324_v19, %v4947_v60  ;;  %v5020_v56 = vmul.f32 %v4319_v17, %v4947_v60 }
 0x171   : > { %v5024_v23 = vmul.f32 %v4319_v17, %v4949_v61  ;;  %v1286_v58 = vrot.slane %v1174_v49, 1  ;;  %v1098_v53 = vmul.f32 %v4324_v19, %v4949_v61  ;;  %v1727_v42 = vmul.f32 %v4343_v43, %v4947_v60 }
 0x172   : > { %v1728_v40 = vmul.f32 %v4343_v43, %v4949_v61  ;;  %v1838_v62 = vrot.slane %v1729_v24, 1  ;;  %v2389_v6 = vrot.slane %v2282_v34, 1  ;;  %v1285_v2 = vsel %vm1247_vm3, %v1283_v4, %v1284_v50  ;;  %v1048_v34 = vld [vmem:[#allocation2 + $0xd0] sm:$0x3] }
 0x173   : > { %v1653_v11 = vmul.f32 %v4351_v51, %v4947_v60  ;;  %v2280_v54 = vmul.f32 %v4371_v21, %v4947_v60  ;;  %v2281_v30 = vmul.f32 %v4371_v21, %v4949_v61  ;;  %v2633_v9 = vrot.slane %v5014_v0, 2 }
 0x174   : > { %v1528_v15 = vrot.slane %v5020_v56, 2  ;;  %v1529_v57 = vrot.slane %v5024_v23, 2  ;;  %v1654_v33 = vmul.f32 %v4351_v51, %v4949_v61  ;;  %v1287_v41 = vsel %vm1247_vm3, %v1284_v50, %v1286_v58  ;;  %v5057_v23 = vld [vmem:[#allocation2 + $0xc8] sm:$0xff] }
 0x175   : > { %v1685_v35 = vadd.f32 %v1653_v11, %v1617_v20  ;;  %v1835_v32 = vrot.slane %v1727_v42, 1  ;;  %v1836_v12 = vrot.slane %v1728_v40, 1  ;;  %v1374_v52 = vadd.f32 %v1285_v2, %v1097_v28  ;;  %v5055_v20 = vld [vmem:[#allocation2 + $0xc0] sm:$0xff] }
 0x176   : > { %v1686_v48 = vadd.f32 %v1654_v33, %v1618_v38  ;;  %v2207_v49 = vmul.f32 %v4382_v31, %v4947_v60  ;;  %v2208_v24 = vmul.f32 %v4382_v31, %v4949_v61  ;;  %v2386_v4 = vrot.slane %v2280_v54, 1 }
 0x177   : > { %v2387_v0 = vrot.slane %v2281_v30, 1  ;;  %v2524_v56 = vmul.f32 %v4376_v26, %v4947_v60  ;;  %v2525_v50 = vmul.f32 %v4376_v26, %v4949_v61  ;;  %v1375_v38 = vadd.f32 %v1287_v41, %v1098_v53 }
 0x178   : > { %v5061_v28 = vmul.f32 %v4357_v55, %v4947_v60  ;;  %v5065_v58 = vmul.f32 %v4357_v55, %v4949_v61  ;;  %v2239_v42 = vadd.f32 %v2207_v49, %v2171_v16  ;;  %v1837_v40 = vsel %vm1247_vm3, %v1835_v32, %v1836_v12 }
 0x179   : > { %v1839_v2 = vsel %vm1247_vm3, %v1836_v12, %v1838_v62  ;;  %v2240_v11 = vadd.f32 %v2208_v24, %v2172_v36  ;;  %v1177_v54 = vmul.f32 %v4303_v5, %v1048_v34  ;;  %v5071_v30 = vmul.f32 %v4319_v17, %v1048_v34 }
 0x17a   : > { %v5074_v53 = vmul.f32 %v4343_v43, %v1048_v34  ;;  %v1175_v60 = vmul.f32 %v4303_v5, %v5055_v20  ;;  %v1176_v61 = vmul.f32 %v4303_v5, %v5057_v23  ;;  %v2388_v16 = vsel %vm1247_vm3, %v2386_v4, %v2387_v0 }
 0x17b   : > { %v2630_v33 = vrot.slane %v2524_v56, 2  ;;  %v2631_v41 = vrot.slane %v2525_v50, 2  ;;  %v5082_v36 = vmul.f32 %v4357_v55, %v1048_v34  ;;  %v1929_v62 = vadd.f32 %v1837_v40, %v1685_v35 }
 0x17c   : > { %v1930_v32 = vadd.f32 %v1839_v2, %v1686_v48  ;;  %v2390_v12 = vsel %vm1247_vm3, %v2387_v0, %v2389_v6  ;;  %v2483_v49 = vadd.f32 %v2388_v16, %v2239_v42  ;;  %v2079_v24 = vrot.slane %v5061_v28, 2 }
 0x17d   : > { %v2080_v27 = vrot.slane %v5065_v58, 2  ;;  %v2484_v63 = vadd.f32 %v2390_v12, %v2240_v11  ;;  %v1291_v7 = vrot.slane %v1177_v54, 1  ;;  %v1536_v10 = vrot.slane %v5071_v30, 2 }
 0x17e   : > { %v1843_v4 = vrot.slane %v5074_v53, 1  ;;  %v1288_v56 = vrot.slane %v1175_v60, 1  ;;  %v1289_v50 = vrot.slane %v1176_v61, 1  ;;  %v2632_v14 = vsel %vm1492_vm4, %v2630_v33, %v2631_v41 }
 0x17f   : > { %v5092_v48 = vmul.f32 %v4371_v21, %v1048_v34  ;;  %v5095_v6 = vmul.f32 %v4376_v26, %v1048_v34  ;;  %v2634_v0 = vsel %vm1492_vm4, %v2631_v41, %v2633_v9  ;;  %v2727_v28 = vadd.f32 %v2632_v14, %v2483_v49 }
 0x180   : > { %v5100_v58 = vmul.f32 %v4319_v17, %v5055_v20  ;;  %v5104_v42 = vmul.f32 %v4319_v17, %v5057_v23  ;;  %v5106_v40 = vadd.f32 %v2634_v0, %v2484_v63  ;;  %v1099_v2 = vmul.f32 %v4324_v19, %v5055_v20 }
 0x181   : > { %v1100_v34 = vmul.f32 %v4324_v19, %v5057_v23  ;;  %v1530_v11 = vsel %vm1492_vm4, %v1528_v15, %v1529_v57  ;;  %v1290_v14 = vsel %vm1247_vm3, %v1288_v56, %v1289_v50  ;;  %v1292_v9 = vsel %vm1247_vm3, %v1289_v50, %v1291_v7 }
 0x182   : > { %6900 = vst [vmem:[#allocation27_spill] sm:$0xff] %v5106_v40  ;;  %v6901_v54 = vrot.slane %v4998_v3, 2  ;;  %v1619_v61 = vadd.f32 %v1530_v11, %v1374_v52  ;;  %v2394_v63 = vrot.slane %v5092_v48, 1  ;;  %v2638_v16 = vrot.slane %v5095_v6, 2 }
 0x183   : > { %v5122_v41 = vmul.f32 %v4343_v43, %v5055_v20  ;;  %v5125_v15 = vmul.f32 %v4517_v59, %v2727_v28  ;;  %v1533_v12 = vrot.slane %v5100_v58, 2  ;;  %v1534_v7 = vrot.slane %v5104_v42, 2 }
 0x184   : > { %v1532_v60 = vsel %vm1492_vm4, %v1529_v57, %v6901_v54  ;;  %v1655_v3 = vmul.f32 %v4351_v51, %v5055_v20  ;;  %v5131_v57 = vadd.f32 %v1290_v14, %v1099_v2  ;;  %v5133_v52 = vadd.f32 %v1292_v9, %v1100_v34 }
 0x185   : > { %v1620_v33 = vadd.f32 %v1532_v60, %v1375_v38  ;;  %6902 = vst [vmem:[#allocation28_spill] sm:$0xff] %v5125_v15  ;;  %v1656_v38 = vmul.f32 %v4351_v51, %v5057_v23  ;;  %v919_v49 = vmax.f32 %v4987_v18, 0.0  ;;  %v5142_v59 = vmul.f32 %v4343_v43, %v5057_v23 }
 0x186   : > { %v5138_v56 = vadd.f32 %v1655_v3, %v1619_v61  ;;  %v5146_v50 = vmul.f32 %v4357_v55, %v5055_v20  ;;  %v5150_v0 = vmul.f32 %v4357_v55, %v5057_v23  ;;  %v1840_v2 = vrot.slane %v5122_v41, 1 }
 0x187   : > { %v5152_v28 = vadd.f32 %v1656_v38, %v1620_v33  ;;  %v2081_v18 = vsel %vm1492_vm4, %v2079_v24, %v2080_v27  ;;  %v6903_v34 = vrot.slane %v5002_v47, 2  ;;  %1008 = vst.msk [vmem:[#allocation2 + $0xf1] sm:$0xff] %vm933_vm1, %v919_v49  ;;  %v890_v54 = vadd.f32 %v4984_v39, %v4991_v37  ;;  %v2930_v37 = vld [vmem:[%s6779_s7 + $0x8] sm:$0xff]  ;;  %v6904_v33 = vld [vmem:[#allocation8_spill] sm:$0xff] }
 0x188   : > { %v2173_v14 = vadd.f32 %v2081_v18, %v1929_v62  ;;  %v889_v60 = vadd.f32 %v4984_v39, %v4995_v8  ;;  %v2283_v61 = vmul.f32 %v4371_v21, %v5055_v20  ;;  %v892_v24 = vadd.f32 %v4984_v39, %v5007_v22  ;;  %v2929_v62 = vld [vmem:[%s6779_s7] sm:$0xff] }
 0x189   : > { %v2083_v11 = vsel %vm1492_vm4, %v2080_v27, %v6903_v34  ;;  %v891_v47 = vadd.f32 %v4984_v39, %v5011_v44  ;;  %v855_v27 = vmul.f32 %v4962_v45, %v4541_v25  ;;  %v922_v8 = vmax.f32 %v890_v54, 0.0  ;;  %v6905_v22 = vld [vmem:[#allocation9_spill] sm:$0xff] }
 0x18a   : > { %v2174_v9 = vadd.f32 %v2083_v11, %v1930_v32  ;;  %v921_v32 = vmax.f32 %v889_v60, 0.0  ;;  %v854_v41 = vmul.f32 %v4962_v45, %v6904_v33  ;;  %v857_v3 = vmul.f32 %v4962_v45, %v6905_v22 }
 0x18b   : > { %v2284_v44 = vmul.f32 %v4371_v21, %v5057_v23  ;;  %v924_v25 = vmax.f32 %v892_v24, 0.0  ;;  %v923_v38 = vmax.f32 %v891_v47, 0.0  ;;  %v894_v49 = vadd.f32 %v4984_v39, %v855_v27  ;;  %1011 = vst.msk [vmem:[#allocation2 + $0x111] sm:$0xff] %vm933_vm1, %v922_v8  ;;  %v5194_v47 = vld [vmem:[#allocation2 + $0xd8] sm:$0xff]  ;;  %v5196_v27 = vld [vmem:[#allocation2 + $0xe0] sm:$0xff] }
 0x18c   : > { %1010 = vst.msk [vmem:[#allocation2 + $0x109] sm:$0xff] %vm933_vm1, %v921_v32  ;;  %v893_v18 = vadd.f32 %v4984_v39, %v854_v41  ;;  %v896_v34 = vadd.f32 %v4984_v39, %v857_v3  ;;  %v3922_v11 = vpack.c.bf16 %v2930_v37, %v2929_v62  ;;  %v1841_v54 = vrot.slane %v5142_v59, 1  ;;  %v1051_v37 = vld [vmem:[#allocation2 + $0xe8] sm:$0x3] }
 0x18d   : > { %v2527_v60 = vmul.f32 %v4376_v26, %v5055_v20  ;;  %v2528_v24 = vmul.f32 %v4376_v26, %v5057_v23  ;;  %1013 = vst.msk [vmem:[#allocation2 + $0x129] sm:$0xff] %vm933_vm1, %v924_v25  ;;  %1012 = vst.msk [vmem:[#allocation2 + $0x121] sm:$0xff] %vm933_vm1, %v923_v38  ;;  %v926_v8 = vmax.f32 %v894_v49, 0.0  ;;  %v3988_v32 = vmov 0.0|0.0  }
 0x18e   : > { %3921 = vmatprep.subr.bf16.mxu0 %v3988_v32  ;;  %v2209_v59 = vmul.f32 %v4382_v31, %v5055_v20  ;;  %v2210_v62 = vmul.f32 %v4382_v31, %v5057_v23  ;;  %v925_v33 = vmax.f32 %v893_v18, 0.0  ;;  %v928_v41 = vmax.f32 %v896_v34, 0.0 }
 0x18f   : > { %3923 = vmatpush3.bf16.msra.mxu0 %v3922_v11  ;;  %v2084_v22 = vrot.slane %v5146_v50, 2  ;;  %v2085_v3 = vrot.slane %v5150_v0, 2  ;;  %v2391_v25 = vrot.slane %v2283_v61, 1  ;;  %v2392_v35 = vrot.slane %v2284_v44, 1  ;;  %1015 = vst.msk [vmem:[#allocation2 + $0x141] sm:$0xff] %vm933_vm1, %v926_v8 }
 0x190   : > { %v2241_v38 = vadd.f32 %v2209_v59, %v2173_v14  ;;  %v2242_v49 = vadd.f32 %v2210_v62, %v2174_v9  ;;  %v1178_v20 = vmul.f32 %v4303_v5, %v5194_v47  ;;  %v1179_v23 = vmul.f32 %v4303_v5, %v5196_v27  ;;  %1014 = vst.msk [vmem:[#allocation2 + $0x139] sm:$0xff] %vm933_vm1, %v925_v33 }
 0x191   : > { %1017 = vst.msk [vmem:[#allocation2 + $0x159] sm:$0xff] %vm933_vm1, %v928_v41  ;;  %v2635_v18 = vrot.slane %v2527_v60, 2  ;;  %v2636_v34 = vrot.slane %v2528_v24, 2  ;;  %v1180_v11 = vmul.f32 %v4303_v5, %v1051_v37  ;;  %v5215_v61 = vmul.f32 %v4319_v17, %v1051_v37 }
 0x192   : > { %v1842_v14 = vsel %vm1247_vm3, %v1840_v2, %v1841_v54  ;;  %v1844_v9 = vsel %vm1247_vm3, %v1841_v54, %v1843_v4  ;;  %v1735_v44 = vmul.f32 %v4343_v43, %v1051_v37  ;;  %v5223_v8 = vmul.f32 %v4357_v55, %v1051_v37 }
 0x193   : > { %v1931_v32 = vadd.f32 %v1842_v14, %v5138_v56  ;;  %v1932_v60 = vadd.f32 %v1844_v9, %v5152_v28  ;;  %v2393_v24 = vsel %vm1247_vm3, %v2391_v25, %v2392_v35  ;;  %v2395_v59 = vsel %vm1247_vm3, %v2392_v35, %v2394_v63 }
 0x194   : > { %6906 = vst [vmem:[#allocation8_spill] sm:$0xff] %v5223_v8  ;;  %v2485_v2 = vadd.f32 %v2393_v24, %v2241_v38  ;;  %v5232_v53 = vmul.f32 %v4371_v21, %v1051_v37  ;;  %v1293_v4 = vrot.slane %v1178_v20, 1  ;;  %v1294_v54 = vrot.slane %v1179_v23, 1  ;;  %v1060_v13 = vld [vmem:[#allocation2 + $0x130] sm:$0x3] }
 0x195   : > { %v5234_v62 = vadd.f32 %v2395_v59, %v2242_v49  ;;  %v2637_v33 = vsel %vm1492_vm4, %v2635_v18, %v2636_v34  ;;  %v1296_v41 = vrot.slane %v1180_v11, 1  ;;  %v1541_v56 = vrot.slane %v5215_v61, 2 }
 0x196   : > { %6907 = vst [vmem:[#allocation9_spill] sm:$0xff] %v5232_v53  ;;  %v5241_v28 = vsel %vm1492_vm4, %v2636_v34, %v2638_v16  ;;  %v1848_v48 = vrot.slane %v1735_v44, 1  ;;  %v5245_v63 = vmul.f32 %v4376_v26, %v1051_v37  ;;  %v5249_v25 = vmul.f32 %v4319_v17, %v5194_v47  ;;  %v1063_v40 = vld [vmem:[#allocation2 + $0x148] sm:$0x3] }
 0x197   : > { %6908 = vst [vmem:[#allocation29_spill] sm:$0xff] %v5234_v62  ;;  %6909 = vst [vmem:[#allocation30_spill] sm:$0xff] %v5241_v28  ;;  %v5253_v38 = vmul.f32 %v4319_v17, %v5196_v27  ;;  %v1535_v6 = vsel %vm1492_vm4, %v1533_v12, %v1534_v7  ;;  %v1537_v16 = vsel %vm1492_vm4, %v1534_v7, %v1536_v10 }
 0x198   : > { %6910 = vst [vmem:[#allocation31_spill] sm:$0xff] %v5245_v63  ;;  %v1295_v37 = vsel %vm1247_vm3, %v1293_v4, %v1294_v54  ;;  %v1621_v49 = vadd.f32 %v1535_v6, %v5131_v57  ;;  %v1733_v20 = vmul.f32 %v4343_v43, %v5194_v47  ;;  %v1734_v23 = vmul.f32 %v4343_v43, %v5196_v27 }
 0x199   : > { %v5271_v18 = vadd.f32 %v2637_v33, %v2485_v2  ;;  %v1101_v58 = vmul.f32 %v4324_v19, %v5194_v47  ;;  %v1297_v30 = vsel %vm1247_vm3, %v1294_v54, %v1296_v41  ;;  %v1622_v42 = vadd.f32 %v1537_v16, %v5133_v52  ;;  %v1054_v41 = vld [vmem:[#allocation2 + $0x100] sm:$0x3] }
 0x19a   : > { %v1102_v7 = vmul.f32 %v4324_v19, %v5196_v27  ;;  %v1657_v57 = vmul.f32 %v4351_v51, %v5194_v47  ;;  %v1538_v11 = vrot.slane %v5249_v25, 2  ;;  %v1539_v14 = vrot.slane %v5253_v38, 2 }
 0x19b   : > { %6911 = vst [vmem:[#allocation32_spill] sm:$0xff] %v5271_v18  ;;  %v1378_v34 = vadd.f32 %v1295_v37, %v1101_v58  ;;  %v1658_v9 = vmul.f32 %v4351_v51, %v5196_v27  ;;  %v1845_v24 = vrot.slane %v1733_v20, 1  ;;  %v1846_v59 = vrot.slane %v1734_v23, 1 }
 0x19c   : > { %v5287_v44 = vadd.f32 %v1297_v30, %v1102_v7  ;;  %v1689_v52 = vadd.f32 %v1657_v57, %v1621_v49  ;;  %v5291_v4 = vmul.f32 %v4357_v55, %v5194_v47  ;;  %v2286_v54 = vmul.f32 %v4371_v21, %v5194_v47  ;;  %v6917_v30 = vld [vmem:[#allocation11_spill] sm:$0xff] }
 0x19d   : > { %v1690_v2 = vadd.f32 %v1658_v9, %v1622_v42  ;;  %v5297_v33 = vmul.f32 %v4371_v21, %v5196_v27  ;;  %v5301_v25 = vmul.f32 %v4357_v55, %v5196_v27  ;;  %v2086_v38 = vsel %vm1492_vm4, %v2084_v22, %v2085_v3 }
 0x19e   : > { %v6914_v6 = vrot.slane %v5082_v36, 2  ;;  %v2211_v37 = vmul.f32 %v4382_v31, %v5194_v47  ;;  %v2175_v49 = vadd.f32 %v2086_v38, %v1931_v32  ;;  %v2212_v23 = vmul.f32 %v4382_v31, %v5196_v27 }
 0x19f   : > { %6912 = vst [vmem:[#allocation33_spill] sm:$0xff] %v5297_v33  ;;  %6913 = vst [vmem:[#allocation34_spill] sm:$0xff] %v5301_v25  ;;  %v5319_v58 = vmul.f32 %v4376_v26, %v5194_v47  ;;  %v1847_v50 = vsel %vm1247_vm3, %v1845_v24, %v1846_v59  ;;  %v1849_v36 = vsel %vm1247_vm3, %v1846_v59, %v1848_v48  ;;  %v6804_v32 = vrot.slane %v5297_v33, 1  ;;  %v6926_v24 = vld [vmem:[#allocation18_spill] sm:$0xff] }
 0x1a0   : > { %v2088_v16 = vsel %vm1492_vm4, %v2085_v3, %v6914_v6  ;;  %v5325_v0 = vmul.f32 %v4376_v26, %v5196_v27  ;;  %v5328_v22 = vmul.f32 %v4303_v5, %v1054_v41  ;;  %v2396_v3 = vrot.slane %v2286_v54, 1  ;;  %v5358_v6 = vld [vmem:[#allocation2 + $0xf8] sm:$0xff] }
 0x1a1   : > { %v2176_v20 = vadd.f32 %v2088_v16, %v1932_v60  ;;  %6915 = vst [vmem:[#allocation35_spill] sm:$0xff] %v5319_v58  ;;  %v5332_v60 = vmul.f32 %v4319_v17, %v1054_v41  ;;  %v856_v47 = vmul.f32 %v4962_v45, %v6917_v30  ;;  %v1933_v42 = vadd.f32 %v1847_v50, %v1689_v52  ;;  %v6925_v30 = vld [vmem:[#allocation17_spill] sm:$0xff] }
 0x1a2   : > { %6916 = vst [vmem:[#allocation36_spill] sm:$0xff] %v5325_v0  ;;  %v5336_v7 = vadd.f32 %v1849_v36, %v1690_v2  ;;  %v2089_v48 = vrot.slane %v5291_v4, 2  ;;  %v6805_v27 = vrot.slane %v5301_v25, 2  ;;  %v2243_v57 = vadd.f32 %v2211_v37, %v2175_v49  ;;  %v5356_v4 = vld [vmem:[#allocation2 + $0xf0] sm:$0xff] }
 0x1a3   : > { %v5340_v9 = vadd.f32 %v2212_v23, %v2176_v20  ;;  %v5344_v59 = vmul.f32 %v4343_v43, %v1054_v41  ;;  %v5348_v38 = vmul.f32 %v4357_v55, %v1054_v41  ;;  %v5351_v52 = vmul.f32 %v4371_v21, %v1054_v41  ;;  %v6923_v23 = vld [vmem:[#allocation14_spill] sm:$0xff]  ;;  %v6924_v36 = vld [vmem:[#allocation15_spill] sm:$0xff] }
 0x1a4   : > { %6918 = vst [vmem:[#allocation11_spill] sm:$0xff] %v5336_v7  ;;  %v5354_v2 = vmul.f32 %v4376_v26, %v1054_v41  ;;  %v2398_v16 = vsel %vm1247_vm3, %v2396_v3, %v6804_v32  ;;  %v1301_v37 = vrot.slane %v5328_v22, 1  ;;  %v895_v20 = vadd.f32 %v4984_v39, %v856_v47 }
 0x1a5   : > { %6919 = vst [vmem:[#allocation37_spill] sm:$0xff] %v5340_v9  ;;  %6920 = vst [vmem:[#allocation38_spill] sm:$0xff] %v5348_v38  ;;  %v859_v50 = vmul.f32 %v4962_v45, %v6923_v23  ;;  %v858_v41 = vmul.f32 %v4962_v45, %v6924_v36  ;;  %v861_v12 = vmul.f32 %v4962_v45, %v6925_v30  ;;  %v5597_v9 = vld [vmem:[#allocation2 + $0x140] sm:$0xff] }
 0x1a6   : > { %6921 = vst [vmem:[#allocation39_spill] sm:$0xff] %v5351_v52  ;;  %6922 = vst [vmem:[#allocation40_spill] sm:$0xff] %v5354_v2  ;;  %v860_v54 = vmul.f32 %v4962_v45, %v6926_v24  ;;  %v5374_v10 = vadd.f32 %v2398_v16, %v2243_v57  ;;  %v1181_v3 = vmul.f32 %v4303_v5, %v5356_v4  ;;  %v927_v16 = vmax.f32 %v895_v20, 0.0  ;;  %v5588_v52 = vld [vmem:[#allocation2 + $0x128] sm:$0xff] }
 0x1a7   : > { %v1182_v47 = vmul.f32 %v4303_v5, %v5358_v6  ;;  %v1540_v30 = vsel %vm1492_vm4, %v1538_v11, %v1539_v14  ;;  %v5387_v45 = vmul.f32 %v4319_v17, %v5356_v4  ;;  %v1542_v57 = vsel %vm1492_vm4, %v1539_v14, %v1541_v56 }
 0x1a8   : > { %6927 = vst [vmem:[#allocation14_spill] sm:$0xff] %v5374_v10  ;;  %v1623_v24 = vadd.f32 %v1540_v30, %v1378_v34  ;;  %v898_v35 = vadd.f32 %v4984_v39, %v859_v50  ;;  %v897_v23 = vadd.f32 %v4984_v39, %v858_v41  ;;  %v900_v36 = vadd.f32 %v4984_v39, %v861_v12 }
 0x1a9   : > { %v899_v32 = vadd.f32 %v4984_v39, %v860_v54  ;;  %v1298_v22 = vrot.slane %v1181_v3, 1  ;;  %v1299_v11 = vrot.slane %v1182_v47, 1  ;;  %v5398_v49 = vmul.f32 %v4319_v17, %v5358_v6  ;;  %1016 = vst.msk [vmem:[#allocation2 + $0x151] sm:$0xff] %vm933_vm1, %v927_v16 }
 0x1aa   : > { %v930_v61 = vmax.f32 %v898_v35, 0.0  ;;  %v929_v56 = vmax.f32 %v897_v23, 0.0  ;;  %v932_v34 = vmax.f32 %v900_v36, 0.0  ;;  %v6928_v20 = vmov 0.0  }
 0x1ab   : > { %v931_v14 = vmax.f32 %v899_v32, 0.0  ;;  %3861 = vmatprep.mubr.msk.f32.mxu0 %vm3989_vm5, %v6928_v20  ;;  %3866 = vmatprep.mubr.msk.f32.mxu1 %vm3989_vm5, %v6928_v20  ;;  %v1624_v12 = vadd.f32 %v1542_v57, %v5287_v44  ;;  %v5406_v39 = vmul.f32 %v4343_v43, %v5356_v4  ;;  %v5410_v54 = vmul.f32 %v4343_v43, %v5358_v6 }
 0x1ac   : > { %v2091_v35 = vsel %vm1492_vm4, %v2089_v48, %v6805_v27  ;;  %v1103_v32 = vmul.f32 %v4324_v19, %v5356_v4  ;;  %v1104_v50 = vmul.f32 %v4324_v19, %v5358_v6  ;;  %v1659_v44 = vmul.f32 %v4351_v51, %v5356_v4  ;;  %1019 = vst.msk [vmem:[#allocation2 + $0x171] sm:$0xff] %vm933_vm1, %v930_v61  ;;  %v5482_v27 = vld [vmem:[#allocation2 + $0x110] sm:$0xff] }
 0x1ad   : > { %v2177_v41 = vadd.f32 %v2091_v35, %v1933_v42  ;;  %1018 = vst.msk [vmem:[#allocation2 + $0x169] sm:$0xff] %vm933_vm1, %v929_v56  ;;  %1021 = vst.msk [vmem:[#allocation2 + $0x189] sm:$0xff] %vm933_vm1, %v932_v34  ;;  %v1300_v48 = vsel %vm1247_vm3, %v1298_v22, %v1299_v11  ;;  %v1660_v23 = vmul.f32 %v4351_v51, %v5358_v6  ;;  %v1057_v22 = vld [vmem:[#allocation2 + $0x118] sm:$0x3] }
 0x1ae   : > { %1020 = vst.msk [vmem:[#allocation2 + $0x181] sm:$0xff] %vm933_vm1, %v931_v14  ;;  %v1302_v36 = vsel %vm1247_vm3, %v1299_v11, %v1301_v37  ;;  %v5431_v42 = vadd.f32 %v1659_v44, %v1623_v24  ;;  %v5435_v30 = vmul.f32 %v4357_v55, %v5356_v4  ;;  %v5439_v57 = vmul.f32 %v4357_v55, %v5358_v6 }
 0x1af   : > { %v5441_v16 = vadd.f32 %v1660_v23, %v1624_v12  ;;  %v5447_v37 = vmul.f32 %v4371_v21, %v5356_v4  ;;  %v5449_v24 = vadd.f32 %v1300_v48, %v1103_v32  ;;  %v5453_v11 = vmul.f32 %v4371_v21, %v5358_v6  ;;  %6939 = vst [vmem:[#allocation48_spill] sm:$0xff] %v5482_v27 }
 0x1b0   : > { %6929 = vst [vmem:[#allocation15_spill] sm:$0xff] %v5431_v42  ;;  %6930 = vst [vmem:[#allocation17_spill] sm:$0xff] %v5435_v30  ;;  %v5457_v34 = vmul.f32 %v4376_v26, %v5356_v4  ;;  %v5461_v14 = vmul.f32 %v4376_v26, %v5358_v6  ;;  %v5463_v20 = vadd.f32 %v1302_v36, %v1104_v50  ;;  %v1055_v36 = vld [vmem:[#allocation2 + $0x108] sm:$0xff]  ;;  %v5652_v38 = vld [vmem:[#allocation2 + $0x158] sm:$0xff] }
 0x1b1   : > { %6931 = vst [vmem:[#allocation18_spill] sm:$0xff] %v5439_v57  ;;  %6932 = vst [vmem:[#allocation41_spill] sm:$0xff] %v5441_v16  ;;  %v2213_v12 = vmul.f32 %v4382_v31, %v5356_v4  ;;  %v5468_v35 = vmul.f32 %v4303_v5, %v1057_v22  ;;  %v5471_v32 = vmul.f32 %v4319_v17, %v1057_v22 }
 0x1b2   : > { %6933 = vst [vmem:[#allocation42_spill] sm:$0xff] %v5447_v37  ;;  %6934 = vst [vmem:[#allocation43_spill] sm:$0xff] %v5453_v11  ;;  %v5477_v23 = vmul.f32 %v4382_v31, %v5358_v6  ;;  %v5480_v50 = vmul.f32 %v4343_v43, %v1057_v22  ;;  %v5488_v56 = vmul.f32 %v4357_v55, %v1057_v22  ;;  %v5590_v37 = vld [vmem:[#allocation2 + $0x138] sm:$0xff] }
 0x1b3   : > { %6935 = vst [vmem:[#allocation44_spill] sm:$0xff] %v5457_v34  ;;  %6936 = vst [vmem:[#allocation45_spill] sm:$0xff] %v5461_v14  ;;  %v5484_v4 = vadd.f32 %v2213_v12, %v2177_v41  ;;  %v5491_v44 = vmul.f32 %v4371_v21, %v1057_v22  ;;  %v5497_v47 = vmul.f32 %v4376_v26, %v1057_v22 }
 0x1b4   : > { %6937 = vst [vmem:[#allocation46_spill] sm:$0xff] %v5477_v23  ;;  %6938 = vst [vmem:[#allocation47_spill] sm:$0xff] %v5480_v50  ;;  %v5502_v61 = vmul.f32 %v4303_v5, %v1055_v36  ;;  %v5506_v1 = vmul.f32 %v4303_v5, %v5482_v27  ;;  %v5510_v6 = vmul.f32 %v4324_v19, %v1055_v36 }
 0x1b5   : > { %6940 = vst [vmem:[#allocation49_spill] sm:$0xff] %v5484_v4  ;;  %6941 = vst [vmem:[#allocation50_spill] sm:$0xff] %v5488_v56  ;;  %v5514_v22 = vmul.f32 %v4324_v19, %v5482_v27  ;;  %v5517_v3 = vmul.f32 %v4319_v17, %v1055_v36  ;;  %v5523_v46 = vmul.f32 %v4319_v17, %v5482_v27 }
 0x1b6   : > { %6942 = vst [vmem:[#allocation51_spill] sm:$0xff] %v5491_v44  ;;  %6943 = vst [vmem:[#allocation52_spill] sm:$0xff] %v5497_v47  ;;  %v5526_v48 = vmul.f32 %v4343_v43, %v1055_v36  ;;  %v5530_v29 = vmul.f32 %v4351_v51, %v1055_v36  ;;  %v5534_v18 = vmul.f32 %v4343_v43, %v5482_v27  ;;  %v5566_v47 = vld [vmem:[#allocation2 + $0x120] sm:$0xff]  ;;  %v6962_v57 = vrot.slane %v5502_v61, 1 }
 0x1b7   : > { %v5537_v12 = vmul.f32 %v4357_v55, %v1055_v36  ;;  %v5543_v10 = vmul.f32 %v4351_v51, %v5482_v27  ;;  %v5546_v15 = vmul.f32 %v4371_v21, %v1055_v36  ;;  %v5550_v28 = vmul.f32 %v4303_v5, %v1060_v13 }
 0x1b8   : > { %6944 = vst [vmem:[#allocation53_spill] sm:$0xff] %v5526_v48  ;;  %v5553_v62 = vmul.f32 %v4319_v17, %v1060_v13  ;;  %v5556_v2 = vmul.f32 %v4343_v43, %v1060_v13  ;;  %v5561_v34 = vmul.f32 %v4357_v55, %v1060_v13  ;;  %v5564_v14 = vmul.f32 %v4371_v21, %v1060_v13 }
 0x1b9   : > { %6945 = vst [vmem:[#allocation54_spill] sm:$0xff] %v5537_v12  ;;  %6946 = vst [vmem:[#allocation55_spill] sm:$0xff] %v5546_v15  ;;  %v5571_v58 = vmul.f32 %v4357_v55, %v5482_v27  ;;  %v5575_v41 = vmul.f32 %v4382_v31, %v1055_v36  ;;  %v5579_v4 = vmul.f32 %v4371_v21, %v5482_v27  ;;  %v1311_v0 = vrot.slane %v5550_v28, 1  ;;  %v5650_v12 = vld [vmem:[#allocation2 + $0x150] sm:$0xff] }
 0x1ba   : > { %6947 = vst [vmem:[#allocation56_spill] sm:$0xff] %v5556_v2  ;;  %6948 = vst [vmem:[#allocation57_spill] sm:$0xff] %v5561_v34  ;;  %v5583_v44 = vmul.f32 %v4376_v26, %v1055_v36  ;;  %v5586_v63 = vmul.f32 %v4376_v26, %v1060_v13  ;;  %v5599_v36 = vld [vmem:[#allocation2 + $0x160] sm:$0x3]  ;;  %v1192_v15 = vmul.f32 %v4303_v5, %v1063_v40 }
 0x1bb   : > { %6949 = vst [vmem:[#allocation58_spill] sm:$0xff] %v5564_v14  ;;  %6950 = vst [vmem:[#allocation59_spill] sm:$0xff] %v5571_v58  ;;  %v5605_v53 = vmul.f32 %v4319_v17, %v1063_v40  ;;  %v1188_v28 = vmul.f32 %v4303_v5, %v5588_v52  ;;  %v5610_v33 = vmul.f32 %v4343_v43, %v1063_v40 }
 0x1bc   : > { %6951 = vst [vmem:[#allocation60_spill] sm:$0xff] %v5575_v41  ;;  %6952 = vst [vmem:[#allocation61_spill] sm:$0xff] %v5579_v4  ;;  %v1187_v4 = vmul.f32 %v4303_v5, %v5566_v47  ;;  %v5613_v11 = vmul.f32 %v4357_v55, %v1063_v40  ;;  %v5616_v41 = vmul.f32 %v4371_v21, %v1063_v40  ;;  %v1316_v34 = vrot.slane %v1192_v15, 1 }
 0x1bd   : > { %6953 = vst [vmem:[#allocation62_spill] sm:$0xff] %v5583_v44  ;;  %6954 = vst [vmem:[#allocation63_spill] sm:$0xff] %v5586_v63  ;;  %v5619_v13 = vmul.f32 %v4376_v26, %v1063_v40  ;;  %v5623_v44 = vmul.f32 %v4303_v5, %v5599_v36  ;;  %v1190_v14 = vmul.f32 %v4303_v5, %v5590_v37  ;;  %v1309_v30 = vrot.slane %v1188_v28, 1  ;;  %v5660_v63 = vld [vmem:[#allocation2 + $0x170] sm:$0xff] }
 0x1be   : > { %6955 = vst [vmem:[#allocation64_spill] sm:$0xff] %v5599_v36  ;;  %6956 = vst [vmem:[#allocation65_spill] sm:$0xff] %v5610_v33  ;;  %v1191_v23 = vmul.f32 %v4303_v5, %v5597_v9  ;;  %v1308_v27 = vrot.slane %v1187_v4, 1  ;;  %v5632_v21 = vmul.f32 %v4319_v17, %v5599_v36  ;;  %v5636_v40 = vmul.f32 %v4343_v43, %v5599_v36  ;;  %v5658_v4 = vld [vmem:[#allocation2 + $0x168] sm:$0xff] }
 0x1bf   : > { %6957 = vst [vmem:[#allocation66_spill] sm:$0xff] %v5613_v11  ;;  %6958 = vst [vmem:[#allocation67_spill] sm:$0xff] %v5616_v41  ;;  %v5640_v26 = vmul.f32 %v4319_v17, %v5566_v47  ;;  %v5644_v7 = vmul.f32 %v4343_v43, %v5566_v47  ;;  %v1321_v58 = vrot.slane %v5623_v44, 1  ;;  %v1313_v25 = vrot.slane %v1190_v14, 1  ;;  %v5666_v41 = vld [vmem:[#allocation2 + $0x178] sm:$0x3] }
 0x1c0   : > { %6959 = vst [vmem:[#allocation68_spill] sm:$0xff] %v5619_v13  ;;  %6960 = vst [vmem:[#allocation69_spill] sm:$0xff] %v5636_v40  ;;  %v1314_v8 = vrot.slane %v1191_v23, 1  ;;  %v1107_v56 = vmul.f32 %v4324_v19, %v5566_v47  ;;  %v1108_v28 = vmul.f32 %v4324_v19, %v5588_v52  ;;  %v1193_v14 = vmul.f32 %v4303_v5, %v5650_v12 }
 0x1c1   : > { %v1194_v44 = vmul.f32 %v4303_v5, %v5652_v38  ;;  %v6961_v23 = vrot.slane %v5506_v1, 1  ;;  %v6963_v15 = vrot.slane %v5468_v35, 1  ;;  %v1109_v36 = vmul.f32 %v4324_v19, %v5590_v37 }
 0x1c2   : > { %v1110_v55 = vmul.f32 %v4324_v19, %v5597_v9  ;;  %v1310_v16 = vsel %vm1247_vm3, %v1308_v27, %v1309_v30  ;;  %v1312_v42 = vsel %vm1247_vm3, %v1309_v30, %v1311_v0  ;;  %v1196_v61 = vmul.f32 %v4303_v5, %v5658_v4 }
 0x1c3   : > { %v1305_v31 = vsel %vm1247_vm3, %v6962_v57, %v6961_v23  ;;  %v6964_v13 = vmov %v6961_v23  ;;  %v1197_v57 = vmul.f32 %v4303_v5, %v5660_v63  ;;  %v1315_v1 = vsel %vm1247_vm3, %v1313_v25, %v1314_v8 }
 0x1c4   : > { %v1307_v11 = vsel %vm1247_vm3, %v6964_v13, %v6963_v15  ;;  %v1317_v35 = vsel %vm1247_vm3, %v1314_v8, %v1316_v34  ;;  %v1198_v13 = vmul.f32 %v4303_v5, %v5666_v41  ;;  %v1382_v15 = vadd.f32 %v1305_v31, %v5510_v6 }
 0x1c5   : > { %v1383_v23 = vadd.f32 %v1307_v11, %v5514_v22  ;;  %v1433_v0 = vmul.f32 %v4319_v17, %v5588_v52  ;;  %v1318_v27 = vrot.slane %v1193_v14, 1  ;;  %v1319_v30 = vrot.slane %v1194_v44, 1 }
 0x1c6   : > { %v1435_v40 = vmul.f32 %v4319_v17, %v5590_v37  ;;  %v1436_v25 = vmul.f32 %v4319_v17, %v5597_v9  ;;  %v1384_v33 = vadd.f32 %v1310_v16, %v1107_v56  ;;  %v1385_v8 = vadd.f32 %v1312_v42, %v1108_v28 }
 0x1c7   : > { %v1386_v34 = vadd.f32 %v1315_v1, %v1109_v36  ;;  %v1387_v2 = vadd.f32 %v1317_v35, %v1110_v55  ;;  %v1323_v5 = vrot.slane %v1196_v61, 1  ;;  %v1324_v50 = vrot.slane %v1197_v57, 1 }
 0x1c8   : > { %v6965_v31 = vrot.slane %v5398_v49, 2  ;;  %v6966_v11 = vrot.slane %v5387_v45, 2  ;;  %v6967_v22 = vrot.slane %v5332_v60, 2  ;;  %v1111_v16 = vmul.f32 %v4324_v19, %v5650_v12 }
 0x1c9   : > { %v1326_v42 = vrot.slane %v1198_v13, 1  ;;  %v1438_v55 = vmul.f32 %v4319_v17, %v5650_v12  ;;  %v1439_v56 = vmul.f32 %v4319_v17, %v5652_v38  ;;  %v1112_v45 = vmul.f32 %v4324_v19, %v5652_v38 }
 0x1ca   : > { %v1545_v6 = vsel %vm1492_vm4, %v6966_v11, %v6965_v31  ;;  %v6968_v14 = vmov %v6965_v31  ;;  %v1320_v36 = vsel %vm1247_vm3, %v1318_v27, %v1319_v30  ;;  %v6969_v60 = vrot.slane %v5523_v46, 2 }
 0x1cb   : > { %v1547_v44 = vsel %vm1492_vm4, %v6968_v14, %v6967_v22  ;;  %v6970_v49 = vrot.slane %v5517_v3, 2  ;;  %v6971_v61 = vrot.slane %v5471_v32, 2  ;;  %v1322_v35 = vsel %vm1247_vm3, %v1319_v30, %v1321_v58 }
 0x1cc   : > { %v6972_v57 = vmov %v6969_v60  ;;  %v1441_v13 = vmul.f32 %v4319_v17, %v5658_v4  ;;  %v1442_v27 = vmul.f32 %v4319_v17, %v5660_v63  ;;  %v1443_v31 = vmul.f32 %v4319_v17, %v5666_v41 }
 0x1cd   : > { %v1550_v28 = vsel %vm1492_vm4, %v6970_v49, %v6969_v60  ;;  %v1552_v1 = vsel %vm1492_vm4, %v6972_v57, %v6971_v61  ;;  %v1325_v3 = vsel %vm1247_vm3, %v1323_v5, %v1324_v50  ;;  %v1553_v11 = vrot.slane %v5640_v26, 2 }
 0x1ce   : > { %v1554_v32 = vrot.slane %v1433_v0, 2  ;;  %v1558_v22 = vrot.slane %v1435_v40, 2  ;;  %v1327_v46 = vsel %vm1247_vm3, %v1324_v50, %v1326_v42  ;;  %v1559_v14 = vrot.slane %v1436_v25, 2 }
 0x1cf   : > { %v1563_v60 = vrot.slane %v1438_v55, 2  ;;  %v1564_v58 = vrot.slane %v1439_v56, 2  ;;  %v1113_v30 = vmul.f32 %v4324_v19, %v5658_v4  ;;  %v1114_v49 = vmul.f32 %v4324_v19, %v5660_v63 }
 0x1d0   : > { %v1625_v61 = vadd.f32 %v1545_v6, %v5449_v24  ;;  %v1626_v17 = vadd.f32 %v1547_v44, %v5463_v20  ;;  %v1388_v5 = vadd.f32 %v1320_v36, %v1111_v16  ;;  %v1389_v57 = vadd.f32 %v1322_v35, %v1112_v45 }
 0x1d1   : > { %v1568_v26 = vrot.slane %v1441_v13, 2  ;;  %v1569_v0 = vrot.slane %v1442_v27, 2  ;;  %v1390_v40 = vadd.f32 %v1325_v3, %v1113_v30  ;;  %v1391_v48 = vadd.f32 %v1327_v46, %v1114_v49  ;;  %v5764_v3 = vld [vmem:[#allocation2 + $0x188] sm:$0xff] }
 0x1d2   : > { %v1555_v50 = vsel %vm1492_vm4, %v1553_v11, %v1554_v32  ;;  %v1571_v25 = vrot.slane %v1443_v31, 2  ;;  %v6973_v42 = vrot.slane %v5553_v62, 2  ;;  %v1560_v56 = vsel %vm1492_vm4, %v1558_v22, %v1559_v14  ;;  %v5762_v31 = vld [vmem:[#allocation2 + $0x180] sm:$0xff]  ;;  %6976 = vst [vmem:[#allocation70_spill] sm:$0xff] %v5764_v3 }
 0x1d3   : > { %v6974_v19 = vrot.slane %v5605_v53, 2  ;;  %v1565_v20 = vsel %vm1492_vm4, %v1563_v60, %v1564_v58  ;;  %v6975_v6 = vrot.slane %v5632_v21, 2  ;;  %v1627_v16 = vadd.f32 %v1550_v28, %v1382_v15 }
 0x1d4   : > { %v1557_v55 = vsel %vm1492_vm4, %v1554_v32, %v6973_v42  ;;  %v1628_v45 = vadd.f32 %v1552_v1, %v1383_v23  ;;  %v1629_v36 = vadd.f32 %v1555_v50, %v1384_v33  ;;  %v1570_v35 = vsel %vm1492_vm4, %v1568_v26, %v1569_v0 }
 0x1d5   : > { %v1562_v24 = vsel %vm1492_vm4, %v1559_v14, %v6974_v19  ;;  %v1567_v44 = vsel %vm1492_vm4, %v1564_v58, %v6975_v6  ;;  %v1630_v62 = vadd.f32 %v1557_v55, %v1385_v8  ;;  %v1631_v13 = vadd.f32 %v1560_v56, %v1386_v34 }
 0x1d6   : > { %v1632_v27 = vadd.f32 %v1562_v24, %v1387_v2  ;;  %v1572_v53 = vsel %vm1492_vm4, %v1569_v0, %v1571_v25  ;;  %v1633_v11 = vadd.f32 %v1565_v20, %v1388_v5  ;;  %v1634_v32 = vadd.f32 %v1567_v44, %v1389_v57 }
 0x1d7   : > { %v1635_v22 = vadd.f32 %v1570_v35, %v1390_v40  ;;  %v1636_v21 = vadd.f32 %v1572_v53, %v1391_v48  ;;  %v1663_v15 = vmul.f32 %v4351_v51, %v5566_v47  ;;  %v1664_v33 = vmul.f32 %v4351_v51, %v5588_v52  ;;  %v5791_v40 = vld [vmem:[#allocation2 + $0x190] sm:$0x3] }
 0x1d8   : > { %v1665_v23 = vmul.f32 %v4351_v51, %v5590_v37  ;;  %v1666_v2 = vmul.f32 %v4351_v51, %v5597_v9  ;;  %v1667_v8 = vmul.f32 %v4351_v51, %v5650_v12  ;;  %v1668_v34 = vmul.f32 %v4351_v51, %v5652_v38  ;;  %6977 = vst [vmem:[#allocation71_spill] sm:$0xff] %v5791_v40 }
 0x1d9   : > { %v1669_v48 = vmul.f32 %v4351_v51, %v5658_v4  ;;  %v1670_v28 = vmul.f32 %v4351_v51, %v5660_v63  ;;  %v1671_v1 = vmul.f32 %v4351_v51, %v5762_v31  ;;  %v1672_v46 = vmul.f32 %v4351_v51, %v5764_v3 }
 0x1da   : > { %v1693_v14 = vadd.f32 %v5530_v29, %v1625_v61  ;;  %v1694_v60 = vadd.f32 %v5543_v10, %v1626_v17  ;;  %v1695_v58 = vadd.f32 %v1663_v15, %v1627_v16  ;;  %v1696_v30 = vadd.f32 %v1664_v33, %v1628_v45  ;;  %v6983_v33 = vld [vmem:[#allocation53_spill] sm:$0xff] }
 0x1db   : > { %v1697_v49 = vadd.f32 %v1665_v23, %v1629_v36  ;;  %v1698_v5 = vadd.f32 %v1666_v2, %v1630_v62  ;;  %v1699_v57 = vadd.f32 %v1667_v8, %v1631_v13  ;;  %v1700_v26 = vadd.f32 %v1668_v34, %v1632_v27 }
 0x1dc   : > { %v1743_v0 = vmul.f32 %v4343_v43, %v5588_v52  ;;  %v1745_v50 = vmul.f32 %v4343_v43, %v5590_v37  ;;  %v1746_v51 = vmul.f32 %v4343_v43, %v5597_v9  ;;  %v1748_v29 = vmul.f32 %v4343_v43, %v5650_v12 }
 0x1dd   : > { %v1749_v10 = vmul.f32 %v4343_v43, %v5652_v38  ;;  %v1701_v61 = vadd.f32 %v1669_v48, %v1633_v11  ;;  %v1751_v17 = vmul.f32 %v4343_v43, %v5658_v4  ;;  %v1752_v25 = vmul.f32 %v4343_v43, %v5660_v63 }
 0x1de   : > { %v1753_v42 = vmul.f32 %v4343_v43, %v5666_v41  ;;  %v1702_v55 = vadd.f32 %v1670_v28, %v1634_v32  ;;  %v1703_v56 = vadd.f32 %v1671_v1, %v1635_v22  ;;  %v1754_v19 = vmul.f32 %v4343_v43, %v5762_v31 }
 0x1df   : > { %v1755_v24 = vmul.f32 %v4343_v43, %v5764_v3  ;;  %v1704_v20 = vadd.f32 %v1672_v46, %v1636_v21  ;;  %v1756_v6 = vmul.f32 %v4343_v43, %v5791_v40  ;;  %v1860_v44 = vrot.slane %v5644_v7, 1  ;;  %v6988_v46 = vld [vmem:[#allocation56_spill] sm:$0xff] }
 0x1e0   : > { %v1861_v16 = vrot.slane %v1743_v0, 1  ;;  %v1865_v45 = vrot.slane %v1745_v50, 1  ;;  %v1866_v36 = vrot.slane %v1746_v51, 1  ;;  %v1870_v35 = vrot.slane %v1748_v29, 1  ;;  %v6990_v29 = vld [vmem:[#allocation65_spill] sm:$0xff] }
 0x1e1   : > { %v1871_v62 = vrot.slane %v1749_v10, 1  ;;  %v6978_v13 = vrot.slane %v5410_v54, 1  ;;  %v6979_v27 = vrot.slane %v5406_v39, 1  ;;  %v1875_v11 = vrot.slane %v1751_v17, 1  ;;  %v6985_v39 = vld [vmem:[#allocation47_spill] sm:$0xff] }
 0x1e2   : > { %v1876_v32 = vrot.slane %v1752_v25, 1  ;;  %v1878_v22 = vrot.slane %v1753_v42, 1  ;;  %v6980_v21 = vrot.slane %v5344_v59, 1  ;;  %v6982_v15 = vrot.slane %v5534_v18, 1  ;;  %v6992_v42 = vld [vmem:[#allocation69_spill] sm:$0xff] }
 0x1e3   : > { %v1852_v53 = vsel %vm1247_vm3, %v6979_v27, %v6978_v13  ;;  %v6981_v43 = vmov %v6978_v13  ;;  %v6984_v23 = vrot.slane %v6983_v33, 1  ;;  %v1880_v8 = vrot.slane %v1754_v19, 1  ;;  %v6994_v13 = vld [vmem:[#allocation15_spill] sm:$0xff] }
 0x1e4   : > { %v1854_v7 = vsel %vm1247_vm3, %v6981_v43, %v6980_v21  ;;  %v1881_v34 = vrot.slane %v1755_v24, 1  ;;  %v6986_v48 = vrot.slane %v6985_v39, 1  ;;  %v6987_v28 = vmov %v6982_v15 }
 0x1e5   : > { %v1857_v2 = vsel %vm1247_vm3, %v6984_v23, %v6982_v15  ;;  %v1862_v59 = vsel %vm1247_vm3, %v1860_v44, %v1861_v16  ;;  %v6989_v54 = vrot.slane %v6988_v46, 1  ;;  %v1883_v50 = vrot.slane %v1756_v6, 1  ;;  %v7002_v46 = vld [vmem:[#allocation59_spill] sm:$0xff] }
 0x1e6   : > { %v1859_v1 = vsel %vm1247_vm3, %v6987_v28, %v6986_v48  ;;  %v1867_v51 = vsel %vm1247_vm3, %v1865_v45, %v1866_v36  ;;  %v6991_v10 = vrot.slane %v6990_v29, 1  ;;  %v1872_v25 = vsel %vm1247_vm3, %v1870_v35, %v1871_v62 }
 0x1e7   : > { %v1864_v0 = vsel %vm1247_vm3, %v1861_v16, %v6989_v54  ;;  %v6993_v19 = vrot.slane %v6992_v42, 1  ;;  %v1877_v24 = vsel %vm1247_vm3, %v1875_v11, %v1876_v32  ;;  %v1879_v44 = vsel %vm1247_vm3, %v1876_v32, %v1878_v22  ;;  %v6995_v16 = vld [vmem:[#allocation41_spill] sm:$0xff]  ;;  %v6996_v32 = vld [vmem:[#allocation4_spill] sm:$0xff]  ;;  %v7003_v42 = vld [vmem:[#allocation18_spill] sm:$0xff] }
 0x1e8   : > { %v1869_v17 = vsel %vm1247_vm3, %v1866_v36, %v6991_v10  ;;  %v1935_v27 = vadd.f32 %v1852_v53, %v6994_v13  ;;  %v1936_v6 = vadd.f32 %v1854_v7, %v6995_v16  ;;  %v1882_v45 = vsel %vm1247_vm3, %v1880_v8, %v1881_v34  ;;  %v6998_v8 = vld [vmem:[#allocation8_spill] sm:$0xff] }
 0x1e9   : > { %v1874_v18 = vsel %vm1247_vm3, %v1871_v62, %v6993_v19  ;;  %v1937_v21 = vadd.f32 %v1857_v2, %v1693_v14  ;;  %v1938_v43 = vadd.f32 %v1859_v1, %v1694_v60  ;;  %v1939_v15 = vadd.f32 %v1862_v59, %v1695_v58 }
 0x1ea   : > { %v1884_v36 = vsel %vm1247_vm3, %v1881_v34, %v1883_v50  ;;  %v1940_v35 = vadd.f32 %v1864_v0, %v1696_v30  ;;  %v1941_v33 = vadd.f32 %v1867_v51, %v1697_v49  ;;  %v1942_v23 = vadd.f32 %v1869_v17, %v1698_v5  ;;  %v6997_v49 = vld [vmem:[#allocation64_spill] sm:$0xff]  ;;  %v7000_v34 = vld [vmem:[#allocation34_spill] sm:$0xff] }
 0x1eb   : > { %v1943_v39 = vadd.f32 %v1872_v25, %v1699_v57  ;;  %v1944_v62 = vadd.f32 %v1874_v18, %v1700_v26  ;;  %v1945_v48 = vadd.f32 %v1877_v24, %v1701_v61  ;;  %v1946_v11 = vadd.f32 %v1879_v44, %v1702_v55  ;;  %v7005_v18 = vld [vmem:[#allocation17_spill] sm:$0xff] }
 0x1ec   : > { %v1947_v28 = vadd.f32 %v1882_v45, %v1703_v56  ;;  %v1986_v53 = vmul.f32 %v6996_v32, %v5566_v47  ;;  %v1987_v22 = vmul.f32 %v6996_v32, %v5588_v52  ;;  %v1989_v14 = vmul.f32 %v6996_v32, %v5590_v37 }
 0x1ed   : > { %v1990_v60 = vmul.f32 %v6996_v32, %v5597_v9  ;;  %v1992_v58 = vmul.f32 %v6996_v32, %v5650_v12  ;;  %v1993_v30 = vmul.f32 %v6996_v32, %v5652_v38  ;;  %v1994_v5 = vmul.f32 %v6996_v32, %v6997_v49 }
 0x1ee   : > { %v1948_v57 = vadd.f32 %v1884_v36, %v1704_v20  ;;  %v1995_v26 = vmul.f32 %v6996_v32, %v5658_v4  ;;  %v1996_v61 = vmul.f32 %v6996_v32, %v5660_v63  ;;  %v1997_v55 = vmul.f32 %v6996_v32, %v5666_v41  ;;  %v7007_v36 = vld [vmem:[#allocation38_spill] sm:$0xff] }
 0x1ef   : > { %v1998_v56 = vmul.f32 %v6996_v32, %v5762_v31  ;;  %v1999_v7 = vmul.f32 %v6996_v32, %v5764_v3  ;;  %v2000_v2 = vmul.f32 %v6996_v32, %v5791_v40  ;;  %v6999_v20 = vrot.slane %v6998_v8, 2 }
 0x1f0   : > { %v7001_v1 = vrot.slane %v7000_v34, 2  ;;  %v2100_v54 = vrot.slane %v7002_v46, 2  ;;  %v2104_v0 = vrot.slane %v1986_v53, 2  ;;  %v2105_v50 = vrot.slane %v1987_v22, 2 }
 0x1f1   : > { %v2109_v51 = vrot.slane %v1989_v14, 2  ;;  %v2110_v29 = vrot.slane %v1990_v60, 2  ;;  %v2114_v10 = vrot.slane %v1992_v58, 2  ;;  %v2115_v17 = vrot.slane %v1993_v30, 2  ;;  %v7010_v58 = vld [vmem:[#allocation54_spill] sm:$0xff] }
 0x1f2   : > { %v2093_v59 = vsel %vm1492_vm4, %v7001_v1, %v6999_v20  ;;  %v2117_v25 = vrot.slane %v1994_v5, 2  ;;  %v7004_v19 = vrot.slane %v7003_v42, 2  ;;  %v7006_v24 = vrot.slane %v7005_v18, 2  ;;  %v7012_v20 = vld [vmem:[#allocation50_spill] sm:$0xff] }
 0x1f3   : > { %v2119_v13 = vrot.slane %v1995_v26, 2  ;;  %v2120_v16 = vrot.slane %v1996_v61, 2  ;;  %v2122_v45 = vrot.slane %v1997_v55, 2  ;;  %v7008_v32 = vrot.slane %v7007_v36, 2  ;;  %v7014_v61 = vld [vmem:[#allocation57_spill] sm:$0xff]  ;;  %v7018_v36 = vld [vmem:[#allocation11_spill] sm:$0xff] }
 0x1f4   : > { %v2096_v44 = vsel %vm1492_vm4, %v7006_v24, %v7004_v19  ;;  %v7009_v8 = vmov %v7004_v19  ;;  %v2124_v22 = vrot.slane %v1998_v56, 2  ;;  %v2125_v14 = vrot.slane %v1999_v7, 2  ;;  %v7016_v19 = vld [vmem:[#allocation66_spill] sm:$0xff] }
 0x1f5   : > { %v2098_v53 = vsel %vm1492_vm4, %v7009_v8, %v7008_v32  ;;  %v2127_v60 = vrot.slane %v2000_v2, 2  ;;  %v7011_v30 = vrot.slane %v7010_v58, 2  ;;  %v7013_v34 = vrot.slane %v7012_v20, 2 }
 0x1f6   : > { %v2106_v26 = vsel %vm1492_vm4, %v2104_v0, %v2105_v50  ;;  %v7015_v55 = vrot.slane %v7014_v61, 2  ;;  %v2111_v42 = vsel %vm1492_vm4, %v2109_v51, %v2110_v29  ;;  %v7017_v56 = vrot.slane %v7016_v19, 2 }
 0x1f7   : > { %v2101_v5 = vsel %vm1492_vm4, %v7011_v30, %v2100_v54  ;;  %v2103_v1 = vsel %vm1492_vm4, %v2100_v54, %v7013_v34  ;;  %v2116_v2 = vsel %vm1492_vm4, %v2114_v10, %v2115_v17  ;;  %v2118_v18 = vsel %vm1492_vm4, %v2115_v17, %v2117_v25 }
 0x1f8   : > { %v2108_v46 = vsel %vm1492_vm4, %v2105_v50, %v7015_v55  ;;  %v2113_v7 = vsel %vm1492_vm4, %v2110_v29, %v7017_v56  ;;  %v2121_v24 = vsel %vm1492_vm4, %v2119_v13, %v2120_v16  ;;  %v2123_v54 = vsel %vm1492_vm4, %v2120_v16, %v2122_v45  ;;  %v5915_v13 = vld [vmem:[#allocation2 + $0x198] sm:$0xff]  ;;  %v5917_v16 = vld [vmem:[#allocation2 + $0x1a0] sm:$0xff] }
 0x1f9   : > { %v2178_v0 = vadd.f32 %v2093_v59, %v7018_v36  ;;  %v2179_v32 = vadd.f32 %v2096_v44, %v1935_v27  ;;  %v2126_v8 = vsel %vm1492_vm4, %v2124_v22, %v2125_v14  ;;  %v2128_v50 = vsel %vm1492_vm4, %v2125_v14, %v2127_v60  ;;  %7019 = vst [vmem:[#allocation53_spill] sm:$0xff] %v5915_v13  ;;  %v7021_v45 = vld [vmem:[#allocation48_spill] sm:$0xff]  ;;  %v7022_v22 = vld [vmem:[#allocation7_spill] sm:$0xff] }
 0x1fa   : > { %v2180_v51 = vadd.f32 %v2098_v53, %v1936_v6  ;;  %v2181_v58 = vadd.f32 %v2101_v5, %v1937_v21  ;;  %v2182_v30 = vadd.f32 %v2103_v1, %v1938_v43  ;;  %v2183_v20 = vadd.f32 %v2106_v26, %v1939_v15  ;;  %7020 = vst [vmem:[#allocation47_spill] sm:$0xff] %v5917_v16  ;;  %v7024_v60 = vld [vmem:[#allocation60_spill] sm:$0xff] }
 0x1fb   : > { %v2184_v29 = vadd.f32 %v2108_v46, %v1940_v35  ;;  %v2185_v34 = vadd.f32 %v2111_v42, %v1941_v33  ;;  %v2186_v10 = vadd.f32 %v2113_v7, %v1942_v23  ;;  %v2187_v61 = vadd.f32 %v2116_v2, %v1943_v39 }
 0x1fc   : > { %v2188_v17 = vadd.f32 %v2118_v18, %v1944_v62  ;;  %v2189_v25 = vadd.f32 %v2121_v24, %v1945_v48  ;;  %v2190_v59 = vadd.f32 %v2123_v54, %v1946_v11  ;;  %v2191_v27 = vadd.f32 %v2126_v8, %v1947_v28  ;;  %v5979_v8 = vld [vmem:[#allocation2 + $0x1a8] sm:$0x3] }
 0x1fd   : > { %v2192_v44 = vadd.f32 %v2128_v50, %v1948_v57  ;;  %v2216_v14 = vmul.f32 %v7022_v22, %v7021_v45  ;;  %v2217_v6 = vmul.f32 %v7022_v22, %v5566_v47  ;;  %v2218_v21 = vmul.f32 %v7022_v22, %v5588_v52  ;;  %v7023_v57 = vld [vmem:[#allocation46_spill] sm:$0xff]  ;;  %7027 = vst [vmem:[#allocation65_spill] sm:$0xff] %v5979_v8 }
 0x1fe   : > { %v2219_v43 = vmul.f32 %v7022_v22, %v5590_v37  ;;  %v2220_v15 = vmul.f32 %v7022_v22, %v5597_v9  ;;  %v2221_v35 = vmul.f32 %v7022_v22, %v5650_v12  ;;  %v2222_v33 = vmul.f32 %v7022_v22, %v5652_v38 }
 0x1ff   : > { %v2223_v23 = vmul.f32 %v7022_v22, %v5658_v4  ;;  %v2224_v39 = vmul.f32 %v7022_v22, %v5660_v63  ;;  %v2225_v62 = vmul.f32 %v7022_v22, %v5762_v31  ;;  %v2226_v48 = vmul.f32 %v7022_v22, %v5764_v3 }
 0x200   : > { %v2227_v11 = vmul.f32 %v7022_v22, %v5915_v13  ;;  %v2228_v28 = vmul.f32 %v7022_v22, %v5917_v16  ;;  %v5946_v53 = vadd.f32 %v7023_v57, %v2178_v0  ;;  %v5949_v5 = vadd.f32 %v7024_v60, %v2179_v32  ;;  %v7026_v0 = vld [vmem:[#allocation5_spill] sm:$0xff] }
 0x201   : > { %v5951_v1 = vadd.f32 %v2216_v14, %v2180_v51  ;;  %v5953_v26 = vadd.f32 %v2217_v6, %v2181_v58  ;;  %v5955_v55 = vadd.f32 %v2218_v21, %v2182_v30  ;;  %v5957_v46 = vadd.f32 %v2219_v43, %v2183_v20  ;;  %v7028_v14 = vld [vmem:[#allocation9_spill] sm:$0xff] }
 0x202   : > { %v5959_v42 = vadd.f32 %v2220_v15, %v2184_v29  ;;  %v5961_v19 = vadd.f32 %v2221_v35, %v2185_v34  ;;  %v5963_v56 = vadd.f32 %v2222_v33, %v2186_v10  ;;  %v5965_v7 = vadd.f32 %v2223_v23, %v2187_v61  ;;  %v7030_v21 = vld [vmem:[#allocation33_spill] sm:$0xff] }
 0x203   : > { %v5967_v2 = vadd.f32 %v2224_v39, %v2188_v17  ;;  %v5969_v18 = vadd.f32 %v2225_v62, %v2189_v25  ;;  %v5971_v24 = vadd.f32 %v2226_v48, %v2190_v59  ;;  %v5973_v54 = vadd.f32 %v2227_v11, %v2191_v27  ;;  %v7032_v35 = vld [vmem:[#allocation61_spill] sm:$0xff] }
 0x204   : > { %v5975_v36 = vadd.f32 %v2228_v28, %v2192_v44  ;;  %v2295_v32 = vmul.f32 %v7026_v0, %v5566_v47  ;;  %v2296_v50 = vmul.f32 %v7026_v0, %v5588_v52  ;;  %v2298_v51 = vmul.f32 %v7026_v0, %v5590_v37 }
 0x205   : > { %v2299_v58 = vmul.f32 %v7026_v0, %v5597_v9  ;;  %v2301_v30 = vmul.f32 %v7026_v0, %v5650_v12  ;;  %v2302_v20 = vmul.f32 %v7026_v0, %v5652_v38  ;;  %v2303_v29 = vmul.f32 %v7026_v0, %v6997_v49 }
 0x206   : > { %7025 = vst [vmem:[#allocation56_spill] sm:$0xff] %v5975_v36  ;;  %v2304_v34 = vmul.f32 %v7026_v0, %v5658_v4  ;;  %v2305_v10 = vmul.f32 %v7026_v0, %v5660_v63  ;;  %v2306_v61 = vmul.f32 %v7026_v0, %v5666_v41  ;;  %v2307_v17 = vmul.f32 %v7026_v0, %v5762_v31 }
 0x207   : > { %v2308_v25 = vmul.f32 %v7026_v0, %v5764_v3  ;;  %v2309_v59 = vmul.f32 %v7026_v0, %v5791_v40  ;;  %v2310_v27 = vmul.f32 %v7026_v0, %v5915_v13  ;;  %v2311_v44 = vmul.f32 %v7026_v0, %v5917_v16 }
 0x208   : > { %v2312_v22 = vmul.f32 %v7026_v0, %v5979_v8  ;;  %v7029_v6 = vrot.slane %v7028_v14, 1  ;;  %v7031_v43 = vrot.slane %v7030_v21, 1  ;;  %v2407_v33 = vrot.slane %v7032_v35, 1  ;;  %v7033_v21 = vld [vmem:[#allocation43_spill] sm:$0xff] }
 0x209   : > { %v2411_v23 = vrot.slane %v2295_v32, 1  ;;  %v2412_v39 = vrot.slane %v2296_v50, 1  ;;  %v2416_v62 = vrot.slane %v2298_v51, 1  ;;  %v2417_v48 = vrot.slane %v2299_v58, 1  ;;  %v7037_v50 = vld [vmem:[#allocation39_spill] sm:$0xff] }
 0x20a   : > { %v2400_v15 = vsel %vm1247_vm3, %v7031_v43, %v7029_v6  ;;  %v2421_v11 = vrot.slane %v2301_v30, 1  ;;  %v2422_v28 = vrot.slane %v2302_v20, 1  ;;  %v2424_v57 = vrot.slane %v2303_v29, 1  ;;  %v7035_v6 = vld [vmem:[#allocation42_spill] sm:$0xff]  ;;  %v7040_v20 = vld [vmem:[#allocation55_spill] sm:$0xff] }
 0x20b   : > { %v2426_v60 = vrot.slane %v2304_v34, 1  ;;  %v2427_v36 = vrot.slane %v2305_v10, 1  ;;  %v2429_v16 = vrot.slane %v2306_v61, 1  ;;  %v2431_v13 = vrot.slane %v2307_v17, 1  ;;  %v7042_v61 = vld [vmem:[#allocation51_spill] sm:$0xff] }
 0x20c   : > { %v2432_v0 = vrot.slane %v2308_v25, 1  ;;  %v2434_v8 = vrot.slane %v2309_v59, 1  ;;  %v2436_v14 = vrot.slane %v2310_v27, 1  ;;  %v2437_v40 = vrot.slane %v2311_v44, 1  ;;  %v7044_v27 = vld [vmem:[#allocation58_spill] sm:$0xff] }
 0x20d   : > { %v7034_v3 = vrot.slane %v7033_v21, 1  ;;  %v7036_v43 = vrot.slane %v7035_v6, 1  ;;  %v7038_v51 = vrot.slane %v7037_v50, 1  ;;  %v7041_v29 = vrot.slane %v7040_v20, 1  ;;  %v7046_v21 = vld [vmem:[#allocation67_spill] sm:$0xff]  ;;  %v7048_v20 = vld [vmem:[#allocation37_spill] sm:$0xff] }
 0x20e   : > { %v2439_v10 = vrot.slane %v2312_v22, 1  ;;  %v7043_v17 = vrot.slane %v7042_v61, 1  ;;  %v2413_v59 = vsel %vm1247_vm3, %v2411_v23, %v2412_v39  ;;  %v7045_v44 = vrot.slane %v7044_v27, 1 }
 0x20f   : > { %v2403_v32 = vsel %vm1247_vm3, %v7036_v43, %v7034_v3  ;;  %v7039_v58 = vmov %v7034_v3  ;;  %v2408_v34 = vsel %vm1247_vm3, %v7041_v29, %v2407_v33  ;;  %v2418_v35 = vsel %vm1247_vm3, %v2416_v62, %v2417_v48 }
 0x210   : > { %v2405_v30 = vsel %vm1247_vm3, %v7039_v58, %v7038_v51  ;;  %v2410_v25 = vsel %vm1247_vm3, %v2407_v33, %v7043_v17  ;;  %v2415_v3 = vsel %vm1247_vm3, %v2412_v39, %v7045_v44  ;;  %v7047_v6 = vrot.slane %v7046_v21, 1  ;;  %v7060_v17 = vld [vmem:[#allocation31_spill] sm:$0xff]  ;;  %v7063_v44 = vld [vmem:[#allocation45_spill] sm:$0xff] }
 0x211   : > { %v2423_v50 = vsel %vm1247_vm3, %v2421_v11, %v2422_v28  ;;  %v2425_v22 = vsel %vm1247_vm3, %v2422_v28, %v2424_v57  ;;  %v2428_v51 = vsel %vm1247_vm3, %v2426_v60, %v2427_v36  ;;  %v2430_v33 = vsel %vm1247_vm3, %v2427_v36, %v2429_v16  ;;  %v7053_v57 = vld [vmem:[#allocation53_spill] sm:$0xff]  ;;  %v7054_v60 = vld [vmem:[#allocation47_spill] sm:$0xff] }
 0x212   : > { %v2420_v43 = vsel %vm1247_vm3, %v2417_v48, %v7047_v6  ;;  %v2433_v23 = vsel %vm1247_vm3, %v2431_v13, %v2432_v0  ;;  %v2435_v58 = vsel %vm1247_vm3, %v2432_v0, %v2434_v8  ;;  %v2438_v39 = vsel %vm1247_vm3, %v2436_v14, %v2437_v40  ;;  %v7049_v48 = vld [vmem:[#allocation49_spill] sm:$0xff]  ;;  %v7056_v14 = vld [vmem:[#allocation36_spill] sm:$0xff] }
 0x213   : > { %v6049_v62 = vsel %vm1247_vm3, %v2437_v40, %v2439_v10  ;;  %v2488_v29 = vadd.f32 %v2400_v15, %v7048_v20  ;;  %v2489_v61 = vadd.f32 %v2403_v32, %v7049_v48  ;;  %v6054_v11 = vadd.f32 %v2405_v30, %v5946_v53  ;;  %v7055_v0 = vld [vmem:[#allocation65_spill] sm:$0xff]  ;;  %v7058_v30 = vld [vmem:[#allocation35_spill] sm:$0xff] }
 0x214   : > { %v6057_v28 = vadd.f32 %v2408_v34, %v5949_v5  ;;  %v6060_v16 = vadd.f32 %v2410_v25, %v5951_v1  ;;  %v6063_v13 = vadd.f32 %v2413_v59, %v5953_v26  ;;  %v6066_v36 = vadd.f32 %v2415_v3, %v5955_v55 }
 0x215   : > { %v6069_v40 = vadd.f32 %v2418_v35, %v5957_v46  ;;  %v6072_v8 = vadd.f32 %v2420_v43, %v5959_v42  ;;  %v6075_v53 = vadd.f32 %v2423_v50, %v5961_v19  ;;  %v6078_v5 = vadd.f32 %v2425_v22, %v5963_v56  ;;  %v7050_v19 = vld [vmem:[#allocation6_spill] sm:$0xff]  ;;  %v7065_v35 = vld [vmem:[#allocation44_spill] sm:$0xff] }
 0x216   : > { %v6081_v1 = vadd.f32 %v2428_v51, %v5965_v7  ;;  %v6084_v26 = vadd.f32 %v2430_v33, %v5967_v2  ;;  %v6087_v55 = vadd.f32 %v2433_v23, %v5969_v18  ;;  %v6090_v46 = vadd.f32 %v2435_v58, %v5971_v24  ;;  %v7067_v43 = vld [vmem:[#allocation40_spill] sm:$0xff]  ;;  %v7070_v33 = vld [vmem:[#allocation62_spill] sm:$0xff]  ;;  %v7071_v58 = vld [vmem:[#allocation29_spill] sm:$0xff] }
 0x217   : > { %v6093_v42 = vadd.f32 %v2438_v39, %v5973_v54  ;;  %v2537_v15 = vmul.f32 %v7050_v19, %v7021_v45  ;;  %v6099_v56 = vmul.f32 %v7050_v19, %v5566_v47  ;;  %v6103_v7 = vmul.f32 %v7050_v19, %v5588_v52  ;;  %v7051_v45 = vld [vmem:[#allocation70_spill] sm:$0xff]  ;;  %v7052_v54 = vld [vmem:[#allocation71_spill] sm:$0xff] }
 0x218   : > { %v6107_v2 = vmul.f32 %v7050_v19, %v5590_v37  ;;  %v6111_v18 = vmul.f32 %v7050_v19, %v5597_v9  ;;  %v6115_v24 = vmul.f32 %v7050_v19, %v5650_v12  ;;  %v6119_v47 = vmul.f32 %v7050_v19, %v5652_v38  ;;  %v7072_v39 = vld [vmem:[#allocation30_spill] sm:$0xff] }
 0x219   : > { %v6123_v52 = vmul.f32 %v7050_v19, %v6997_v49  ;;  %v6127_v37 = vmul.f32 %v7050_v19, %v5658_v4  ;;  %v6131_v9 = vmul.f32 %v7050_v19, %v5660_v63  ;;  %v6135_v12 = vmul.f32 %v7050_v19, %v5666_v41 }
 0x21a   : > { %v6139_v38 = vmul.f32 %v7050_v19, %v5762_v31  ;;  %v6143_v49 = vmul.f32 %v7050_v19, %v7051_v45  ;;  %v6147_v4 = vmul.f32 %v7050_v19, %v7052_v54  ;;  %v6151_v63 = vmul.f32 %v7050_v19, %v7053_v57  ;;  %v6188_v54 = vld [vmem:[%s6777_s5] ss:$0 sm:$0xff]  ;;  %v7074_v57 = vld [vmem:[#allocation27_spill] sm:$0xff] }
 0x21b   : > { %v6155_v41 = vmul.f32 %v7050_v19, %v7054_v60  ;;  %v6159_v31 = vmul.f32 %v7050_v19, %v7055_v0  ;;  %v7057_v32 = vrot.slane %v7056_v14, 2  ;;  %v7059_v34 = vrot.slane %v7058_v30, 2  ;;  %v7073_v19 = vld [vmem:[#allocation14_spill] sm:$0xff]  ;;  %v7075_v0 = vld [vmem:[#allocation32_spill] sm:$0xff]  ;;  %v6198_v30 = vld [vmem:[%s6778_s6] ss:$0 sm:$0xff] }
 0x21c   : > { %v7061_v25 = vrot.slane %v7060_v17, 2  ;;  %v7064_v3 = vrot.slane %v7063_v44, 2  ;;  %v7066_v21 = vrot.slane %v7065_v35, 2  ;;  %v7068_v50 = vrot.slane %v7067_v43, 2  ;;  %v7079_v35 = vld [vmem:[#allocation24_spill] sm:$0xff] }
 0x21d   : > { %v2642_v10 = vsel %vm1492_vm4, %v7059_v34, %v7057_v32  ;;  %v7062_v59 = vmov %v7057_v32  ;;  %v2650_v23 = vrot.slane %v7070_v33, 2  ;;  %v2730_v20 = vadd.f32 %v7072_v39, %v7071_v58  ;;  %v7081_v58 = vld [vmem:[#allocation22_spill] sm:$0xff] }
 0x21e   : > { %v2644_v27 = vsel %vm1492_vm4, %v7062_v59, %v7061_v25  ;;  %v2647_v6 = vsel %vm1492_vm4, %v7066_v21, %v7064_v3  ;;  %v7069_v22 = vmov %v7064_v3  ;;  %v2651_v48 = vrot.slane %v2537_v15, 2  ;;  %v7076_v15 = vld [vmem:[#allocation25_spill] sm:$0xff]  ;;  %v7078_v25 = vld [vmem:[#allocation26_spill] sm:$0xff] }
 0x21f   : > { %v2649_v51 = vsel %vm1492_vm4, %v7069_v22, %v7068_v50  ;;  %v2731_v45 = vadd.f32 %v2642_v10, %v7073_v19  ;;  %v2767_v60 = vmul.f32 %v6188_v54, %v7074_v57  ;;  %v2768_v14 = vmul.f32 %v6188_v54, %v7075_v0  ;;  %v7077_v10 = vld [vmem:[#allocation28_spill] sm:$0xff]  ;;  %v7080_v21 = vld [vmem:[#allocation21_spill] sm:$0xff] }
 0x220   : > { %v2655_v32 = vrot.slane %v6099_v56, 2  ;;  %v6202_v34 = vadd.f32 %v6198_v30, %v7076_v15  ;;  %v6206_v17 = vadd.f32 %v6198_v30, %v7077_v10  ;;  %v6862_v59 = vmax.f32 %v7078_v25, 0.0  ;;  %v7085_v10 = vld [vmem:[#allocation52_spill] sm:$0xff] }
 0x221   : > { %v2656_v44 = vrot.slane %v6103_v7, 2  ;;  %v2660_v3 = vrot.slane %v6107_v2, 2  ;;  %v2661_v56 = vrot.slane %v6111_v18, 2  ;;  %v2869_v43 = vadd.f32 %v7080_v21, %v7079_v35 }
 0x222   : > { %v2732_v50 = vadd.f32 %v2644_v27, %v2488_v29  ;;  %v2733_v22 = vadd.f32 %v2647_v6, %v2489_v61  ;;  %v2769_v33 = vmul.f32 %v6188_v54, %v2730_v20  ;;  %v7082_v39 = vmax.f32 %v7081_v58, 0.0  ;;  %v7083_v61 = vld [vmem:[#allocation23_spill] sm:$0xff] }
 0x223   : > { %v2770_v57 = vmul.f32 %v6188_v54, %v2731_v45  ;;  %v6220_v0 = vadd.f32 %v6198_v30, %v2767_v60  ;;  %v6223_v7 = vadd.f32 %v6198_v30, %v2768_v14  ;;  %v2836_v18 = vmax.f32 %v6202_v34, 0.0 }
 0x224   : > { %v2870_v19 = vsel %vm933_vm1, %v7082_v39, 0.0  ;;  %v6863_v29 = vmax.f32 %v6206_v17, 0.0  ;;  %v7084_v27 = vmax.f32 %v7083_v61, 0.0  ;;  %v2874_v20 = vsel %vm933_vm1, %v6862_v59, 0.0 }
 0x225   : > { %v2871_v2 = vadd.f32 %v2870_v19, %v2869_v43  ;;  %v2652_v45 = vsel %vm1492_vm4, %v2650_v23, %v2651_v48  ;;  %v2665_v60 = vrot.slane %v6115_v24, 2  ;;  %v2666_v14 = vrot.slane %v6119_v47, 2 }
 0x226   : > { %v2872_v6 = vsel %vm933_vm1, %v7084_v27, 0.0  ;;  %v7086_v35 = vrot.slane %v7085_v10, 2  ;;  %v2734_v43 = vadd.f32 %v2649_v51, %v6054_v11  ;;  %v2735_v39 = vadd.f32 %v2652_v45, %v6057_v28 }
 0x227   : > { %v2873_v15 = vadd.f32 %v2872_v6, %v2871_v2  ;;  %v2771_v19 = vmul.f32 %v6188_v54, %v2732_v50  ;;  %v2772_v27 = vmul.f32 %v6188_v54, %v2733_v22  ;;  %v6244_v59 = vadd.f32 %v6198_v30, %v2769_v33  ;;  %v7089_v6 = vld [vmem:[#allocation68_spill] sm:$0xff] }
 0x228   : > { %v2654_v21 = vsel %vm1492_vm4, %v2651_v48, %v7086_v35  ;;  %v6247_v24 = vadd.f32 %v6198_v30, %v2770_v57  ;;  %v2838_v23 = vmax.f32 %v6220_v0, 0.0  ;;  %v2839_v2 = vmax.f32 %v6223_v7, 0.0  ;;  %v7087_v48 = vld [vmem:[#allocation63_spill] sm:$0xff] }
 0x229   : > { %v2875_v47 = vadd.f32 %v2874_v20, %v2873_v15  ;;  %v2876_v11 = vsel %vm933_vm1, %v2836_v18, 0.0  ;;  %v2878_v28 = vsel %vm933_vm1, %v6863_v29, 0.0  ;;  %v2657_v51 = vsel %vm1492_vm4, %v2655_v32, %v2656_v44 }
 0x22a   : > { %v7088_v50 = vrot.slane %v7087_v48, 2  ;;  %v2662_v33 = vsel %vm1492_vm4, %v2660_v3, %v2661_v56  ;;  %v7090_v20 = vrot.slane %v7089_v6, 2  ;;  %v2736_v15 = vadd.f32 %v2654_v21, %v6060_v16 }
 0x22b   : > { %v2877_v57 = vadd.f32 %v2876_v11, %v2875_v47  ;;  %v2737_v10 = vadd.f32 %v2657_v51, %v6063_v13  ;;  %v2773_v35 = vmul.f32 %v6188_v54, %v2734_v43  ;;  %v2774_v29 = vmul.f32 %v6188_v54, %v2735_v39 }
 0x22c   : > { %v2659_v22 = vsel %vm1492_vm4, %v2656_v44, %v7088_v50  ;;  %v2664_v45 = vsel %vm1492_vm4, %v2661_v56, %v7090_v20  ;;  %v6270_v32 = vadd.f32 %v6198_v30, %v2771_v19  ;;  %v6273_v44 = vadd.f32 %v6198_v30, %v2772_v27 }
 0x22d   : > { %v2879_v3 = vadd.f32 %v2878_v28, %v2877_v57  ;;  %v2840_v47 = vmax.f32 %v6244_v59, 0.0  ;;  %v2841_v11 = vmax.f32 %v6247_v24, 0.0  ;;  %v2880_v16 = vsel %vm933_vm1, %v2838_v23, 0.0 }
 0x22e   : > { %v2882_v13 = vsel %vm933_vm1, %v2839_v2, 0.0  ;;  %v2667_v56 = vsel %vm1492_vm4, %v2665_v60, %v2666_v14  ;;  %v2668_v21 = vrot.slane %v6123_v52, 2  ;;  %v2670_v43 = vrot.slane %v6127_v37, 2 }
 0x22f   : > { %v2881_v39 = vadd.f32 %v2880_v16, %v2879_v3  ;;  %v2671_v19 = vrot.slane %v6131_v9, 2  ;;  %v2738_v27 = vadd.f32 %v2659_v22, %v6066_v36  ;;  %v2739_v28 = vadd.f32 %v2662_v33, %v6069_v40 }
 0x230   : > { %v2775_v51 = vmul.f32 %v6188_v54, %v2736_v15  ;;  %v2776_v48 = vmul.f32 %v6188_v54, %v2737_v10  ;;  %v6292_v50 = vadd.f32 %v6198_v30, %v2773_v35  ;;  %v6295_v60 = vadd.f32 %v6198_v30, %v2774_v29 }
 0x231   : > { %v2883_v52 = vadd.f32 %v2882_v13, %v2881_v39  ;;  %v2842_v37 = vmax.f32 %v6270_v32, 0.0  ;;  %v2843_v57 = vmax.f32 %v6273_v44, 0.0  ;;  %v2884_v36 = vsel %vm933_vm1, %v2840_v47, 0.0 }
 0x232   : > { %v2886_v40 = vsel %vm933_vm1, %v2841_v11, 0.0  ;;  %v2669_v9 = vsel %vm1492_vm4, %v2666_v14, %v2668_v21  ;;  %v2673_v22 = vrot.slane %v6135_v12, 2  ;;  %v2675_v29 = vrot.slane %v6139_v38, 2 }
 0x233   : > { %v2885_v33 = vadd.f32 %v2884_v36, %v2883_v52  ;;  %v2676_v6 = vrot.slane %v6143_v49, 2  ;;  %v2740_v20 = vadd.f32 %v2664_v45, %v6072_v8  ;;  %v2741_v15 = vadd.f32 %v2667_v56, %v6075_v53 }
 0x234   : > { %v2777_v10 = vmul.f32 %v6188_v54, %v2738_v27  ;;  %v2778_v35 = vmul.f32 %v6188_v54, %v2739_v28  ;;  %v6314_v3 = vadd.f32 %v6198_v30, %v2775_v51  ;;  %v6317_v14 = vadd.f32 %v6198_v30, %v2776_v48 }
 0x235   : > { %v2887_v12 = vadd.f32 %v2886_v40, %v2885_v33  ;;  %v2844_v38 = vmax.f32 %v6292_v50, 0.0  ;;  %v2845_v16 = vmax.f32 %v6295_v60, 0.0  ;;  %v2888_v8 = vsel %vm933_vm1, %v2842_v37, 0.0 }
 0x236   : > { %v2890_v53 = vsel %vm933_vm1, %v2843_v57, 0.0  ;;  %v2672_v49 = vsel %vm1492_vm4, %v2670_v43, %v2671_v19  ;;  %v2678_v45 = vrot.slane %v6147_v4, 2  ;;  %v2680_v13 = vrot.slane %v6151_v63, 2 }
 0x237   : > { %v2889_v56 = vadd.f32 %v2888_v8, %v2887_v12  ;;  %v2681_v21 = vrot.slane %v6155_v41, 2  ;;  %v2742_v39 = vadd.f32 %v2669_v9, %v6078_v5  ;;  %v2743_v27 = vadd.f32 %v2672_v49, %v6081_v1  ;;  %v7091_v8 = vld [vmem:[#allocation56_spill] sm:$0xff] }
 0x238   : > { %v2779_v28 = vmul.f32 %v6188_v54, %v2740_v20  ;;  %v2780_v51 = vmul.f32 %v6188_v54, %v2741_v15  ;;  %v6336_v48 = vadd.f32 %v6198_v30, %v2777_v10  ;;  %v6339_v43 = vadd.f32 %v6198_v30, %v2778_v35 }
 0x239   : > { %v2891_v4 = vadd.f32 %v2890_v53, %v2889_v56  ;;  %v2846_v63 = vmax.f32 %v6314_v3, 0.0  ;;  %v2847_v52 = vmax.f32 %v6317_v14, 0.0  ;;  %v2892_v5 = vsel %vm933_vm1, %v2844_v38, 0.0 }
 0x23a   : > { %v2894_v1 = vsel %vm933_vm1, %v2845_v16, 0.0  ;;  %v2674_v41 = vsel %vm1492_vm4, %v2671_v19, %v2673_v22  ;;  %v2677_v36 = vsel %vm1492_vm4, %v2675_v29, %v2676_v6  ;;  %v2683_v40 = vrot.slane %v6159_v31, 2 }
 0x23b   : > { %v2893_v9 = vadd.f32 %v2892_v5, %v2891_v4  ;;  %v2682_v33 = vsel %vm1492_vm4, %v2680_v13, %v2681_v21  ;;  %v2744_v20 = vadd.f32 %v2674_v41, %v6084_v26  ;;  %v2745_v15 = vadd.f32 %v2677_v36, %v6087_v55 }
 0x23c   : > { %v2781_v10 = vmul.f32 %v6188_v54, %v2742_v39  ;;  %v2782_v35 = vmul.f32 %v6188_v54, %v2743_v27  ;;  %v6358_v12 = vadd.f32 %v6198_v30, %v2779_v28  ;;  %v6361_v19 = vadd.f32 %v6198_v30, %v2780_v51 }
 0x23d   : > { %v2895_v22 = vadd.f32 %v2894_v1, %v2893_v9  ;;  %v2848_v31 = vmax.f32 %v6336_v48, 0.0  ;;  %v2849_v29 = vmax.f32 %v6339_v43, 0.0  ;;  %v2896_v26 = vsel %vm933_vm1, %v2846_v63, 0.0  ;;  %v6600_v48 = vld [vmem:[%s6785_s13] ss:$0 sm:$0xff] }
 0x23e   : > { %v2898_v55 = vsel %vm933_vm1, %v2847_v52, 0.0  ;;  %v2504_v53 = vadd.f32 %v6049_v62, %v7091_v8  ;;  %v2679_v49 = vsel %vm1492_vm4, %v2676_v6, %v2678_v45  ;;  %v2684_v56 = vsel %vm1492_vm4, %v2681_v21, %v2683_v40 }
 0x23f   : > { %v2897_v13 = vadd.f32 %v2896_v26, %v2895_v22  ;;  %v2746_v39 = vadd.f32 %v2679_v49, %v6090_v46  ;;  %v2747_v27 = vadd.f32 %v2682_v33, %v6093_v42  ;;  %v2783_v28 = vmul.f32 %v6188_v54, %v2744_v20 }
 0x240   : > { %v2784_v51 = vmul.f32 %v6188_v54, %v2745_v15  ;;  %v6380_v4 = vadd.f32 %v6198_v30, %v2781_v10  ;;  %v6383_v5 = vadd.f32 %v6198_v30, %v2782_v35  ;;  %v2850_v6 = vmax.f32 %v6358_v12, 0.0 }
 0x241   : > { %v2899_v62 = vadd.f32 %v2898_v55, %v2897_v13  ;;  %v2851_v45 = vmax.f32 %v6361_v19, 0.0  ;;  %v2900_v46 = vsel %vm933_vm1, %v2848_v31, 0.0  ;;  %v2902_v42 = vsel %vm933_vm1, %v2849_v29, 0.0 }
 0x242   : > { %v2748_v1 = vadd.f32 %v2684_v56, %v2504_v53  ;;  %v2785_v41 = vmul.f32 %v6188_v54, %v2746_v39  ;;  %v2786_v36 = vmul.f32 %v6188_v54, %v2747_v27  ;;  %v6396_v40 = vadd.f32 %v6198_v30, %v2783_v28 }
 0x243   : > { %v2901_v21 = vadd.f32 %v2900_v46, %v2899_v62  ;;  %v6399_v9 = vadd.f32 %v6198_v30, %v2784_v51  ;;  %v2852_v20 = vmax.f32 %v6380_v4, 0.0  ;;  %v2853_v15 = vmax.f32 %v6383_v5, 0.0 }
 0x244   : > { %v2904_v10 = vsel %vm933_vm1, %v2850_v6, 0.0  ;;  %v2906_v35 = vsel %vm933_vm1, %v2851_v45, 0.0  ;;  %v2787_v26 = vmul.f32 %v6188_v54, %v2748_v1  ;;  %v6411_v55 = vadd.f32 %v6198_v30, %v2785_v41 }
 0x245   : > { %v2903_v33 = vadd.f32 %v2902_v42, %v2901_v21  ;;  %v6414_v8 = vadd.f32 %v6198_v30, %v2786_v36  ;;  %v2854_v49 = vmax.f32 %v6396_v40, 0.0  ;;  %v2855_v13 = vmax.f32 %v6399_v9, 0.0 }
 0x246   : > { %v2908_v56 = vsel %vm933_vm1, %v2852_v20, 0.0  ;;  %v2910_v39 = vsel %vm933_vm1, %v2853_v15, 0.0  ;;  %v6425_v27 = vadd.f32 %v6198_v30, %v2787_v26  ;;  %v2856_v51 = vmax.f32 %v6411_v55, 0.0 }
 0x247   : > { %v2905_v22 = vadd.f32 %v2904_v10, %v2903_v33  ;;  %v2857_v62 = vmax.f32 %v6414_v8, 0.0  ;;  %v2912_v46 = vsel %vm933_vm1, %v2854_v49, 0.0  ;;  %v2914_v42 = vsel %vm933_vm1, %v2855_v13, 0.0  ;;  %v3949_v8 = vld [vmem:[%s4084_s20 + $0x18] sm:$0xff] }
 0x248   : > { %v2858_v41 = vmax.f32 %v6425_v27, 0.0  ;;  %v2916_v30 = vsel %vm933_vm1, %v2856_v51, 0.0 }
 0x249   : > { %v2907_v53 = vadd.f32 %v2906_v35, %v2905_v22  ;;  %v2918_v36 = vsel %vm933_vm1, %v2857_v62, 0.0 }
 0x24a   : > { %v2920_v35 = vsel %vm933_vm1, %v2858_v41, 0.0 }
 0x24b   : > { %v2909_v54 = vadd.f32 %v2908_v56, %v2907_v53 }
 0x24d   : > { %v2911_v28 = vadd.f32 %v2910_v39, %v2909_v54 }
 0x24f   : > { %v2913_v21 = vadd.f32 %v2912_v46, %v2911_v28 }
 0x251   : > { %v2915_v1 = vadd.f32 %v2914_v42, %v2913_v21  ;;  %v3006_v42 = vld [vmem:[%s6781_s9] sm:$0xf] }
 0x252   : > { %3865 = vmatpush3.msk.msra.mxu1 %vm3012_vm6, %v3006_v42  ;;  %v2931_v21 = vld [vmem:[%s6780_s8] sm:$0x1] }
 0x253   : > { %v2917_v33 = vadd.f32 %v2916_v30, %v2915_v1 }
 0x255   : > { %v2919_v10 = vadd.f32 %v2918_v36, %v2917_v33 }
 0x257   : > { %v2921_v22 = vadd.f32 %v2920_v35, %v2919_v10  ;;  %v3128_v10 = vld [vmem:[%s6783_s11] sm:$0xff]  ;;  %v3129_v35 = vld [vmem:[%s6783_s11 + $0x8] sm:$0xff] }
 0x259   : > { %v2922_v26 = vrot.slane %v2921_v22, 4 }
 0x25b   : > { %v2923_v53 = vadd.f32 %v2922_v26, %v2921_v22  ;;  %v3924_v22 = vpack.c.bf16 %v3129_v35, %v3128_v10  ;;  %v3007_v26 = vld [vmem:[%s6782_s10] sm:$0x1]  ;;  %v7095_v10 = vld [vmem:[#allocation12_spill] sm:$0xff] }
 0x25c   : > { %v7096_v35 = vmax.f32 %v7095_v10, 0.0  ;;  %v7105_v10 = vmax.f32 %v7081_v58, 0.0 }
 0x25d   : > { %v2924_v56 = vrot.slane %v2923_v53, 2  ;;  %3925 = vmatprep.subr.bf16.mxu1 %v3924_v22 }
 0x25f   : > { %v2925_v39 = vadd.f32 %v2924_v56, %v2923_v53 }
 0x261   : > { %v2926_v54 = vrot.slane %v2925_v39, 1 }
 0x263   : > { %v2927_v28 = vadd.f32 %v2926_v54, %v2925_v39 }
 0x265   : > { %v2928_v46 = vmul.f32 0.00390625, %v2927_v28 }
 0x267   : > { %3862 = vmatmul.mubr.msk.f32.vlgmr.msra.gmra.mrb[32].mxu0 %vm933_vm1, %v2928_v46 }
 0x33a   : > { %v3001_v1 = vpop.f32.mrb[32].mxu0 }
 0x33b   : > { %v3002_v30 = vadd.f32 %v3001_v1, %v2931_v21  ;;  %v3863_v36 = vpop.f32.mrb[33].mxu0  ;;  %v7092_v21 = vld [vmem:[#allocation3_spill] sm:$0xff] }
 0x33d   : > { %v3005_v33 = vmax.f32 %v3002_v30, 0.0  ;;  %v7093_v30 = vld [vmem:[#allocation10_spill] sm:$0xff] }
 0x33e   : > { %v7094_v36 = vmax.f32 %v7093_v30, 0.0  ;;  %v7103_v30 = vld [vmem:[#allocation20_spill] sm:$0xff] }
 0x33f   : > { %3867 = vmatmul.mubr.msk.f32.vlgmr.msra.gmra.mrb[0].mxu1 %vm3008_vm7, %v3005_v33 }
 0x340   : > { %3927 = vmatpush3.bf16.msra.mxu1 %v3924_v22 }
 0x412   : > { %v3082_v53 = vpop.f32.mrb[0].mxu1 }
 0x413   : > { %v3083_v56 = vadd.f32 %v3082_v53, %v3007_v26  ;;  %v3868_v39 = vpop.f32.mrb[1].mxu1  ;;  %v7097_v26 = vld [vmem:[#allocation13_spill] sm:$0xff] }
 0x414   : > { %v7098_v53 = vmax.f32 %v7097_v26, 0.0  ;;  %v7099_v39 = vld [vmem:[#allocation16_spill] sm:$0xff] }
 0x415   : > { %v3696_v54 = vmul.f32 -1.442695, %v3083_v56 }
 0x417   : > { %3939 = vpow2.f32 %v3696_v54  ;;  %v7100_v54 = vmax.f32 %v7099_v39, 0.0  ;;  %v7108_v39 = vmax.f32 %v6206_v17, 0.0 }
 0x421   : > { %v3940_v28 = vpop.eup %3939 }
 0x422   : > { %v3089_v46 = vadd.f32 1.0, %v3940_v28 }
 0x424   : > { %3941 = vrcp.f32 %v3089_v46  ;;  %v7101_v46 = vld [vmem:[#allocation19_spill] sm:$0xff] }
 0x42e   : > { %v3942_v42 = vpop.eup %3941 }
 0x42f   : > { %v6462_v1 = vrot.slane %v3942_v42, %v7092_v21  ;;  %v7102_v42 = vmax.f32 %v7101_v46, 0.0 }
 0x431   : > { %v3096_v33 = vmul.f32 %v6462_v1, %v7094_v36  ;;  %v3097_v22 = vmul.f32 %v6462_v1, %v7096_v35  ;;  %v3098_v56 = vmul.f32 %v6462_v1, %v7098_v53  ;;  %v3099_v28 = vmul.f32 %v6462_v1, %v7100_v54 }
 0x432   : > { %v3100_v21 = vmul.f32 %v6462_v1, %v7102_v42  ;;  %v7104_v36 = vmax.f32 %v7103_v30, 0.0  ;;  %v3102_v35 = vmul.f32 %v6462_v1, %v7105_v10  ;;  %v7107_v53 = vmax.f32 %v7078_v25, 0.0  ;;  %v3951_v42 = vld [vmem:[%s4084_s20 + $0x28] sm:$0xff] }
 0x433   : > { %3873 = vmatprep.mubr.msk.f32.mxu1 %vm933_vm1, %v3096_v33  ;;  %v3105_v58 = vmul.f32 %v6462_v1, %v2836_v18  ;;  %v3106_v54 = vmul.f32 %v6462_v1, %v7108_v39  ;;  %v3107_v25 = vmul.f32 %v6462_v1, %v2838_v23  ;;  %v3109_v34 = vmul.f32 %v6462_v1, %v2840_v47 }
 0x434   : > { %3874 = vmatmul.mubr.msk.f32.vlgmr.msra.gmra.mrb[2].mxu1 %vm933_vm1, %v3097_v22  ;;  %v3101_v33 = vmul.f32 %v6462_v1, %v7104_v36  ;;  %v7106_v22 = vmax.f32 %v7083_v61, 0.0  ;;  %v3108_v61 = vmul.f32 %v6462_v1, %v2839_v2  ;;  %v3110_v17 = vmul.f32 %v6462_v1, %v2841_v11 }
 0x435   : > { %3876 = vmatprep.mubr.msk.f32.mxu1 %vm933_vm1, %v3098_v56  ;;  %v3104_v56 = vmul.f32 %v6462_v1, %v7107_v53  ;;  %v3111_v0 = vmul.f32 %v6462_v1, %v2842_v37  ;;  %v3112_v7 = vmul.f32 %v6462_v1, %v2843_v57  ;;  %v3113_v59 = vmul.f32 %v6462_v1, %v2844_v38  ;;  %v6595_v38 = vld [vmem:[%s6784_s12] ss:$0 sm:$0xff] }
 0x436   : > { %v3103_v26 = vmul.f32 %v6462_v1, %v7106_v22  ;;  %v3114_v18 = vmul.f32 %v6462_v1, %v2845_v16  ;;  %v3115_v24 = vmul.f32 %v6462_v1, %v2846_v63  ;;  %v3116_v23 = vmul.f32 %v6462_v1, %v2847_v52 }
 0x437   : > { %v3117_v2 = vmul.f32 %v6462_v1, %v2848_v31  ;;  %v3118_v32 = vmul.f32 %v6462_v1, %v2849_v29  ;;  %v3119_v44 = vmul.f32 %v6462_v1, %v2850_v6  ;;  %v3120_v47 = vmul.f32 %v6462_v1, %v2851_v45  ;;  %v3947_v29 = vld [vmem:[%s4084_s20 + $0x8] sm:$0xff]  ;;  %v3948_v45 = vld [vmem:[%s4084_s20] sm:$0xff] }
 0x438   : > { %3877 = vmatmul.mubr.msk.f32.gmra.mrb[4].mxu1 %vm933_vm1, %v3099_v28  ;;  %v3121_v11 = vmul.f32 %v6462_v1, %v2852_v20  ;;  %v3122_v50 = vmul.f32 %v6462_v1, %v2853_v15  ;;  %v3123_v60 = vmul.f32 %v6462_v1, %v2854_v49  ;;  %v3124_v37 = vmul.f32 %v6462_v1, %v2855_v13 }
 0x439   : > { %3879 = vmatprep.mubr.msk.f32.mxu1 %vm933_vm1, %v3100_v21  ;;  %v3125_v57 = vmul.f32 %v6462_v1, %v2856_v51  ;;  %v3126_v3 = vmul.f32 %v6462_v1, %v2857_v62  ;;  %v3127_v14 = vmul.f32 %v6462_v1, %v2858_v41  ;;  %v3950_v51 = vld [vmem:[%s4084_s20 + $0x10] sm:$0xff] }
 0x43c   : > { %3880 = vmatmul.mubr.msk.f32.gmra.mrb[6].mxu1 %vm933_vm1, %v3101_v33  ;;  %v3952_v33 = vld [vmem:[%s4084_s20 + $0x20] sm:$0xff] }
 0x43d   : > { %3882 = vmatprep.mubr.msk.f32.mxu1 %vm933_vm1, %v3102_v35 }
 0x440   : > { %3883 = vmatmul.mubr.msk.f32.gmra.mrb[8].mxu1 %vm933_vm1, %v3103_v26 }
 0x441   : > { %3885 = vmatprep.mubr.msk.f32.mxu1 %vm933_vm1, %v3104_v56  ;;  %v3953_v56 = vld [vmem:[%s4084_s20 + $0x38] sm:$0xff] }
 0x444   : > { %3886 = vmatmul.mubr.msk.f32.gmra.mrb[10].mxu1 %vm933_vm1, %v3105_v58 }
 0x445   : > { %3888 = vmatprep.mubr.msk.f32.mxu1 %vm933_vm1, %v3106_v54 }
 0x448   : > { %3889 = vmatmul.mubr.msk.f32.gmra.mrb[12].mxu1 %vm933_vm1, %v3107_v25  ;;  %v3954_v25 = vld [vmem:[%s4084_s20 + $0x30] sm:$0xff] }
 0x449   : > { %3891 = vmatprep.mubr.msk.f32.mxu1 %vm933_vm1, %v3108_v61 }
 0x44c   : > { %3892 = vmatmul.mubr.msk.f32.gmra.mrb[14].mxu1 %vm933_vm1, %v3109_v34 }
 0x44d   : > { %3894 = vmatprep.mubr.msk.f32.mxu1 %vm933_vm1, %v3110_v17 }
 0x450   : > { %3895 = vmatmul.mubr.msk.f32.gmra.mrb[16].mxu1 %vm933_vm1, %v3111_v0 }
 0x451   : > { %3897 = vmatprep.mubr.msk.f32.mxu1 %vm933_vm1, %v3112_v7 }
 0x454   : > { %3898 = vmatmul.mubr.msk.f32.gmra.mrb[18].mxu1 %vm933_vm1, %v3113_v59  ;;  %v3955_v59 = vld [vmem:[%s4084_s20 + $0x48] sm:$0xff] }
 0x455   : > { %3900 = vmatprep.mubr.msk.f32.mxu1 %vm933_vm1, %v3114_v18 }
 0x458   : > { %3901 = vmatmul.mubr.msk.f32.gmra.mrb[20].mxu1 %vm933_vm1, %v3115_v24 }
 0x459   : > { %3903 = vmatprep.mubr.msk.f32.mxu1 %vm933_vm1, %v3116_v23 }
 0x45c   : > { %3904 = vmatmul.mubr.msk.f32.gmra.mrb[22].mxu1 %vm933_vm1, %v3117_v2  ;;  %v3956_v2 = vld [vmem:[%s4084_s20 + $0x40] sm:$0xff] }
 0x45d   : > { %3906 = vmatprep.mubr.msk.f32.mxu1 %vm933_vm1, %v3118_v32 }
 0x460   : > { %3907 = vmatmul.mubr.msk.f32.gmra.mrb[24].mxu1 %vm933_vm1, %v3119_v44 }
 0x461   : > { %3909 = vmatprep.mubr.msk.f32.mxu1 %vm933_vm1, %v3120_v47 }
 0x464   : > { %3910 = vmatmul.mubr.msk.f32.gmra.mrb[26].mxu1 %vm933_vm1, %v3121_v11 }
 0x465   : > { %3912 = vmatprep.mubr.msk.f32.mxu1 %vm933_vm1, %v3122_v50 }
 0x468   : > { %3913 = vmatmul.mubr.msk.f32.gmra.mrb[28].mxu1 %vm933_vm1, %v3123_v60  ;;  %v3957_v60 = vld [vmem:[%s4084_s20 + $0x58] sm:$0xff] }
 0x469   : > { %3915 = vmatprep.mubr.msk.f32.mxu1 %vm933_vm1, %v3124_v37 }
 0x46c   : > { %3916 = vmatmul.mubr.msk.f32.gmra.mrb[30].mxu1 %vm933_vm1, %v3125_v57 }
 0x46d   : > { %3918 = vmatprep.mubr.msk.f32.mxu1 %vm933_vm1, %v3126_v3 }
 0x470   : > { %3919 = vmatmul.mubr.msk.f32.gmra.mrb[32].mxu1 %vm933_vm1, %v3127_v14  ;;  %v3958_v14 = vld [vmem:[%s4084_s20 + $0x50] sm:$0xff] }
 0x507   : > { %v3875_v16 = vpop.f32.mrb[2].mxu1 }
 0x508   : > { %v3459_v43 = vmul.f32 %v3875_v16, %v6595_v38  ;;  %v3292_v63 = vpop.f32.mrb[3].mxu1 }
 0x509   : > { %v3458_v52 = vmul.f32 %v6595_v38, %v3292_v63 }
 0x50a   : > { %v3498_v12 = vadd.f32 %v6600_v48, %v3459_v43 }
 0x50b   : > { %v3497_v19 = vadd.f32 %v6600_v48, %v3458_v52  ;;  %v3878_v31 = vpop.f32.mrb[4].mxu1 }
 0x50c   : > { %v3530_v4 = vadd.f32 %v3947_v29, %v3498_v12  ;;  %v3461_v5 = vmul.f32 %v3878_v31, %v6595_v38  ;;  %v3302_v6 = vpop.f32.mrb[5].mxu1 }
 0x50d   : > { %v3529_v40 = vadd.f32 %v3948_v45, %v3497_v19  ;;  %v3460_v9 = vmul.f32 %v6595_v38, %v3302_v6  ;;  %v3959_v19 = vld [vmem:[%s4084_s20 + $0x68] sm:$0xff] }
 0x50e   : > { %3562 = vst.msk [vmem:[%s6610_s27 + $0x8] sm:$0xff] %vm501_vm0, %v3530_v4  ;;  %v3500_v20 = vadd.f32 %v6600_v48, %v3461_v5  ;;  %v3960_v5 = vld [vmem:[%s4084_s20 + $0x60] sm:$0xff] }
 0x50f   : > { %3561 = vst.msk [vmem:[%s6610_s27] sm:$0xff] %vm501_vm0, %v3529_v40  ;;  %v3499_v15 = vadd.f32 %v6600_v48, %v3460_v9  ;;  %v3881_v55 = vpop.f32.mrb[6].mxu1 }
 0x510   : > { %v3532_v49 = vadd.f32 %v3949_v8, %v3500_v20  ;;  %v3463_v13 = vmul.f32 %v3881_v55, %v6595_v38  ;;  %v3312_v27 = vpop.f32.mrb[7].mxu1 }
 0x511   : > { %v3531_v62 = vadd.f32 %v3950_v51, %v3499_v15  ;;  %v3462_v41 = vmul.f32 %v6595_v38, %v3312_v27  ;;  %v3961_v15 = vld [vmem:[%s4084_s20 + $0x78] sm:$0xff] }
 0x512   : > { %3564 = vst.msk [vmem:[%s6610_s27 + $0x18] sm:$0xff] %vm501_vm0, %v3532_v49  ;;  %v3502_v1 = vadd.f32 %v6600_v48, %v3463_v13  ;;  %v3962_v13 = vld [vmem:[%s4084_s20 + $0x70] sm:$0xff] }
 0x513   : > { %3563 = vst.msk [vmem:[%s6610_s27 + $0x10] sm:$0xff] %vm501_vm0, %v3531_v62  ;;  %v3501_v28 = vadd.f32 %v6600_v48, %v3462_v41  ;;  %v3884_v46 = vpop.f32.mrb[8].mxu1 }
 0x514   : > { %v3534_v21 = vadd.f32 %v3951_v42, %v3502_v1  ;;  %v3465_v30 = vmul.f32 %v3884_v46, %v6595_v38  ;;  %v3322_v36 = vpop.f32.mrb[9].mxu1 }
 0x515   : > { %v3533_v10 = vadd.f32 %v3952_v33, %v3501_v28  ;;  %v3464_v35 = vmul.f32 %v6595_v38, %v3322_v36  ;;  %v3963_v28 = vld [vmem:[%s4084_s20 + $0x88] sm:$0xff] }
 0x516   : > { %3566 = vst.msk [vmem:[%s6610_s27 + $0x28] sm:$0xff] %vm501_vm0, %v3534_v21  ;;  %v3504_v22 = vadd.f32 %v6600_v48, %v3465_v30  ;;  %v3964_v30 = vld [vmem:[%s4084_s20 + $0x80] sm:$0xff] }
 0x517   : > { %3565 = vst.msk [vmem:[%s6610_s27 + $0x20] sm:$0xff] %vm501_vm0, %v3533_v10  ;;  %v3503_v26 = vadd.f32 %v6600_v48, %v3464_v35  ;;  %v3887_v53 = vpop.f32.mrb[10].mxu1 }
 0x518   : > { %v3536_v58 = vadd.f32 %v3953_v56, %v3504_v22  ;;  %v3467_v39 = vmul.f32 %v3887_v53, %v6595_v38  ;;  %v3332_v54 = vpop.f32.mrb[11].mxu1 }
 0x519   : > { %v3535_v61 = vadd.f32 %v3954_v25, %v3503_v26  ;;  %v3466_v34 = vmul.f32 %v6595_v38, %v3332_v54  ;;  %v3965_v26 = vld [vmem:[%s4084_s20 + $0x98] sm:$0xff] }
 0x51a   : > { %3568 = vst.msk [vmem:[%s6610_s27 + $0x38] sm:$0xff] %vm501_vm0, %v3536_v58  ;;  %v3506_v17 = vadd.f32 %v6600_v48, %v3467_v39  ;;  %v3966_v39 = vld [vmem:[%s4084_s20 + $0x90] sm:$0xff] }
 0x51b   : > { %3567 = vst.msk [vmem:[%s6610_s27 + $0x30] sm:$0xff] %vm501_vm0, %v3535_v61  ;;  %v3505_v0 = vadd.f32 %v6600_v48, %v3466_v34  ;;  %v3890_v7 = vpop.f32.mrb[12].mxu1 }
 0x51c   : > { %v3538_v18 = vadd.f32 %v3955_v59, %v3506_v17  ;;  %v3469_v24 = vmul.f32 %v3890_v7, %v6595_v38  ;;  %v3342_v23 = vpop.f32.mrb[13].mxu1 }
 0x51d   : > { %v3537_v32 = vadd.f32 %v3956_v2, %v3505_v0  ;;  %v3468_v44 = vmul.f32 %v6595_v38, %v3342_v23  ;;  %v3967_v0 = vld [vmem:[%s4084_s20 + $0xa8] sm:$0xff] }
 0x51e   : > { %3570 = vst.msk [vmem:[%s6610_s27 + $0x48] sm:$0xff] %vm501_vm0, %v3538_v18  ;;  %v3508_v47 = vadd.f32 %v6600_v48, %v3469_v24  ;;  %v3968_v24 = vld [vmem:[%s4084_s20 + $0xa0] sm:$0xff] }
 0x51f   : > { %3569 = vst.msk [vmem:[%s6610_s27 + $0x40] sm:$0xff] %vm501_vm0, %v3537_v32  ;;  %v3507_v11 = vadd.f32 %v6600_v48, %v3468_v44  ;;  %v3893_v50 = vpop.f32.mrb[14].mxu1 }
 0x520   : > { %v3540_v37 = vadd.f32 %v3957_v60, %v3508_v47  ;;  %v3471_v57 = vmul.f32 %v3893_v50, %v6595_v38  ;;  %v3352_v3 = vpop.f32.mrb[15].mxu1 }
 0x521   : > { %v3539_v16 = vadd.f32 %v3958_v14, %v3507_v11  ;;  %v3470_v43 = vmul.f32 %v6595_v38, %v3352_v3  ;;  %v3969_v11 = vld [vmem:[%s4084_s20 + $0xb8] sm:$0xff] }
 0x522   : > { %3572 = vst.msk [vmem:[%s6610_s27 + $0x58] sm:$0xff] %vm501_vm0, %v3540_v37  ;;  %v3510_v63 = vadd.f32 %v6600_v48, %v3471_v57  ;;  %v3970_v57 = vld [vmem:[%s4084_s20 + $0xb0] sm:$0xff] }
 0x523   : > { %3571 = vst.msk [vmem:[%s6610_s27 + $0x50] sm:$0xff] %vm501_vm0, %v3539_v16  ;;  %v3509_v52 = vadd.f32 %v6600_v48, %v3470_v43  ;;  %v3896_v12 = vpop.f32.mrb[16].mxu1 }
 0x524   : > { %v3542_v31 = vadd.f32 %v3959_v19, %v3510_v63  ;;  %v3473_v29 = vmul.f32 %v3896_v12, %v6595_v38  ;;  %v3362_v4 = vpop.f32.mrb[17].mxu1 }
 0x525   : > { %v3541_v6 = vadd.f32 %v3960_v5, %v3509_v52  ;;  %v3472_v45 = vmul.f32 %v6595_v38, %v3362_v4  ;;  %v3971_v52 = vld [vmem:[%s4084_s20 + $0xc8] sm:$0xff] }
 0x526   : > { %3574 = vst.msk [vmem:[%s6610_s27 + $0x68] sm:$0xff] %vm501_vm0, %v3542_v31  ;;  %v3512_v40 = vadd.f32 %v6600_v48, %v3473_v29  ;;  %v3972_v29 = vld [vmem:[%s4084_s20 + $0xc0] sm:$0xff] }
 0x527   : > { %3573 = vst.msk [vmem:[%s6610_s27 + $0x60] sm:$0xff] %vm501_vm0, %v3541_v6  ;;  %v3511_v9 = vadd.f32 %v6600_v48, %v3472_v45  ;;  %v3899_v20 = vpop.f32.mrb[18].mxu1 }
 0x528   : > { %v3544_v55 = vadd.f32 %v3961_v15, %v3512_v40  ;;  %v3475_v8 = vmul.f32 %v3899_v20, %v6595_v38  ;;  %v3372_v49 = vpop.f32.mrb[19].mxu1 }
 0x529   : > { %v3543_v27 = vadd.f32 %v3962_v13, %v3511_v9  ;;  %v3474_v51 = vmul.f32 %v6595_v38, %v3372_v49  ;;  %v3973_v9 = vld [vmem:[%s4084_s20 + $0xd8] sm:$0xff] }
 0x52a   : > { %3576 = vst.msk [vmem:[%s6610_s27 + $0x78] sm:$0xff] %vm501_vm0, %v3544_v55  ;;  %v3514_v62 = vadd.f32 %v6600_v48, %v3475_v8  ;;  %v3974_v8 = vld [vmem:[%s4084_s20 + $0xd0] sm:$0xff] }
 0x52b   : > { %3575 = vst.msk [vmem:[%s6610_s27 + $0x70] sm:$0xff] %vm501_vm0, %v3543_v27  ;;  %v3513_v41 = vadd.f32 %v6600_v48, %v3474_v51  ;;  %v3902_v1 = vpop.f32.mrb[20].mxu1 }
 0x52c   : > { %v3546_v46 = vadd.f32 %v3963_v28, %v3514_v62  ;;  %v3477_v42 = vmul.f32 %v3902_v1, %v6595_v38  ;;  %v3382_v21 = vpop.f32.mrb[21].mxu1 }
 0x52d   : > { %v3545_v36 = vadd.f32 %v3964_v30, %v3513_v41  ;;  %v3476_v33 = vmul.f32 %v6595_v38, %v3382_v21  ;;  %v3975_v41 = vld [vmem:[%s4084_s20 + $0xe8] sm:$0xff] }
 0x52e   : > { %3578 = vst.msk [vmem:[%s6610_s27 + $0x88] sm:$0xff] %vm501_vm0, %v3546_v46  ;;  %v3516_v10 = vadd.f32 %v6600_v48, %v3477_v42  ;;  %v3976_v42 = vld [vmem:[%s4084_s20 + $0xe0] sm:$0xff] }
 0x52f   : > { %3577 = vst.msk [vmem:[%s6610_s27 + $0x80] sm:$0xff] %vm501_vm0, %v3545_v36  ;;  %v3515_v35 = vadd.f32 %v6600_v48, %v3476_v33  ;;  %v3905_v22 = vpop.f32.mrb[22].mxu1 }
 0x530   : > { %v3548_v53 = vadd.f32 %v3965_v26, %v3516_v10  ;;  %v3479_v56 = vmul.f32 %v3905_v22, %v6595_v38  ;;  %v3392_v58 = vpop.f32.mrb[23].mxu1  ;;  %v3977_v10 = vld [vmem:[%s4084_s20 + $0xf8] sm:$0xff]  ;;  %v3978_v22 = vld [vmem:[%s4084_s20 + $0xf0] sm:$0xff] }
 0x531   : > { %v3547_v54 = vadd.f32 %v3966_v39, %v3515_v35  ;;  %v3478_v25 = vmul.f32 %v6595_v38, %v3392_v58 }
 0x532   : > { %3580 = vst.msk [vmem:[%s6610_s27 + $0x98] sm:$0xff] %vm501_vm0, %v3548_v53  ;;  %v3518_v61 = vadd.f32 %v6600_v48, %v3479_v56 }
 0x533   : > { %3579 = vst.msk [vmem:[%s6610_s27 + $0x90] sm:$0xff] %vm501_vm0, %v3547_v54  ;;  %v3517_v34 = vadd.f32 %v6600_v48, %v3478_v25  ;;  %v3908_v17 = vpop.f32.mrb[24].mxu1 }
 0x534   : > { %v3550_v7 = vadd.f32 %v3967_v0, %v3518_v61  ;;  %v3481_v59 = vmul.f32 %v3908_v17, %v6595_v38  ;;  %v3402_v18 = vpop.f32.mrb[25].mxu1 }
 0x535   : > { %v3549_v23 = vadd.f32 %v3968_v24, %v3517_v34  ;;  %v3480_v2 = vmul.f32 %v6595_v38, %v3402_v18 }
 0x536   : > { %3582 = vst.msk [vmem:[%s6610_s27 + $0xa8] sm:$0xff] %vm501_vm0, %v3550_v7  ;;  %v3520_v32 = vadd.f32 %v6600_v48, %v3481_v59 }
 0x537   : > { %3581 = vst.msk [vmem:[%s6610_s27 + $0xa0] sm:$0xff] %vm501_vm0, %v3549_v23  ;;  %v3519_v44 = vadd.f32 %v6600_v48, %v3480_v2  ;;  %v3911_v47 = vpop.f32.mrb[26].mxu1 }
 0x538   : > { %v3552_v50 = vadd.f32 %v3969_v11, %v3520_v32  ;;  %v3483_v60 = vmul.f32 %v3911_v47, %v6595_v38  ;;  %v3412_v37 = vpop.f32.mrb[27].mxu1 }
 0x539   : > { %v3551_v3 = vadd.f32 %v3970_v57, %v3519_v44  ;;  %v3482_v14 = vmul.f32 %v6595_v38, %v3412_v37 }
 0x53a   : > { %3584 = vst.msk [vmem:[%s6610_s27 + $0xb8] sm:$0xff] %vm501_vm0, %v3552_v50  ;;  %v3522_v16 = vadd.f32 %v6600_v48, %v3483_v60 }
 0x53b   : > { %3583 = vst.msk [vmem:[%s6610_s27 + $0xb0] sm:$0xff] %vm501_vm0, %v3551_v3  ;;  %v3521_v43 = vadd.f32 %v6600_v48, %v3482_v14  ;;  %v3914_v63 = vpop.f32.mrb[28].mxu1 }
 0x53c   : > { %v3554_v12 = vadd.f32 %v3971_v52, %v3522_v16  ;;  %v3485_v19 = vmul.f32 %v3914_v63, %v6595_v38  ;;  %v3422_v31 = vpop.f32.mrb[29].mxu1 }
 0x53d   : > { %v3553_v4 = vadd.f32 %v3972_v29, %v3521_v43  ;;  %v3484_v5 = vmul.f32 %v6595_v38, %v3422_v31 }
 0x53e   : > { %3586 = vst.msk [vmem:[%s6610_s27 + $0xc8] sm:$0xff] %vm501_vm0, %v3554_v12  ;;  %v3524_v6 = vadd.f32 %v6600_v48, %v3485_v19 }
 0x53f   : > { %3585 = vst.msk [vmem:[%s6610_s27 + $0xc0] sm:$0xff] %vm501_vm0, %v3553_v4  ;;  %v3523_v45 = vadd.f32 %v6600_v48, %v3484_v5  ;;  %v3917_v40 = vpop.f32.mrb[30].mxu1 }
 0x540   : > { %v3556_v20 = vadd.f32 %v3973_v9, %v3524_v6  ;;  %v3487_v15 = vmul.f32 %v3917_v40, %v6595_v38  ;;  %v3432_v55 = vpop.f32.mrb[31].mxu1 }
 0x541   : > { %v3555_v49 = vadd.f32 %v3974_v8, %v3523_v45  ;;  %v3486_v13 = vmul.f32 %v6595_v38, %v3432_v55 }
 0x542   : > { %3588 = vst.msk [vmem:[%s6610_s27 + $0xd8] sm:$0xff] %vm501_vm0, %v3556_v20  ;;  %v3526_v27 = vadd.f32 %v6600_v48, %v3487_v15 }
 0x543   : > { %3587 = vst.msk [vmem:[%s6610_s27 + $0xd0] sm:$0xff] %vm501_vm0, %v3555_v49  ;;  %v3525_v51 = vadd.f32 %v6600_v48, %v3486_v13  ;;  %v3920_v62 = vpop.f32.mrb[32].mxu1 }
 0x544   : > { %v3558_v1 = vadd.f32 %v3975_v41, %v3526_v27  ;;  %v3489_v28 = vmul.f32 %v3920_v62, %v6595_v38  ;;  %v3442_v46 = vpop.f32.mrb[33].mxu1 }
 0x545   : > { %v3557_v21 = vadd.f32 %v3976_v42, %v3525_v51  ;;  %v3488_v30 = vmul.f32 %v6595_v38, %v3442_v46 }
 0x546   : > { %3590 = vst.msk [vmem:[%s6610_s27 + $0xe8] sm:$0xff] %vm501_vm0, %v3558_v1  ;;  %v3528_v36 = vadd.f32 %v6600_v48, %v3489_v28 }
 0x547   : > { %3589 = vst.msk [vmem:[%s6610_s27 + $0xe0] sm:$0xff] %vm501_vm0, %v3557_v21  ;;  %v3527_v33 = vadd.f32 %v6600_v48, %v3488_v30 }
 0x548   : > { %v3560_v35 = vadd.f32 %v3977_v10, %v3528_v36 }
 0x549   : > { %v3559_v26 = vadd.f32 %v3978_v22, %v3527_v33 }
 0x54a   : > { %3592 = vst.msk [vmem:[%s6610_s27 + $0xf8] sm:$0xff] %vm501_vm0, %v3560_v35 }
 0x54b   : > { %3591 = vst.msk [vmem:[%s6610_s27 + $0xf0] sm:$0xff] %vm501_vm0, %v3559_v26 }
 0x54c PF: > { %s24_s29 = sadd.s32 1, %s3985_s29  }
 0x54d   : > { %p21_p4 = scmp.ge.s32.totalorder %s24_s29, 4  }
 0x54f   :  { %23 = sbr.rel (!%p21_p4) target bundleno = 1 (0x1), region = 107 }

</bundles_post_ra>
